<compile_context>
chip_gen: v7x
topology: tpu7x:2x2x1
jax: 0.10.0
libtpu: 0.0.40
codegen_flags: <defaults>
</compile_context>

<pallas_src>
from functools import partial

import numpy as np
import jax
import jax.numpy as jnp
from jax.experimental import pallas as pl
from jax.experimental.pallas import tpu as pltpu

LANES = 128
VMEM_LIMIT = 48 * 1024 * 1024   # explicit scoped VMEM budget (fits v5e/v6e/v7x)


def getpadding(k, s, p, d):
    if isinstance(p, int):
        return p
    if p == 'same':
        if s == 1:
            p = (k - 1) // 2
        if s > 1:
            p = int(np.ceil((k - s) / 2))
    if p == 'valid':
        p = 0
    if d != 1:
        p = d * (k // 2)
    return p


def _round_up(x, m):
    return (x + m - 1) // m * m


# ---------------------- fused stride-1 conv+BN+ReLU kernel ---------------------- #
def _fused_conv_bn_relu_kernel(x_ref, w_ref, b_ref, o_ref, *, k, Ho, Wo):
    # x_ref: (1, Hp, Wp, C_in)   bf16  spatially padded input image (one batch element)
    # w_ref: (k*k, C_in, Tco)    bf16  conv weight taps, BN scale pre-folded into Tco
    # b_ref: (1, Tco)            f32   folded BN bias
    # o_ref: (1, Ho, Wo, Tco)    f32   output block
    c_in = x_ref.shape[3]
    t_co = o_ref.shape[3]
    acc = jnp.zeros((Ho, Wo, t_co), jnp.float32)
    # k*k is a small static trip count -> unrolled tap loop. Each tap is a batched
    # (Wo, C_in) @ (C_in, Tco) MXU matmul over the Ho output rows, accumulated in f32.
    # Patch extraction happens in VMEM via shifted window loads (no im2col in HBM).
    for t in range(k * k):
        i, j = divmod(t, k)
        xs = x_ref[0, i:i + Ho, j:j + Wo, :]                       # (Ho, Wo, C_in) bf16
        wt = jnp.broadcast_to(w_ref[t], (Ho, c_in, t_co))          # (Ho, C_in, Tco) bf16
        acc = acc + jax.lax.dot_general(
            xs, wt, (((2,), (1,)), ((0,), (0,))),
            preferred_element_type=jnp.float32)                    # (Ho, Wo, Tco) f32
    y = acc + b_ref[...][None]                                     # f32 epilogue
    o_ref[0] = jnp.maximum(y, 0.0).astype(o_ref.dtype)


def _conv_bn_relu_stride1(x_nhwc, w_khkwio, bias, k, pad):
    """Fused conv+BN+ReLU for stride 1 (in-kernel patch extraction).

    x_nhwc:    (N, H, W, C_in) f32
    w_khkwio:  (k, k, C_in, C_out) f32 with the BN scale already folded into C_out
    bias:      (C_out,) f32 folded BN bias
    Returns (N, Ho, Wo, C_out) f32.
    """
    N, H, W, C_in = x_nhwc.shape
    C_out = w_khkwio.shape[-1]
    Hp, Wp = H + 2 * pad, W + 2 * pad
    Ho, Wo = Hp - k + 1, Wp - k + 1

    C_pad = _round_up(C_out, LANES)       # lane-dense output stores
    tile_co = LANES                       # TODO(synk): 256-wide C_out tiles on v6e/v7x

    x_p = jnp.pad(x_nhwc, ((0, 0), (pad, pad), (pad, pad), (0, 0))).astype(jnp.bfloat16)
    w = w_khkwio.reshape(k * k, C_in, C_out)
    w = jnp.pad(w, ((0, 0), (0, 0), (0, C_pad - C_out))).astype(jnp.bfloat16)
    b = jnp.pad(bias, (0, C_pad - C_out)).reshape(1, C_pad).astype(jnp.float32)

    kernel = partial(_fused_conv_bn_relu_kernel, k=k, Ho=Ho, Wo=Wo)
    out = pl.pallas_call(
        kernel,
        out_shape=jax.ShapeDtypeStruct((N, Ho, Wo, C_pad), jnp.float32),
        grid_spec=pltpu.PrefetchScalarGridSpec(
            num_scalar_prefetch=0,
            grid=(N, C_pad // tile_co),
            in_specs=[
                pl.BlockSpec((1, Hp, Wp, C_in), lambda n, c: (n, 0, 0, 0)),
                pl.BlockSpec((k * k, C_in, tile_co), lambda n, c: (0, 0, c)),
                pl.BlockSpec((1, tile_co), lambda n, c: (0, c)),
            ],
            out_specs=pl.BlockSpec((1, Ho, Wo, tile_co), lambda n, c: (n, 0, 0, c)),
        ),
        compiler_params=pltpu.CompilerParams(
            dimension_semantics=("parallel", "parallel"),
            vmem_limit_bytes=VMEM_LIMIT),
    )(x_p, w, b)
    # TODO(synk): for large images also tile Ho (needs overlapping input row windows).
    return out[..., :C_out]


# ---------------- generic matmul+bias+ReLU kernel (used for stride > 1) --------- #
def _matmul_bias_relu_kernel(p_ref, w_ref, b_ref, o_ref):
    # p_ref: (Tm, K) bf16   w_ref: (K, Tn) bf16 (BN scale folded)   b_ref: (1, Tn) f32
    acc = jnp.dot(p_ref[...], w_ref[...], preferred_element_type=jnp.float32)
    o_ref[...] = jnp.maximum(acc + b_ref[...], 0.0).astype(o_ref.dtype)


def _matmul_bias_relu(patches, w2d, bias2d, tile_m=512, tile_n=LANES):
    """patches (M,K) bf16 @ w2d (K,Cp) bf16 + bias2d (1,Cp) f32 -> ReLU, f32 (M,Cp)."""
    M, K = patches.shape
    Cp = w2d.shape[1]
    tile_m = min(tile_m, _round_up(M, 8))
    M_pad = _round_up(M, tile_m)
    if M_pad != M:
        patches = jnp.pad(patches, ((0, M_pad - M), (0, 0)))
    out = pl.pallas_call(
        _matmul_bias_relu_kernel,
        out_shape=jax.ShapeDtypeStruct((M_pad, Cp), jnp.float32),
        grid_spec=pltpu.PrefetchScalarGridSpec(
            num_scalar_prefetch=0,
            grid=(M_pad // tile_m, Cp // tile_n),
            in_specs=[
                pl.BlockSpec((tile_m, K), lambda i, j: (i, 0)),
                pl.BlockSpec((K, tile_n), lambda i, j: (0, j)),
                pl.BlockSpec((1, tile_n), lambda i, j: (0, j)),
            ],
            out_specs=pl.BlockSpec((tile_m, tile_n), lambda i, j: (i, j)),
        ),
        compiler_params=pltpu.CompilerParams(
            dimension_semantics=("parallel", "parallel"),
            vmem_limit_bytes=VMEM_LIMIT),
    )(patches, w2d, bias2d)
    # TODO(synk): for large K = k*k*C_in add a K reduction grid axis ('arbitrary', last)
    # with an f32 VMEM accumulator to bound per-step VMEM.
    return out[:M]


def _extract_patches_nhwc(x_nhwc, k, s, pad):
    """im2col (glue, stride>1 fallback only): (N, Ho, Wo, k*k*C), feature order (kh,kw,c)."""
    x_p = jnp.pad(x_nhwc, ((0, 0), (pad, pad), (pad, pad), (0, 0)))
    N, Hp, Wp, C = x_p.shape
    Ho = (Hp - k) // s + 1
    Wo = (Wp - k) // s + 1
    pieces = []
    for i in range(k):
        for j in range(k):
            pieces.append(
                x_p[:, i:i + (Ho - 1) * s + 1:s, j:j + (Wo - 1) * s + 1:s, :])
    patches = jnp.stack(pieces, axis=3)              # (N, Ho, Wo, k*k, C)
    return patches.reshape(N, Ho, Wo, k * k * C), Ho, Wo


# ---------------------------------- module ------------------------------------- #
class BasicConv2dPallas:
    """Mirrors models/common.py::BasicConv2d forward (eval-mode BatchNorm)."""

    def __init__(self, in_chans, out_chans, k=1, s=1, p='same', d=1, g=1,
                 key=jax.random.PRNGKey(0)):
        assert d == 1 and g == 1, "only dilation=1, groups=1 supported"
        self.k, self.s = k, s
        self.pad = getpadding(k, s, p, d)
        self.in_chans, self.out_chans = in_chans, out_chans

        kw_key, g_key, b_key, m_key, v_key = jax.random.split(key, 5)
        fan_in = in_chans * k * k
        bound = 1.0 / np.sqrt(fan_in)
        self.weight = jax.random.uniform(
            kw_key, (out_chans, in_chans, k, k), jnp.float32, -bound, bound)
        self.gamma = 1.0 + 0.1 * jax.random.normal(g_key, (out_chans,), jnp.float32)
        self.beta = 0.1 * jax.random.normal(b_key, (out_chans,), jnp.float32)
        self.running_mean = 0.1 * jax.random.normal(m_key, (out_chans,), jnp.float32)
        self.running_var = 1.0 + 0.1 * jax.random.uniform(v_key, (out_chans,),
                                                          jnp.float32)
        self.eps = 1e-5

    def __call__(self, x_nchw):
        x = x_nchw.astype(jnp.float32)
        N, C, H, W = x.shape
        assert C == self.in_chans
        k, s, pad = self.k, self.s, self.pad
        C_out = self.out_chans

        # Inference-mode BN -> per-channel (scale, bias); scale folded into the conv
        # weight once so the kernel epilogue is bias-add + ReLU only.
        scale = self.gamma / jnp.sqrt(self.running_var + self.eps)
        bias = self.beta - self.running_mean * scale
        w_khkwio = jnp.transpose(self.weight, (2, 3, 1, 0)) * scale    # (k,k,I,O)

        # TODO(synk): public API stays NCHW to match PyTorch; keeping activations NHWC
        # across layers would remove these two transpose passes.
        x_nhwc = jnp.transpose(x, (0, 2, 3, 1))

        if s == 1:
            out = _conv_bn_relu_stride1(x_nhwc, w_khkwio, bias, k, pad)
        else:
            # TODO(synk): stride>1 path still builds im2col in HBM (not the hot default).
            patches, Ho, Wo = _extract_patches_nhwc(x_nhwc, k, s, pad)
            M = N * Ho * Wo
            C_pad = _round_up(C_out, LANES)
            p2 = patches.reshape(M, k * k * C).astype(jnp.bfloat16)
            w2 = jnp.pad(w_khkwio.reshape(k * k * C, C_out),
                         ((0, 0), (0, C_pad - C_out))).astype(jnp.bfloat16)
            b2 = jnp.pad(bias, (0, C_pad - C_out)).reshape(1, C_pad).astype(jnp.float32)
            out2 = _matmul_bias_relu(p2, w2, b2)
            out = out2[:, :C_out].reshape(N, Ho, Wo, C_out)
        return jnp.transpose(out, (0, 3, 1, 2))      # NCHW


# ----------------------------------- demo -------------------------------------- #
if __name__ == "__main__":
    key = jax.random.PRNGKey(0)
    xkey, pkey1, pkey2 = jax.random.split(key, 3)

    N, C_in, H, W = 2, 4, 16, 16
    C_out, k = 8, 3
    x = jax.random.normal(xkey, (N, C_in, H, W), jnp.float32)

    def reference(mod, xin, stride):
        # Same operand rounding as the kernel (bf16 inputs / scale-folded bf16 weights,
        # f32 accumulation) so only accumulation-order noise remains.
        scale = mod.gamma / jnp.sqrt(mod.running_var + mod.eps)
        bias = (mod.beta - mod.running_mean * scale).reshape(1, -1, 1, 1)
        xb = xin.astype(jnp.bfloat16).astype(jnp.float32)
        wb = (mod.weight * scale.reshape(-1, 1, 1, 1)
              ).astype(jnp.bfloat16).astype(jnp.float32)
        y = jax.lax.conv_general_dilated(
            xb, wb, window_strides=(stride, stride),
            padding=[(mod.pad, mod.pad), (mod.pad, mod.pad)],
            dimension_numbers=("NCHW", "OIHW", "NCHW"))
        return jnp.maximum(y + bias, 0.0)

    # Default stride-1 path: fused in-kernel patch extraction.
    mod1 = BasicConv2dPallas(C_in, C_out, k=k, s=1, p='same', key=pkey1)
    y1 = jax.block_until_ready(mod1(x))
    assert y1.shape == (N, C_out, H, W), y1.shape
    assert jnp.allclose(y1, reference(mod1, x, 1), atol=2e-2, rtol=2e-2), "s=1 mismatch"

    # Strided path: im2col + fused matmul/bias/ReLU kernel.
    mod2 = BasicConv2dPallas(C_in, C_out, k=k, s=2, p='same', key=pkey2)
    y2 = jax.block_until_ready(mod2(x))
    ref2 = reference(mod2, x, 2)
    assert y2.shape == ref2.shape, (y2.shape, ref2.shape)
    assert jnp.allclose(y2, ref2, atol=2e-2, rtol=2e-2), "s=2 mismatch"

    print("KERNEL_OK")
</pallas_src>

<mosaic_0001>
module attributes {stable_mosaic.version = 11 : i64} {
  func.func @_fused_conv_bn_relu_kernel(%arg0: i32, %arg1: i32, %arg2: memref<1x18x18x4xbf16, #tpu.memory_space<vmem>>, %arg3: memref<9x4x128xbf16, #tpu.memory_space<vmem>>, %arg4: memref<1x128xf32, #tpu.memory_space<vmem>>, %arg5: memref<1x16x16x128xf32, #tpu.memory_space<vmem>>) attributes {dimension_semantics = [#tpu.dimension_semantics<parallel>, #tpu.dimension_semantics<parallel>], iteration_bounds = array<i64: 2, 1>, scalar_prefetch = 0 : i64, scratch_operands = 0 : i64, tpu.core_type = #tpu.core_type<tc>, window_params = [{transform_indices = @transform_0, window_bounds = array<i64: 1, 18, 18, 4>}, {transform_indices = @transform_1, window_bounds = array<i64: 9, 4, 128>}, {transform_indices = @transform_2, window_bounds = array<i64: 1, 128>}, {transform_indices = @transform_3, window_bounds = array<i64: 1, 16, 16, 128>}]} {
    %cst = arith.constant 0.000000e+00 : f32
    %0 = vector.broadcast %cst : f32 to vector<16x16x128xf32>
    %c0 = arith.constant 0 : index
    %c0_0 = arith.constant 0 : index
    %c0_1 = arith.constant 0 : index
    %c0_2 = arith.constant 0 : index
    %1 = vector.load %arg2[%c0, %c0_0, %c0_1, %c0_2] : memref<1x18x18x4xbf16, #tpu.memory_space<vmem>>, vector<1x16x16x4xbf16>
    %2 = vector.shape_cast %1 : vector<1x16x16x4xbf16> to vector<16x16x4xbf16>
    %c0_3 = arith.constant 0 : index
    %c0_4 = arith.constant 0 : index
    %c0_5 = arith.constant 0 : index
    %3 = vector.load %arg3[%c0_3, %c0_4, %c0_5] : memref<9x4x128xbf16, #tpu.memory_space<vmem>>, vector<1x4x128xbf16>
    %4 = vector.shape_cast %3 : vector<1x4x128xbf16> to vector<4x128xbf16>
    %5 = vector.shape_cast %4 : vector<4x128xbf16> to vector<1x4x128xbf16>
    %6 = vector.broadcast %5 : vector<1x4x128xbf16> to vector<16x4x128xbf16>
    %cst_6 = arith.constant dense<0.000000e+00> : vector<16x16x128xf32>
    %7 = tpu.matmul %2, %6, %cst_6 {dimension_numbers = #tpu.dot_dimension_numbers<[2], [1], [1], [2], [0, 0, 0, 1, 1, 2], [0], [0]>} : vector<16x16x4xbf16>, vector<16x4x128xbf16>, vector<16x16x128xf32> -> vector<16x16x128xf32>
    %8 = arith.addf %0, %7 : vector<16x16x128xf32>
    %c0_7 = arith.constant 0 : index
    %c0_8 = arith.constant 0 : index
    %c1 = arith.constant 1 : index
    %c0_9 = arith.constant 0 : index
    %9 = vector.load %arg2[%c0_7, %c0_8, %c1, %c0_9] : memref<1x18x18x4xbf16, #tpu.memory_space<vmem>>, vector<1x16x16x4xbf16>
    %10 = vector.shape_cast %9 : vector<1x16x16x4xbf16> to vector<16x16x4xbf16>
    %c1_10 = arith.constant 1 : index
    %c0_11 = arith.constant 0 : index
    %c0_12 = arith.constant 0 : index
    %11 = vector.load %arg3[%c1_10, %c0_11, %c0_12] : memref<9x4x128xbf16, #tpu.memory_space<vmem>>, vector<1x4x128xbf16>
    %12 = vector.shape_cast %11 : vector<1x4x128xbf16> to vector<4x128xbf16>
    %13 = vector.shape_cast %12 : vector<4x128xbf16> to vector<1x4x128xbf16>
    %14 = vector.broadcast %13 : vector<1x4x128xbf16> to vector<16x4x128xbf16>
    %cst_13 = arith.constant dense<0.000000e+00> : vector<16x16x128xf32>
    %15 = tpu.matmul %10, %14, %cst_13 {dimension_numbers = #tpu.dot_dimension_numbers<[2], [1], [1], [2], [0, 0, 0, 1, 1, 2], [0], [0]>} : vector<16x16x4xbf16>, vector<16x4x128xbf16>, vector<16x16x128xf32> -> vector<16x16x128xf32>
    %16 = arith.addf %8, %15 : vector<16x16x128xf32>
    %c0_14 = arith.constant 0 : index
    %c0_15 = arith.constant 0 : index
    %c2 = arith.constant 2 : index
    %c0_16 = arith.constant 0 : index
    %17 = vector.load %arg2[%c0_14, %c0_15, %c2, %c0_16] : memref<1x18x18x4xbf16, #tpu.memory_space<vmem>>, vector<1x16x16x4xbf16>
    %18 = vector.shape_cast %17 : vector<1x16x16x4xbf16> to vector<16x16x4xbf16>
    %c2_17 = arith.constant 2 : index
    %c0_18 = arith.constant 0 : index
    %c0_19 = arith.constant 0 : index
    %19 = vector.load %arg3[%c2_17, %c0_18, %c0_19] : memref<9x4x128xbf16, #tpu.memory_space<vmem>>, vector<1x4x128xbf16>
    %20 = vector.shape_cast %19 : vector<1x4x128xbf16> to vector<4x128xbf16>
    %21 = vector.shape_cast %20 : vector<4x128xbf16> to vector<1x4x128xbf16>
    %22 = vector.broadcast %21 : vector<1x4x128xbf16> to vector<16x4x128xbf16>
    %cst_20 = arith.constant dense<0.000000e+00> : vector<16x16x128xf32>
    %23 = tpu.matmul %18, %22, %cst_20 {dimension_numbers = #tpu.dot_dimension_numbers<[2], [1], [1], [2], [0, 0, 0, 1, 1, 2], [0], [0]>} : vector<16x16x4xbf16>, vector<16x4x128xbf16>, vector<16x16x128xf32> -> vector<16x16x128xf32>
    %24 = arith.addf %16, %23 : vector<16x16x128xf32>
    %c0_21 = arith.constant 0 : index
    %c1_22 = arith.constant 1 : index
    %c0_23 = arith.constant 0 : index
    %c0_24 = arith.constant 0 : index
    %25 = vector.load %arg2[%c0_21, %c1_22, %c0_23, %c0_24] : memref<1x18x18x4xbf16, #tpu.memory_space<vmem>>, vector<1x16x16x4xbf16>
    %26 = vector.shape_cast %25 : vector<1x16x16x4xbf16> to vector<16x16x4xbf16>
    %c3 = arith.constant 3 : index
    %c0_25 = arith.constant 0 : index
    %c0_26 = arith.constant 0 : index
    %27 = vector.load %arg3[%c3, %c0_25, %c0_26] : memref<9x4x128xbf16, #tpu.memory_space<vmem>>, vector<1x4x128xbf16>
    %28 = vector.shape_cast %27 : vector<1x4x128xbf16> to vector<4x128xbf16>
    %29 = vector.shape_cast %28 : vector<4x128xbf16> to vector<1x4x128xbf16>
    %30 = vector.broadcast %29 : vector<1x4x128xbf16> to vector<16x4x128xbf16>
    %cst_27 = arith.constant dense<0.000000e+00> : vector<16x16x128xf32>
    %31 = tpu.matmul %26, %30, %cst_27 {dimension_numbers = #tpu.dot_dimension_numbers<[2], [1], [1], [2], [0, 0, 0, 1, 1, 2], [0], [0]>} : vector<16x16x4xbf16>, vector<16x4x128xbf16>, vector<16x16x128xf32> -> vector<16x16x128xf32>
    %32 = arith.addf %24, %31 : vector<16x16x128xf32>
    %c0_28 = arith.constant 0 : index
    %c1_29 = arith.constant 1 : index
    %c1_30 = arith.constant 1 : index
    %c0_31 = arith.constant 0 : index
    %33 = vector.load %arg2[%c0_28, %c1_29, %c1_30, %c0_31] : memref<1x18x18x4xbf16, #tpu.memory_space<vmem>>, vector<1x16x16x4xbf16>
    %34 = vector.shape_cast %33 : vector<1x16x16x4xbf16> to vector<16x16x4xbf16>
    %c4 = arith.constant 4 : index
    %c0_32 = arith.constant 0 : index
    %c0_33 = arith.constant 0 : index
    %35 = vector.load %arg3[%c4, %c0_32, %c0_33] : memref<9x4x128xbf16, #tpu.memory_space<vmem>>, vector<1x4x128xbf16>
    %36 = vector.shape_cast %35 : vector<1x4x128xbf16> to vector<4x128xbf16>
    %37 = vector.shape_cast %36 : vector<4x128xbf16> to vector<1x4x128xbf16>
    %38 = vector.broadcast %37 : vector<1x4x128xbf16> to vector<16x4x128xbf16>
    %cst_34 = arith.constant dense<0.000000e+00> : vector<16x16x128xf32>
    %39 = tpu.matmul %34, %38, %cst_34 {dimension_numbers = #tpu.dot_dimension_numbers<[2], [1], [1], [2], [0, 0, 0, 1, 1, 2], [0], [0]>} : vector<16x16x4xbf16>, vector<16x4x128xbf16>, vector<16x16x128xf32> -> vector<16x16x128xf32>
    %40 = arith.addf %32, %39 : vector<16x16x128xf32>
    %c0_35 = arith.constant 0 : index
    %c1_36 = arith.constant 1 : index
    %c2_37 = arith.constant 2 : index
    %c0_38 = arith.constant 0 : index
    %41 = vector.load %arg2[%c0_35, %c1_36, %c2_37, %c0_38] : memref<1x18x18x4xbf16, #tpu.memory_space<vmem>>, vector<1x16x16x4xbf16>
    %42 = vector.shape_cast %41 : vector<1x16x16x4xbf16> to vector<16x16x4xbf16>
    %c5 = arith.constant 5 : index
    %c0_39 = arith.constant 0 : index
    %c0_40 = arith.constant 0 : index
    %43 = vector.load %arg3[%c5, %c0_39, %c0_40] : memref<9x4x128xbf16, #tpu.memory_space<vmem>>, vector<1x4x128xbf16>
    %44 = vector.shape_cast %43 : vector<1x4x128xbf16> to vector<4x128xbf16>
    %45 = vector.shape_cast %44 : vector<4x128xbf16> to vector<1x4x128xbf16>
    %46 = vector.broadcast %45 : vector<1x4x128xbf16> to vector<16x4x128xbf16>
    %cst_41 = arith.constant dense<0.000000e+00> : vector<16x16x128xf32>
    %47 = tpu.matmul %42, %46, %cst_41 {dimension_numbers = #tpu.dot_dimension_numbers<[2], [1], [1], [2], [0, 0, 0, 1, 1, 2], [0], [0]>} : vector<16x16x4xbf16>, vector<16x4x128xbf16>, vector<16x16x128xf32> -> vector<16x16x128xf32>
    %48 = arith.addf %40, %47 : vector<16x16x128xf32>
    %c0_42 = arith.constant 0 : index
    %c2_43 = arith.constant 2 : index
    %c0_44 = arith.constant 0 : index
    %c0_45 = arith.constant 0 : index
    %49 = vector.load %arg2[%c0_42, %c2_43, %c0_44, %c0_45] : memref<1x18x18x4xbf16, #tpu.memory_space<vmem>>, vector<1x16x16x4xbf16>
    %50 = vector.shape_cast %49 : vector<1x16x16x4xbf16> to vector<16x16x4xbf16>
    %c6 = arith.constant 6 : index
    %c0_46 = arith.constant 0 : index
    %c0_47 = arith.constant 0 : index
    %51 = vector.load %arg3[%c6, %c0_46, %c0_47] : memref<9x4x128xbf16, #tpu.memory_space<vmem>>, vector<1x4x128xbf16>
    %52 = vector.shape_cast %51 : vector<1x4x128xbf16> to vector<4x128xbf16>
    %53 = vector.shape_cast %52 : vector<4x128xbf16> to vector<1x4x128xbf16>
    %54 = vector.broadcast %53 : vector<1x4x128xbf16> to vector<16x4x128xbf16>
    %cst_48 = arith.constant dense<0.000000e+00> : vector<16x16x128xf32>
    %55 = tpu.matmul %50, %54, %cst_48 {dimension_numbers = #tpu.dot_dimension_numbers<[2], [1], [1], [2], [0, 0, 0, 1, 1, 2], [0], [0]>} : vector<16x16x4xbf16>, vector<16x4x128xbf16>, vector<16x16x128xf32> -> vector<16x16x128xf32>
    %56 = arith.addf %48, %55 : vector<16x16x128xf32>
    %c0_49 = arith.constant 0 : index
    %c2_50 = arith.constant 2 : index
    %c1_51 = arith.constant 1 : index
    %c0_52 = arith.constant 0 : index
    %57 = vector.load %arg2[%c0_49, %c2_50, %c1_51, %c0_52] : memref<1x18x18x4xbf16, #tpu.memory_space<vmem>>, vector<1x16x16x4xbf16>
    %58 = vector.shape_cast %57 : vector<1x16x16x4xbf16> to vector<16x16x4xbf16>
    %c7 = arith.constant 7 : index
    %c0_53 = arith.constant 0 : index
    %c0_54 = arith.constant 0 : index
    %59 = vector.load %arg3[%c7, %c0_53, %c0_54] : memref<9x4x128xbf16, #tpu.memory_space<vmem>>, vector<1x4x128xbf16>
    %60 = vector.shape_cast %59 : vector<1x4x128xbf16> to vector<4x128xbf16>
    %61 = vector.shape_cast %60 : vector<4x128xbf16> to vector<1x4x128xbf16>
    %62 = vector.broadcast %61 : vector<1x4x128xbf16> to vector<16x4x128xbf16>
    %cst_55 = arith.constant dense<0.000000e+00> : vector<16x16x128xf32>
    %63 = tpu.matmul %58, %62, %cst_55 {dimension_numbers = #tpu.dot_dimension_numbers<[2], [1], [1], [2], [0, 0, 0, 1, 1, 2], [0], [0]>} : vector<16x16x4xbf16>, vector<16x4x128xbf16>, vector<16x16x128xf32> -> vector<16x16x128xf32>
    %64 = arith.addf %56, %63 : vector<16x16x128xf32>
    %c0_56 = arith.constant 0 : index
    %c2_57 = arith.constant 2 : index
    %c2_58 = arith.constant 2 : index
    %c0_59 = arith.constant 0 : index
    %65 = vector.load %arg2[%c0_56, %c2_57, %c2_58, %c0_59] : memref<1x18x18x4xbf16, #tpu.memory_space<vmem>>, vector<1x16x16x4xbf16>
    %66 = vector.shape_cast %65 : vector<1x16x16x4xbf16> to vector<16x16x4xbf16>
    %c8 = arith.constant 8 : index
    %c0_60 = arith.constant 0 : index
    %c0_61 = arith.constant 0 : index
    %67 = vector.load %arg3[%c8, %c0_60, %c0_61] : memref<9x4x128xbf16, #tpu.memory_space<vmem>>, vector<1x4x128xbf16>
    %68 = vector.shape_cast %67 : vector<1x4x128xbf16> to vector<4x128xbf16>
    %69 = vector.shape_cast %68 : vector<4x128xbf16> to vector<1x4x128xbf16>
    %70 = vector.broadcast %69 : vector<1x4x128xbf16> to vector<16x4x128xbf16>
    %cst_62 = arith.constant dense<0.000000e+00> : vector<16x16x128xf32>
    %71 = tpu.matmul %66, %70, %cst_62 {dimension_numbers = #tpu.dot_dimension_numbers<[2], [1], [1], [2], [0, 0, 0, 1, 1, 2], [0], [0]>} : vector<16x16x4xbf16>, vector<16x4x128xbf16>, vector<16x16x128xf32> -> vector<16x16x128xf32>
    %72 = arith.addf %64, %71 : vector<16x16x128xf32>
    %c0_63 = arith.constant 0 : index
    %c0_64 = arith.constant 0 : index
    %73 = vector.load %arg4[%c0_63, %c0_64] : memref<1x128xf32, #tpu.memory_space<vmem>>, vector<1x128xf32>
    %74 = vector.shape_cast %73 : vector<1x128xf32> to vector<1x1x128xf32>
    %75 = vector.broadcast %74 : vector<1x1x128xf32> to vector<16x16x128xf32>
    %76 = arith.addf %72, %75 : vector<16x16x128xf32>
    %cst_65 = arith.constant 0.000000e+00 : f32
    %77 = vector.broadcast %cst_65 : f32 to vector<16x16x128xf32>
    %78 = arith.maximumf %76, %77 : vector<16x16x128xf32>
    %c0_66 = arith.constant 0 : index
    %c0_67 = arith.constant 0 : index
    %c0_68 = arith.constant 0 : index
    %c0_69 = arith.constant 0 : index
    %79 = vector.load %arg5[%c0_66, %c0_67, %c0_68, %c0_69] : memref<1x16x16x128xf32, #tpu.memory_space<vmem>>, vector<1x16x16x128xf32>
    %80 = vector.shape_cast %79 : vector<1x16x16x128xf32> to vector<16x16x128xf32>
    %81 = vector.shape_cast %78 : vector<16x16x128xf32> to vector<1x16x16x128xf32>
    tpu.vector_store %arg5[%c0_66, %c0_67, %c0_68, %c0_69], %81 {strides = array<i32>} : memref<1x16x16x128xf32, #tpu.memory_space<vmem>>, vector<1x16x16x128xf32>,
    return
  }
  func.func @transform_0(%arg0: i32, %arg1: i32) -> (i32, i32, i32, i32) {
    %c0_i32 = arith.constant 0 : i32
    %c0_i32_0 = arith.constant 0 : i32
    %c0_i32_1 = arith.constant 0 : i32
    %c0_i32_2 = arith.constant 0 : i32
    return %arg0, %c0_i32, %c0_i32_0, %c0_i32_1 : i32, i32, i32, i32
  }
  func.func @transform_1(%arg0: i32, %arg1: i32) -> (i32, i32, i32) {
    %c0_i32 = arith.constant 0 : i32
    %c0_i32_0 = arith.constant 0 : i32
    %c0_i32_1 = arith.constant 0 : i32
    return %c0_i32, %c0_i32_0, %arg1 : i32, i32, i32
  }
  func.func @transform_2(%arg0: i32, %arg1: i32) -> (i32, i32) {
    %c0_i32 = arith.constant 0 : i32
    %c0_i32_0 = arith.constant 0 : i32
    return %c0_i32, %arg1 : i32, i32
  }
  func.func @transform_3(%arg0: i32, %arg1: i32) -> (i32, i32, i32, i32) {
    %c0_i32 = arith.constant 0 : i32
    %c0_i32_0 = arith.constant 0 : i32
    %c0_i32_1 = arith.constant 0 : i32
    return %arg0, %c0_i32, %c0_i32_0, %arg1 : i32, i32, i32, i32
  }
}

</mosaic_0001>

<bundles_post_ra>
// kernel: tpu_custom_call.1
= control target key start
LH: loop header
LB: loop body
LE: loop exit
PB: predicated region body
PF: predicated region fallthrough
CT: control target
= control target key end

     0   :  { %8 = vsyncpa [#allocation3], 0  ;;  %s13350_s0 = inlined_call_operand.vmem [shape: bf16[2,18,18,4], index: 0, kind: input, shape index: {}]   ;;  %s13351_s1 = inlined_call_operand.vmem [shape: bf16[9,4,128], index: 1, kind: input, shape index: {}]   ;;  %s13352_s2 = inlined_call_operand.vmem [shape: f32[1,128], index: 2, kind: input, shape index: {}]   ;;  %s13353_s3 = inlined_call_operand.hbm [shape: f32[2,16,16,128], index: 3, kind: output, shape index: {}]  }
   0x1   :  { %10 = vsyncpa [#allocation3 + $0x1], 0  ;;  %s10719_s12 = smov 0   ;;  %s10721_s13 = smov 0  }
   0x2   :  { %s10723_s14 = smov 0   ;;  %s10725_s15 = smov 0  }
   0x3   :  { %s10727_s16 = smov 0   ;;  %s10729_s17 = smov 0  }
   0x4 LB: > { %s8690_s18 = sadd.s32 4294967295, %s10692_s17   ;;  %s8691_s19 = sadd.s32 4294967294, %s10692_s17   ;;  %s10692_s17 = sphi %s10729_s17, %s16_s17   ;;  %s10688_s16 = sphi %s10727_s16, %s13569_s16   ;;  %s10684_s15 = sphi %s10725_s15, %s13568_s15   ;;  %s10680_s14 = sphi %s10723_s14, %s13567_s14   ;;  %s10676_s13 = sphi %s10721_s13, %s13566_s13   ;;  %s10672_s12 = sphi %s10719_s12, %s13565_s12  }
   0x5   : > { %s28_s20 = sadd.s32 1, %s10688_s16  ;;  %s115_s21 = sadd.s32 1, %s10680_s14 }
   0x6   : > { %p30_p0 = scmp.ge.s32.totalorder %s28_s20, 2  ;;  %p125_p1 = scmp.ne.s32.totalorder %s10680_s14, %s10676_s13 }
   0x7   : > { %p126_p2 = scmp.eq.s32.totalorder %s8690_s18, 1  ;;  %p131_p3 = scmp.ne.s32.totalorder %s10676_s13, %s10672_s12 }
   0x8   : > { %s13571_s20 = smov (%p30_p0, %s28_s20), 0  ;;  %p132_p5 = scmp.eq.s32.totalorder %s8691_s19, 1 }
   0x9   : > { %p10759_p4 = por %p126_p2, %p125_p1  ;;  %s110_s23 = ssub.s32 %s10688_s16, %s13571_s20 }
   0xa   : > { %p8696_p6 = scmp.ge.s32.totalorder %s10692_s17, 1  ;;  %p113_p7 = scmp.eq.s32.totalorder %s110_s23, 0 }
   0xb   : > { %p10766_p8 = por %p132_p5, %p131_p3  ;;  %p171_p9 = scmp.lt.s32.totalorder %s10692_s17, 3 }
   0xc   : > { %s10772_s25 = scalar_select %p113_p7, %s10680_s14, %s115_s21  }
   0xd   : > { %p172_p10 = pnand %p8696_p6, %p171_p9 }
   0xf   : > { %175 = sbr.rel (%p172_p10) target bundleno = 844 (0x34c), region = 32 }
  0x16   : > { %v8699_v0 = vld [vmem:[%s13351_s1 + $0x2] sm:$0x3]  ;;  %vm291_vm0 = vcmask 1041408   ;;  %p202_p11 = scmp.lt.s32.totalorder %s10684_s15, 1  ;;  %v13354_v1 = vmov 0.0   ;;  %vm10695_vm1 = vmmov 0  }
  0x17   : > { %9514 = vmatprep.subr.bf16.mxu0 %v13354_v1  ;;  %9520 = vmatprep.subr.bf16.mxu1 %v13354_v1  ;;  %v10781_v2 = vsel %vm291_vm0, %v8699_v0, 0  ;;  %vm274_vm2 = vsmask.f32 7424  ;;  %vm287_vm3 = vcmask 31744   ;;  %vm2008_vm4 = vcmask 1046528   ;;  %s9225_s10 = sshll.u32 %s10684_s15, 12 }
  0x18   : > { %9515 = vmatpush3.bf16.msra.mxu0 %v10781_v2  ;;  %9521 = vmatpush3.bf16.msra.mxu1 %v10781_v2  ;;  %s203_s28 = scalar_select %p202_p11, %s10684_s15, 1 }
  0x19   : > { %9516 = vmatprep.mubr.msk.bf16.mxu0 %vm10695_vm1, %v13354_v1  ;;  %9522 = vmatprep.mubr.msk.bf16.mxu1 %vm10695_vm1, %v13354_v1  ;;  %s13295_s21 = scalar_lea.hbm %s13353_s3, %s9225_s10  ;;  %s10696_s26 = smov [#allocation2]  }
  0x1a   : > { %9526 = vmatprep.subr.bf16.mxu0 %v13354_v1  ;;  %9532 = vmatprep.subr.bf16.mxu1 %v13354_v1  ;;  %s10378_s29 = smul.u32 216, %s203_s28  ;;  %s10618_s27 = sshll.u32 %s10696_s26, 4  ;;  %s10619_s27 = int_to_ptr.vmem [resolvable:$false] %s10618_s27 }
  0x1b   : > { %s10620_s28 = scalar_lea.vmem %s10619_s27, 8192 }
  0x1c   : > { %s10795_s5 = scalar_lea.vmem %s13350_s0, %s10378_s29 }
  0x1d   : > { %v215_v3 = vld [vmem:[%s10795_s5] sm:$0xf]  ;;  %v10799_v4 = vld [vmem:[%s10795_s5 + $0x4] sm:$0xf]  ;;  %v217_v7 = vld [vmem:[%s10795_s5 + $0xc] sm:$0xf] }
  0x1e   : > { %v10802_v5 = vcombine.low %v215_v3, %v10799_v4  ;;  %v10805_v6 = vld [vmem:[%s10795_s5 + $0x8] ss:$0 sps:$4 sm:$0x11]   ;;  %v10809_v8 = vld [vmem:[%s10795_s5 + $0x10] sm:$0xf] }
  0x1f   : > { %v219_v9 = vld [vmem:[%s10795_s5 + $0x18] sm:$0xf]  ;;  %v283_v12 = vshll.u32 %v10805_v6, 16  ;;  %v10816_v13 = vcombine.low %v217_v7, %v10809_v8  ;;  %v10819_v14 = vld [vmem:[%s10795_s5 + $0x14] ss:$0 sps:$4 sm:$0x11]  }
  0x20   : > { %v276_v10 = vshrl.u32 %v10802_v5, 16  ;;  %v278_v11 = vshll.u32 %v10802_v5, 16  ;;  %v10822_v15 = vld [vmem:[%s10795_s5 + $0x1c] sm:$0xf]  ;;  %v221_v16 = vld [vmem:[%s10795_s5 + $0x24] sm:$0xf] }
  0x21   : > { %v285_v18 = vrot.slane %v283_v12, 1  ;;  %v345_v19 = vshrl.u32 %v10816_v13, 16  ;;  %v347_v20 = vshll.u32 %v10816_v13, 16  ;;  %v10828_v21 = vld [vmem:[%s10795_s5 + $0x28] sm:$0xf]  ;;  %v352_v22 = vshll.u32 %v10819_v14, 16 }
  0x22   : > { %v280_v17 = vrot.slane %v278_v11, 1  ;;  %v10832_v23 = vcombine.low %v219_v9, %v10822_v15  ;;  %v10835_v24 = vld [vmem:[%s10795_s5 + $0x20] ss:$0 sps:$4 sm:$0x11]   ;;  %v10838_v25 = vcombine.low %v221_v16, %v10828_v21  ;;  %v223_v29 = vld [vmem:[%s10795_s5 + $0x30] sm:$0xf] }
  0x23   : > { %v349_v27 = vrot.slane %v347_v20, 1  ;;  %v10841_v28 = vld [vmem:[%s10795_s5 + $0x2c] ss:$0 sps:$4 sm:$0x11]   ;;  %v354_v30 = vrot.slane %v352_v22, 1  ;;  %v416_v33 = vshll.u32 %v10835_v24, 16 }
  0x24   : > { %13404 = vst [vmem:[#allocation5_spill] sm:$0xff] %v10838_v25  ;;  %v281_v26 = vor.u32 %v280_v17, %v276_v10  ;;  %v409_v31 = vshrl.u32 %v10832_v23, 16  ;;  %v411_v32 = vshll.u32 %v10832_v23, 16  ;;  %v10848_v34 = vld [vmem:[%s10795_s5 + $0x34] sm:$0xf]  ;;  %v473_v37 = vshrl.u32 %v10838_v25, 16 }
  0x25   : > { %v350_v36 = vor.u32 %v349_v27, %v345_v19  ;;  %v475_v38 = vshll.u32 %v10838_v25, 16  ;;  %v225_v39 = vld [vmem:[%s10795_s5 + $0x3c] sm:$0xf]  ;;  %v480_v41 = vshll.u32 %v10841_v28, 16  ;;  %v10857_v42 = vcombine.low %v223_v29, %v10848_v34  ;;  %v10867_v47 = vld [vmem:[%s10795_s5 + $0x40] sm:$0xf] }
  0x26   : > { %v286_v35 = vsel %vm274_vm2, %v281_v26, %v285_v18  ;;  %v413_v40 = vrot.slane %v411_v32, 1  ;;  %v10860_v43 = vld [vmem:[%s10795_s5 + $0x38] ss:$0 sps:$4 sm:$0x11]   ;;  %v418_v45 = vrot.slane %v416_v33, 1  ;;  %v10879_v53 = vcombine.low %v225_v39, %v10867_v47 }
  0x27   : > { %9517 = vmatmul.mubr.msk.bf16.vlgmr.msra.gmra.mrb[0].mxu0 %vm287_vm3, %v286_v35  ;;  %13405 = vst [vmem:[#allocation6_spill] sm:$0xff] %v10857_v42  ;;  %v355_v44 = vsel %vm274_vm2, %v350_v36, %v354_v30  ;;  %v477_v46 = vrot.slane %v475_v38, 1  ;;  %v539_v49 = vshll.u32 %v10857_v42, 16  ;;  %v10873_v50 = vld [vmem:[%s10795_s5 + $0x44] ss:$0 sps:$4 sm:$0x11]  }
  0x28   : > { %9527 = vmatpush3.bf16.msra.mxu0 %v10781_v2  ;;  %9528 = vmatprep.mubr.msk.bf16.mxu0 %vm10695_vm1, %v13354_v1  ;;  %v414_v48 = vor.u32 %v413_v40, %v409_v31  ;;  %v482_v52 = vrot.slane %v480_v41, 1  ;;  %13406 = vst [vmem:[#allocation7_spill] sm:$0xff] %v10879_v53  ;;  %v227_v54 = vld [vmem:[%s10795_s5 + $0x48] sm:$0xf]  ;;  %v10883_v55 = vld [vmem:[%s10795_s5 + $0x4c] sm:$0xf] }
  0x29   : > { %9523 = vmatmul.mubr.msk.bf16.vlgmr.msra.gmra.mrb[0].mxu1 %vm287_vm3, %v355_v44  ;;  %9538 = vmatprep.subr.bf16.mxu0 %v13354_v1  ;;  %v478_v51 = vor.u32 %v477_v46, %v473_v37  ;;  %v537_v56 = vshrl.u32 %v10857_v42, 16  ;;  %v544_v57 = vshll.u32 %v10860_v43, 16  ;;  %v229_v58 = vld [vmem:[%s10795_s5 + $0x54] sm:$0xf]  ;;  %v541_v60 = vrot.slane %v539_v49, 1 }
  0x2a   : > { %9533 = vmatpush3.bf16.msra.mxu1 %v10781_v2  ;;  %9534 = vmatprep.mubr.msk.bf16.mxu1 %vm10695_vm1, %v13354_v1  ;;  %v419_v59 = vsel %vm274_vm2, %v414_v48, %v418_v45  ;;  %v603_v61 = vshll.u32 %v10879_v53, 16  ;;  %v10892_v62 = vcombine.low %v227_v54, %v10883_v55  ;;  %v608_v63 = vshll.u32 %v10873_v50, 16  ;;  %v10896_v0 = vld [vmem:[%s10795_s5 + $0x50] ss:$0 sps:$4 sm:$0x11]  }
  0x2b   : > { %9544 = vmatprep.subr.bf16.mxu1 %v13354_v1  ;;  %v10899_v3 = vld [vmem:[%s10795_s5 + $0x58] sm:$0xf]  ;;  %v483_v7 = vsel %vm274_vm2, %v478_v51, %v482_v52  ;;  %v601_v9 = vshrl.u32 %v10879_v53, 16  ;;  %v231_v12 = vld [vmem:[%s10795_s5 + $0x60] sm:$0xf]  ;;  %v542_v18 = vor.u32 %v541_v60, %v537_v56  ;;  %v546_v19 = vrot.slane %v544_v57, 1 }
  0x2c   : > { %13407 = vst [vmem:[#allocation8_spill] sm:$0xff] %v10892_v62  ;;  %v605_v10 = vrot.slane %v603_v61, 1  ;;  %v10904_v11 = vcombine.low %v229_v58, %v10899_v3  ;;  %v10909_v16 = vld [vmem:[%s10795_s5 + $0x5c] ss:$0 sps:$4 sm:$0x11]   ;;  %v667_v20 = vshll.u32 %v10892_v62, 16 }
  0x2d   : > { %v10912_v17 = vld [vmem:[%s10795_s5 + $0x64] sm:$0xf]  ;;  %v10925_v27 = vld [vmem:[%s10795_s5 + $0x68] ss:$0 sps:$4 sm:$0x11]   ;;  %v610_v31 = vrot.slane %v608_v63, 1  ;;  %v547_v38 = vsel %vm274_vm2, %v542_v18, %v546_v19 }
  0x2e   : > { %13408 = vst [vmem:[#allocation9_spill] sm:$0xff] %v10904_v11  ;;  %v731_v22 = vshll.u32 %v10904_v11, 16  ;;  %v10922_v26 = vcombine.low %v231_v12, %v10912_v17  ;;  %v233_v29 = vld [vmem:[%s10795_s5 + $0x6c] sm:$0xf]  ;;  %v606_v30 = vor.u32 %v605_v10, %v601_v9  ;;  %v672_v32 = vshll.u32 %v10896_v0, 16 }
  0x2f   : > { %9529 = vmatmul.mubr.msk.bf16.vlgmr.msra.gmra.mrb[4].mxu0 %vm287_vm3, %v419_v59  ;;  %v10933_v33 = vld [vmem:[%s10795_s5 + $0x70] sm:$0xf]  ;;  %v736_v35 = vshll.u32 %v10909_v16, 16  ;;  %v10939_v37 = vld [vmem:[%s10795_s5 + $0x74] ss:$0 sps:$4 sm:$0x11]  }
  0x30   : > { %9539 = vmatpush3.bf16.msra.mxu0 %v10781_v2  ;;  %9540 = vmatprep.mubr.msk.bf16.mxu0 %vm10695_vm1, %v13354_v1  ;;  %13409 = vst [vmem:[#allocation10_spill] sm:$0xff] %v10922_v26  ;;  %v795_v36 = vshll.u32 %v10922_v26, 16  ;;  %v665_v39 = vshrl.u32 %v10892_v62, 16  ;;  %v669_v40 = vrot.slane %v667_v20, 1  ;;  %v10944_v41 = vcombine.low %v233_v29, %v10933_v33  ;;  %v235_v44 = vld [vmem:[%s10795_s5 + $0x78] sm:$0xf] }
  0x31   : > { %9535 = vmatmul.mubr.msk.bf16.vlgmr.msra.gmra.mrb[4].mxu1 %vm287_vm3, %v483_v7  ;;  %9550 = vmatprep.subr.bf16.mxu0 %v13354_v1  ;;  %v10948_v45 = vld [vmem:[%s10795_s5 + $0x7c] sm:$0xf]  ;;  %v729_v46 = vshrl.u32 %v10904_v11, 16  ;;  %v733_v48 = vrot.slane %v731_v22, 1  ;;  %v237_v51 = vld [vmem:[%s10795_s5 + $0x84] sm:$0xf]  ;;  %v611_v52 = vsel %vm274_vm2, %v606_v30, %v610_v31 }
  0x32   : > { %9545 = vmatpush3.bf16.msra.mxu1 %v10781_v2  ;;  %9546 = vmatprep.mubr.msk.bf16.mxu1 %vm10695_vm1, %v13354_v1  ;;  %13410 = vst [vmem:[#allocation11_spill] sm:$0xff] %v10944_v41  ;;  %v10952_v49 = vcombine.low %v235_v44, %v10948_v45  ;;  %v674_v54 = vrot.slane %v672_v32, 1  ;;  %v859_v56 = vshll.u32 %v10944_v41, 16  ;;  %v738_v58 = vrot.slane %v736_v35, 1  ;;  %v10962_v63 = vld [vmem:[%s10795_s5 + $0x88] sm:$0xf] }
  0x33   : > { %9556 = vmatprep.subr.bf16.mxu1 %v13354_v1  ;;  %v793_v59 = vshrl.u32 %v10922_v26, 16  ;;  %v797_v60 = vrot.slane %v795_v36, 1  ;;  %v800_v61 = vshll.u32 %v10925_v27, 16  ;;  %v670_v7 = vor.u32 %v669_v40, %v665_v39  ;;  %v239_v18 = vld [vmem:[%s10795_s5 + $0x90] sm:$0xf] }
  0x34   : > { %13411 = vst [vmem:[#allocation12_spill] sm:$0xff] %v10952_v49  ;;  %v857_v9 = vshrl.u32 %v10944_v41, 16  ;;  %v864_v10 = vshll.u32 %v10939_v37, 16  ;;  %v10970_v12 = vcombine.low %v237_v51, %v10962_v63  ;;  %v734_v19 = vor.u32 %v733_v48, %v729_v46  ;;  %v10976_v20 = vld [vmem:[%s10795_s5 + $0x80] ss:$0 sps:$4 sm:$0x11]  }
  0x35   : > { %v923_v22 = vshll.u32 %v10952_v49, 16  ;;  %v10980_v29 = vld [vmem:[%s10795_s5 + $0x94] sm:$0xf]  ;;  %v861_v30 = vrot.slane %v859_v56, 1  ;;  %v675_v39 = vsel %vm274_vm2, %v670_v7, %v674_v54  ;;  %v798_v40 = vor.u32 %v797_v60, %v793_v59  ;;  %v10999_v46 = vld [vmem:[%s10795_s5 + $0xa0] sm:$0xf] }
  0x36   : > { %13412 = vst [vmem:[#allocation13_spill] sm:$0xff] %v10970_v12  ;;  %v10986_v31 = vld [vmem:[%s10795_s5 + $0x8c] ss:$0 sps:$4 sm:$0x11]   ;;  %v987_v32 = vshll.u32 %v10970_v12, 16  ;;  %v10991_v35 = vcombine.low %v239_v18, %v10980_v29  ;;  %v802_v44 = vrot.slane %v800_v61, 1  ;;  %v739_v51 = vsel %vm274_vm2, %v734_v19, %v738_v58 }
  0x37   : > { %9541 = vmatmul.mubr.msk.bf16.vlgmr.msra.gmra.mrb[8].mxu0 %vm287_vm3, %v547_v38  ;;  %v10994_v36 = vld [vmem:[%s10795_s5 + $0x98] ss:$0 sps:$4 sm:$0x11]   ;;  %v241_v38 = vld [vmem:[%s10795_s5 + $0x9c] sm:$0xf]  ;;  %v921_v56 = vshrl.u32 %v10952_v49, 16 }
  0x38   : > { %9551 = vmatpush3.bf16.msra.mxu0 %v10781_v2  ;;  %9552 = vmatprep.mubr.msk.bf16.mxu0 %vm10695_vm1, %v13354_v1  ;;  %v928_v18 = vshll.u32 %v10976_v20, 16  ;;  %v11006_v57 = vld [vmem:[%s10795_s5 + $0xa4] ss:$0 sps:$4 sm:$0x11]   ;;  %v925_v41 = vrot.slane %v923_v22, 1  ;;  %v992_v54 = vshll.u32 %v10986_v31, 16  ;;  %v11010_v59 = vcombine.low %v241_v38, %v10999_v46 }
  0x39   : > { %9547 = vmatmul.mubr.msk.bf16.vlgmr.msra.gmra.mrb[8].mxu1 %vm287_vm3, %v611_v52  ;;  %9562 = vmatprep.subr.bf16.mxu0 %v13354_v1  ;;  %v866_v52 = vrot.slane %v864_v10, 1  ;;  %v243_v60 = vld [vmem:[%s10795_s5 + $0xa8] sm:$0xf]  ;;  %v11014_v61 = vld [vmem:[%s10795_s5 + $0xac] sm:$0xf]  ;;  %v985_v58 = vshrl.u32 %v10970_v12, 16  ;;  %v803_v22 = vsel %vm274_vm2, %v798_v40, %v802_v44 }
  0x3a   : > { %9557 = vmatpush3.bf16.msra.mxu1 %v10781_v2  ;;  %9558 = vmatprep.mubr.msk.bf16.mxu1 %vm10695_vm1, %v13354_v1  ;;  %v989_v7 = vrot.slane %v987_v32, 1  ;;  %v1051_v10 = vshll.u32 %v10991_v35, 16  ;;  %v13413_v19 = vmov 0.0   ;;  %v1120_v38 = vshll.u32 %v11006_v57, 16  ;;  %v245_v49 = vld [vmem:[%s10795_s5 + $0xb4] sm:$0xf] }
  0x3b   : > { %9568 = vmatprep.subr.bf16.mxu1 %v13354_v1  ;;  %v862_v1 = vor.u32 %v861_v30, %v857_v9  ;;  %v11020_v9 = vcombine.low %v243_v60, %v11014_v61  ;;  %v1056_v30 = vshll.u32 %v10994_v36, 16  ;;  %v930_v60 = vrot.slane %v928_v18, 1  ;;  %v11044_v18 = vld [vmem:[%s10795_s5 + $0xb8] sm:$0xf] }
  0x3c   : > { %v1115_v48 = vshll.u32 %v11010_v59, 16  ;;  %v2163_v40 = vrot.slane %v10841_v28, 1  ;;  %v926_v32 = vor.u32 %v925_v41, %v921_v56  ;;  %v990_v11 = vor.u32 %v989_v7, %v985_v58  ;;  %v1990_v41 = vld [vmem:[%s10795_s5 + $0x24] sm:$0xe] }
  0x3d   : > { %v1179_v12 = vshll.u32 %v11020_v9, 16  ;;  %v867_v44 = vsel %vm274_vm2, %v862_v1, %v866_v52  ;;  %v11048_v62 = vrot.slane %v1051_v10, 1  ;;  %v2213_v53 = vrot.slane %v10860_v43, 1  ;;  %v1988_v10 = vld [vmem:[%s10795_s5 + $0xc] sm:$0xe] }
  0x3e   : > { %v11051_v1 = vrot.slane %v1056_v30, 1  ;;  %v11054_v52 = vrot.slane %v1120_v38, 1  ;;  %v11058_v42 = vrot.slane %v1115_v48, 1  ;;  %v11063_v7 = vcombine.low %v245_v49, %v11044_v18  ;;  %v1989_v30 = vld [vmem:[%s10795_s5 + $0x18] sm:$0xe] }
  0x3f   : > { %9553 = vmatmul.mubr.msk.bf16.vlgmr.msra.gmra.mrb[12].mxu0 %vm287_vm3, %v675_v39  ;;  %v11029_v39 = vld [vmem:[%s10795_s5 + $0xb0] ss:$0 sps:$4 sm:$0x11]   ;;  %v11060_v58 = vrot.slane %v1179_v12, 1  ;;  %v8767_v38 = vcombine.low %v1988_v10, %v10809_v8  ;;  %v8769_v56 = vcombine.low %v1989_v30, %v10822_v15  ;;  %v1991_v48 = vld [vmem:[%s10795_s5 + $0x30] sm:$0xe]  ;;  %v931_v49 = vsel %vm274_vm2, %v926_v32, %v930_v60 }
  0x40   : > { %9563 = vmatpush3.bf16.msra.mxu0 %v10781_v2  ;;  %9564 = vmatprep.mubr.msk.bf16.mxu0 %vm10695_vm1, %v13413_v19  ;;  %v1184_v26 = vshll.u32 %v11029_v39, 16  ;;  %v2263_v12 = vrot.slane %v10873_v50, 1  ;;  %v2313_v8 = vrot.slane %v10896_v0, 1  ;;  %v1994_v32 = vld [vmem:[%s10795_s5 + $0x54] sm:$0xe] }
  0x41   : > { %9559 = vmatmul.mubr.msk.bf16.vlgmr.msra.gmra.mrb[12].mxu1 %vm287_vm3, %v739_v51  ;;  %9574 = vmatprep.subr.bf16.mxu0 %v13413_v19  ;;  %v994_v51 = vrot.slane %v992_v54, 1  ;;  %v1987_v54 = vld [vmem:[%s10795_s5] sm:$0xe]  ;;  %v2062_v50 = vrot.slane %v8767_v38, 1  ;;  %v2112_v10 = vrot.slane %v8769_v56, 1  ;;  %v13416_v56 = vrot.slane %v10835_v24, 1 }
  0x42   : > { %9569 = vmatpush3.bf16.msra.mxu1 %v10781_v2  ;;  %9570 = vmatprep.mubr.msk.bf16.mxu1 %vm10695_vm1, %v13413_v19  ;;  %v8765_v43 = vcombine.low %v1987_v54, %v10799_v4  ;;  %v11068_v28 = vrot.slane %v1184_v26, 1  ;;  %v8771_v4 = vcombine.low %v1990_v41, %v10828_v21  ;;  %v1992_v54 = vld [vmem:[%s10795_s5 + $0x3c] sm:$0xe]  ;;  %v1993_v26 = vld [vmem:[%s10795_s5 + $0x48] sm:$0xe]  ;;  %v13414_v21 = vrot.slane %v10805_v6, 1 }
  0x43   : > { %9580 = vmatprep.subr.bf16.mxu1 %v13413_v19  ;;  %v995_v15 = vsel %vm274_vm2, %v990_v11, %v994_v51  ;;  %v1995_v60 = vld [vmem:[%s10795_s5 + $0x60] sm:$0xe]  ;;  %v8775_v11 = vcombine.low %v1992_v54, %v10867_v47  ;;  %v8777_v51 = vcombine.low %v1993_v26, %v10883_v55  ;;  %v13415_v6 = vrot.slane %v10819_v14, 1  ;;  %v11114_v55 = vld [vmem:[%s10795_s5 + $0xbc] ss:$0 sps:$4 sm:$0x11]  }
  0x44   : > { %v2009_v25 = vrot.slane %v8765_v43, 1  ;;  %v2162_v41 = vrot.slane %v8771_v4, 1  ;;  %v11110_v47 = vsel %vm2008_vm4, %v2112_v10, %v13416_v56  ;;  %v8779_v14 = vcombine.low %v1994_v32, %v10899_v3  ;;  %v1997_v4 = vld [vmem:[%s10795_s5 + $0x78] sm:$0xe]  ;;  %v1998_v54 = vld [vmem:[%s10795_s5 + $0x84] sm:$0xe] }
  0x45   : > { %v2262_v38 = vrot.slane %v8775_v11, 1  ;;  %v2363_v24 = vrot.slane %v10909_v16, 1  ;;  %v2413_v10 = vrot.slane %v10925_v27, 1  ;;  %v2513_v16 = vrot.slane %v10976_v20, 1  ;;  %v2000_v56 = vld [vmem:[%s10795_s5 + $0x9c] sm:$0xe] }
  0x46   : > { %v11093_v0 = vsel %vm2008_vm4, %v2009_v25, %v13414_v21  ;;  %v11105_v25 = vsel %vm2008_vm4, %v2062_v50, %v13415_v6  ;;  %v11117_v30 = vsel %vm2008_vm4, %v2162_v41, %v2163_v40  ;;  %v8781_v50 = vcombine.low %v1995_v60, %v10912_v17 }
  0x47   : > { %9565 = vmatmul.mubr.msk.bf16.vlgmr.msra.gmra.mrb[16].mxu0 %vm287_vm3, %v803_v22  ;;  %v8773_v22 = vcombine.low %v1991_v48, %v10848_v34  ;;  %v1996_v34 = vld [vmem:[%s10795_s5 + $0x6c] sm:$0xe]  ;;  %v2312_v48 = vrot.slane %v8777_v51, 1  ;;  %v2362_v21 = vrot.slane %v8779_v14, 1  ;;  %v2463_v41 = vrot.slane %v10939_v37, 1 }
  0x48   : > { %9575 = vmatpush3.bf16.msra.mxu0 %v10781_v2  ;;  %9576 = vmatprep.mubr.msk.bf16.mxu0 %vm10695_vm1, %v13413_v19  ;;  %v8783_v3 = vcombine.low %v1996_v34, %v10933_v33  ;;  %v2412_v32 = vrot.slane %v8781_v50, 1  ;;  %v13417_v33 = vshrl.u32 %v10991_v35, 16  ;;  %v1248_v60 = vshll.u32 %v11114_v55, 16  ;;  %v2001_v50 = vld [vmem:[%s10795_s5 + $0xa8] sm:$0xe] }
  0x49   : > { %9571 = vmatmul.mubr.msk.bf16.vlgmr.msra.gmra.mrb[16].mxu1 %vm287_vm3, %v867_v44  ;;  %9586 = vmatprep.subr.bf16.mxu0 %v13413_v19  ;;  %v1243_v44 = vshll.u32 %v11063_v7, 16  ;;  %v2212_v43 = vrot.slane %v8773_v22, 1  ;;  %v11129_v22 = vsel %vm2008_vm4, %v2262_v38, %v2263_v12  ;;  %v11132_v40 = vsel %vm2008_vm4, %v2312_v48, %v2313_v8 }
  0x4a   : > { %9581 = vmatpush3.bf16.msra.mxu1 %v10781_v2  ;;  %9582 = vmatprep.mubr.msk.bf16.mxu1 %vm10695_vm1, %v13413_v19  ;;  %v11140_v17 = vsel %vm2008_vm4, %v2362_v21, %v2363_v24  ;;  %v2462_v27 = vrot.slane %v8783_v3, 1  ;;  %v8787_v12 = vcombine.low %v1998_v54, %v10962_v63  ;;  %v2563_v8 = vrot.slane %v10986_v31, 1  ;;  %v2002_v21 = vld [vmem:[%s10795_s5 + $0xb4] sm:$0xe] }
  0x4b   : > { %9592 = vmatprep.subr.bf16.mxu1 %v13413_v19  ;;  %v11123_v26 = vsel %vm2008_vm4, %v2212_v43, %v2213_v53  ;;  %v8785_v53 = vcombine.low %v1997_v4, %v10948_v45  ;;  %v1054_v37 = vor.u32 %v11048_v62, %v13417_v33  ;;  %v1241_v45 = vshrl.u32 %v11063_v7, 16  ;;  %v13428_v33 = vld [vmem:[#allocation13_spill] sm:$0xff] }
  0x4c   : > { %v11152_v20 = vsel %vm2008_vm4, %v2412_v32, %v2413_v10  ;;  %v13418_v63 = vshrl.u32 %v11010_v59, 16  ;;  %v11161_v62 = vsel %vm2008_vm4, %v2462_v27, %v2463_v41  ;;  %v2562_v11 = vrot.slane %v8787_v12, 1  ;;  %v13426_v12 = vld [vmem:[#allocation11_spill] sm:$0xff] }
  0x4d   : > { %v2613_v6 = vrot.slane %v10994_v36, 1  ;;  %v1059_v43 = vsel %vm274_vm2, %v1054_v37, %v11051_v1  ;;  %v8791_v48 = vcombine.low %v2000_v56, %v10999_v46  ;;  %v1250_v4 = vrot.slane %v1248_v60, 1  ;;  %v8764_v37 = vld [vmem:[%s13351_s1 + $0x4] sm:$0x3] }
  0x4e   : > { %v1118_v31 = vor.u32 %v11058_v42, %v13418_v63  ;;  %v11171_v34 = vsel %vm2008_vm4, %v2562_v11, %v2563_v8  ;;  %v1999_v42 = vld [vmem:[%s10795_s5 + $0x90] sm:$0xe]  ;;  %v2663_v36 = vrot.slane %v11006_v57, 1  ;;  %v2713_v10 = vrot.slane %v11029_v39, 1  ;;  %v13427_v8 = vld [vmem:[#allocation12_spill] sm:$0xff] }
  0x4f   : > { %9577 = vmatmul.mubr.msk.bf16.vlgmr.msra.gmra.mrb[20].mxu0 %vm287_vm3, %v931_v49  ;;  %v2512_v49 = vrot.slane %v8785_v53, 1  ;;  %v8789_v38 = vcombine.low %v1999_v42, %v10980_v29  ;;  %v2662_v24 = vrot.slane %v8791_v48, 1  ;;  %v13419_v29 = vshrl.u32 %v11020_v9, 16 }
  0x50   : > { %9587 = vmatpush3.bf16.msra.mxu0 %v10781_v2  ;;  %9588 = vmatprep.mubr.msk.bf16.mxu0 %vm10695_vm1, %v13413_v19  ;;  %v1123_v14 = vsel %vm274_vm2, %v1118_v31, %v11054_v52  ;;  %v8793_v32 = vcombine.low %v2001_v50, %v11014_v61  ;;  %v2763_v27 = vrot.slane %v11114_v55, 1  ;;  %v13425_v55 = vld [vmem:[#allocation10_spill] sm:$0xff]  ;;  %v10493_v31 = vld [vmem:[%s10795_s5 + $0x60] sm:$0xff]  }
  0x51   : > { %9583 = vmatmul.mubr.msk.bf16.vlgmr.msra.gmra.mrb[20].mxu1 %vm287_vm3, %v995_v15  ;;  %9598 = vmatprep.subr.bf16.mxu0 %v13413_v19  ;;  %v11167_v51 = vsel %vm2008_vm4, %v2512_v49, %v2513_v16  ;;  %v1245_v15 = vrot.slane %v1243_v44, 1  ;;  %v247_v44 = vld [vmem:[%s13351_s1] sm:$0x3]  ;;  %v2612_v54 = vrot.slane %v8789_v38, 1  ;;  %v1182_v46 = vor.u32 %v11060_v58, %v13419_v29 }
  0x52   : > { %9593 = vmatpush3.bf16.msra.mxu1 %v10781_v2  ;;  %9594 = vmatprep.mubr.msk.bf16.mxu1 %vm10695_vm1, %v13413_v19  ;;  %v11197_v52 = vsel %vm2008_vm4, %v2662_v24, %v2663_v36  ;;  %v11206_v58 = vsel %vm291_vm0, %v247_v44, 0  ;;  %v2712_v53 = vrot.slane %v8793_v32, 1  ;;  %v10496_v44 = vld [vmem:[%s10795_s5 + $0x84] sm:$0xff]   ;;  %v11524_v32 = vld [vmem:[%s10795_s5 + $0x1c] sm:$0xf] }
  0x53   : > { %9604 = vmatprep.subr.bf16.mxu1 %v13413_v19  ;;  %v11194_v1 = vsel %vm2008_vm4, %v2612_v54, %v2613_v6  ;;  %v1246_v57 = vor.u32 %v1245_v15, %v1241_v45  ;;  %v1187_v3 = vsel %vm274_vm2, %v1182_v46, %v11068_v28  ;;  %v13424_v28 = vld [vmem:[#allocation9_spill] sm:$0xff] }
  0x54   : > { %v11222_v39 = vsel %vm2008_vm4, %v2712_v53, %v2713_v10  ;;  %v10494_v15 = vld [vmem:[%s10795_s5 + $0x6c] sm:$0xff]  }
  0x55   : > { %v1251_v41 = vsel %vm274_vm2, %v1246_v57, %v1250_v4  ;;  %v10497_v46 = vld [vmem:[%s10795_s5 + $0x90] sm:$0xff]   ;;  %v8862_v57 = vld [vmem:[%s10795_s5 + $0xc] sm:$0xf] }
  0x57   : > { %9589 = vmatmul.mubr.msk.bf16.vlgmr.msra.gmra.mrb[24].mxu0 %vm287_vm3, %v1059_v43  ;;  %v10495_v43 = vld [vmem:[%s10795_s5 + $0x78] sm:$0xff]  }
  0x58   : > { %9599 = vmatpush3.bf16.msra.mxu0 %v10781_v2  ;;  %9600 = vmatprep.mubr.msk.bf16.mxu0 %vm10695_vm1, %v13413_v19 }
  0x59   : > { %9595 = vmatmul.mubr.msk.bf16.vlgmr.msra.gmra.mrb[24].mxu1 %vm287_vm3, %v1123_v14  ;;  %9610 = vmatprep.subr.bf16.mxu0 %v13413_v19 }
  0x5a   : > { %9605 = vmatpush3.bf16.msra.mxu1 %v10781_v2  ;;  %9606 = vmatprep.mubr.msk.bf16.mxu1 %vm10695_vm1, %v13413_v19  ;;  %v8795_v2 = vcombine.low %v2002_v21, %v11044_v18  ;;  %v13423_v18 = vld [vmem:[#allocation8_spill] sm:$0xff]  ;;  %v10498_v21 = vld [vmem:[%s10795_s5 + $0x9c] sm:$0xff]  }
  0x5b   : > { %9616 = vmatprep.subr.bf16.mxu1 %v13413_v19 }
  0x5c   : > { %v2762_v16 = vrot.slane %v8795_v2, 1 }
  0x5e   : > { %v11225_v61 = vsel %vm2008_vm4, %v2762_v16, %v2763_v27 }
  0x5f   : > { %9601 = vmatmul.mubr.msk.bf16.vlgmr.msra.gmra.mrb[28].mxu0 %vm287_vm3, %v1187_v3  ;;  %v8865_v3 = vld [vmem:[%s10795_s5 + $0x18] sm:$0xf] }
  0x60   : > { %9611 = vmatpush3.bf16.msra.mxu0 %v11206_v58  ;;  %9612 = vmatprep.mubr.msk.bf16.mxu0 %vm10695_vm1, %v13413_v19 }
  0x61   : > { %9607 = vmatmul.mubr.msk.bf16.vlgmr.msra.gmra.mrb[28].mxu1 %vm287_vm3, %v1251_v41  ;;  %9622 = vmatprep.subr.bf16.mxu0 %v13413_v19 }
  0x62   : > { %9617 = vmatpush3.bf16.msra.mxu1 %v11206_v58  ;;  %9618 = vmatprep.mubr.msk.bf16.mxu1 %vm10695_vm1, %v13413_v19 }
  0x63   : > { %9628 = vmatprep.subr.bf16.mxu1 %v13413_v19 }
  0x67   : > { %9613 = vmatmul.mubr.msk.bf16.vlgmr.msra.gmra.mrb[32].mxu0 %vm287_vm3, %v10802_v5  ;;  %v13420_v5 = vld [vmem:[#allocation5_spill] sm:$0xff] }
  0x68   : > { %9623 = vmatpush3.bf16.msra.mxu0 %v11206_v58  ;;  %9624 = vmatprep.mubr.msk.bf16.mxu0 %vm10695_vm1, %v13413_v19 }
  0x69   : > { %9619 = vmatmul.mubr.msk.bf16.vlgmr.msra.gmra.mrb[32].mxu1 %vm287_vm3, %v10816_v13  ;;  %9634 = vmatprep.subr.bf16.mxu0 %v13413_v19  ;;  %v13421_v13 = vld [vmem:[#allocation6_spill] sm:$0xff] }
  0x6a   : > { %9629 = vmatpush3.bf16.msra.mxu1 %v11206_v58  ;;  %9630 = vmatprep.mubr.msk.bf16.mxu1 %vm10695_vm1, %v13413_v19 }
  0x6b   : > { %9640 = vmatprep.subr.bf16.mxu1 %v13413_v19 }
  0x6f   : > { %9625 = vmatmul.mubr.msk.bf16.vlgmr.msra.gmra.mrb[36].mxu0 %vm287_vm3, %v10832_v23  ;;  %v13422_v23 = vld [vmem:[#allocation7_spill] sm:$0xff] }
  0x70   : > { %9635 = vmatpush3.bf16.msra.mxu0 %v11206_v58  ;;  %9636 = vmatprep.mubr.msk.bf16.mxu0 %vm10695_vm1, %v13413_v19 }
  0x71   : > { %9631 = vmatmul.mubr.msk.bf16.vlgmr.msra.gmra.mrb[36].mxu1 %vm287_vm3, %v13420_v5  ;;  %9646 = vmatprep.subr.bf16.mxu0 %v13413_v19  ;;  %v8914_v5 = vcombine.low %v8865_v3, %v11524_v32 }
  0x72   : > { %9641 = vmatpush3.bf16.msra.mxu1 %v11206_v58  ;;  %9642 = vmatprep.mubr.msk.bf16.mxu1 %vm10695_vm1, %v13413_v19 }
  0x73   : > { %9652 = vmatprep.subr.bf16.mxu1 %v13413_v19 }
  0x77   : > { %9637 = vmatmul.mubr.msk.bf16.vlgmr.msra.gmra.mrb[40].mxu0 %vm287_vm3, %v13421_v13 }
  0x78   : > { %9647 = vmatpush3.bf16.msra.mxu0 %v11206_v58  ;;  %9648 = vmatprep.mubr.msk.bf16.mxu0 %vm10695_vm1, %v13413_v19 }
  0x79   : > { %9643 = vmatmul.mubr.msk.bf16.vlgmr.msra.gmra.mrb[40].mxu1 %vm287_vm3, %v13422_v23  ;;  %9658 = vmatprep.subr.bf16.mxu0 %v13413_v19  ;;  %v11540_v23 = vld [vmem:[%s10795_s5 + $0x14] ss:$0 sps:$4 sm:$0x11]  }
  0x7a   : > { %9653 = vmatpush3.bf16.msra.mxu1 %v11206_v58  ;;  %9654 = vmatprep.mubr.msk.bf16.mxu1 %vm10695_vm1, %v13413_v19 }
  0x7b   : > { %9664 = vmatprep.subr.bf16.mxu1 %v13413_v19 }
  0x7f   : > { %9649 = vmatmul.mubr.msk.bf16.vlgmr.msra.gmra.mrb[44].mxu0 %vm287_vm3, %v13423_v18 }
  0x80   : > { %9659 = vmatpush3.bf16.msra.mxu0 %v11206_v58  ;;  %9660 = vmatprep.mubr.msk.bf16.mxu0 %vm10695_vm1, %v13413_v19 }
  0x81   : > { %9655 = vmatmul.mubr.msk.bf16.vlgmr.msra.gmra.mrb[44].mxu1 %vm287_vm3, %v13424_v28  ;;  %9670 = vmatprep.subr.bf16.mxu0 %v13413_v19  ;;  %v8910_v28 = vld [vmem:[%s13351_s1 + $0x8] sm:$0x3] }
  0x82   : > { %9665 = vmatpush3.bf16.msra.mxu1 %v11206_v58  ;;  %9666 = vmatprep.mubr.msk.bf16.mxu1 %vm10695_vm1, %v13413_v19 }
  0x83   : > { %9676 = vmatprep.subr.bf16.mxu1 %v13413_v19 }
  0x87   : > { %9661 = vmatmul.mubr.msk.bf16.vlgmr.msra.gmra.mrb[48].mxu0 %vm287_vm3, %v13425_v55  ;;  %v8868_v55 = vld [vmem:[%s10795_s5 + $0x24] sm:$0xf] }
  0x88   : > { %9671 = vmatpush3.bf16.msra.mxu0 %v11206_v58  ;;  %9672 = vmatprep.mubr.msk.bf16.mxu0 %vm10695_vm1, %v13413_v19 }
  0x89   : > { %9667 = vmatmul.mubr.msk.bf16.vlgmr.msra.gmra.mrb[48].mxu1 %vm287_vm3, %v13426_v12  ;;  %9682 = vmatprep.subr.bf16.mxu0 %v13413_v19  ;;  %v11549_v12 = vld [vmem:[%s10795_s5 + $0x28] sm:$0xf] }
  0x8a   : > { %9677 = vmatpush3.bf16.msra.mxu1 %v11206_v58  ;;  %9678 = vmatprep.mubr.msk.bf16.mxu1 %vm10695_vm1, %v13413_v19 }
  0x8b   : > { %9688 = vmatprep.subr.bf16.mxu1 %v13413_v19 }
  0x8f   : > { %9673 = vmatmul.mubr.msk.bf16.vlgmr.msra.gmra.mrb[52].mxu0 %vm287_vm3, %v13427_v8 }
  0x90   : > { %9683 = vmatpush3.bf16.msra.mxu0 %v11206_v58  ;;  %9684 = vmatprep.mubr.msk.bf16.mxu0 %vm10695_vm1, %v13413_v19 }
  0x91   : > { %9679 = vmatmul.mubr.msk.bf16.vlgmr.msra.gmra.mrb[52].mxu1 %vm287_vm3, %v13428_v33  ;;  %9694 = vmatprep.subr.bf16.mxu0 %v13413_v19  ;;  %v11557_v33 = vld [vmem:[%s10795_s5 + $0x20] ss:$0 sps:$4 sm:$0x11]  }
  0x92   : > { %9689 = vmatpush3.bf16.msra.mxu1 %v11206_v58  ;;  %9690 = vmatprep.mubr.msk.bf16.mxu1 %vm10695_vm1, %v13413_v19 }
  0x93   : > { %9700 = vmatprep.subr.bf16.mxu1 %v13413_v19 }
  0x97   : > { %9685 = vmatmul.mubr.msk.bf16.vlgmr.msra.gmra.mrb[56].mxu0 %vm287_vm3, %v10991_v35  ;;  %v2016_v35 = vsel %vm291_vm0, %v8764_v37, 0  ;;  %v3823_v37 = vshll.u32 %v8914_v5, 16 }
  0x98   : > { %9695 = vmatpush3.bf16.msra.mxu0 %v11206_v58  ;;  %9696 = vmatprep.mubr.msk.bf16.mxu0 %vm10695_vm1, %v13413_v19 }
  0x99   : > { %9691 = vmatmul.mubr.msk.bf16.vlgmr.msra.gmra.mrb[56].mxu1 %vm287_vm3, %v11010_v59  ;;  %9706 = vmatprep.subr.bf16.mxu0 %v13413_v19  ;;  %v8829_v59 = vld [vmem:[%s13351_s1 + $0x6] sm:$0x3] }
  0x9a   : > { %9701 = vmatpush3.bf16.msra.mxu1 %v11206_v58  ;;  %9702 = vmatprep.mubr.msk.bf16.mxu1 %vm10695_vm1, %v13413_v19  ;;  %v11513_v58 = vld [vmem:[%s10795_s5 + $0x10] sm:$0xf] }
  0x9b   : > { %9712 = vmatprep.subr.bf16.mxu1 %v13413_v19  ;;  %v8911_v53 = vcombine.low %v8862_v57, %v11513_v58 }
  0x9d   : > { %v3756_v18 = vshll.u32 %v8911_v53, 16 }
  0x9f   : > { %9697 = vmatmul.mubr.msk.bf16.vlgmr.msra.gmra.mrb[60].mxu0 %vm287_vm3, %v11020_v9  ;;  %v11405_v9 = vsel %vm291_vm0, %v8829_v59, 0  ;;  %v10500_v59 = vld [vmem:[%s10795_s5 + $0xb4] sm:$0xff]  }
  0xa0   : > { %9707 = vmatpush3.bf16.msra.mxu0 %v2016_v35  ;;  %9708 = vmatprep.mubr.msk.bf16.mxu0 %vm10695_vm1, %v13413_v19 }
  0xa1   : > { %9703 = vmatmul.mubr.msk.bf16.vlgmr.msra.gmra.mrb[60].mxu1 %vm287_vm3, %v11063_v7  ;;  %9718 = vmatprep.subr.bf16.mxu0 %v13413_v19  ;;  %v10486_v7 = vld [vmem:[%s10795_s5 + $0xc] sm:$0xff]  }
  0xa2   : > { %9713 = vmatpush3.bf16.msra.mxu1 %v2016_v35  ;;  %9714 = vmatprep.mubr.msk.bf16.mxu1 %vm10695_vm1, %v13413_v19 }
  0xa3   : > { %9724 = vmatprep.subr.bf16.mxu1 %v13413_v19 }
  0xa7   : > { %9709 = vmatmul.mubr.msk.bf16.vlgmr.msra.gmra.mrb[64].mxu0 %vm287_vm3, %v11093_v0  ;;  %v10487_v0 = vld [vmem:[%s10795_s5 + $0x18] sm:$0xff]  }
  0xa8   : > { %9719 = vmatpush3.bf16.msra.mxu0 %v2016_v35  ;;  %9720 = vmatprep.mubr.msk.bf16.mxu0 %vm10695_vm1, %v13413_v19 }
  0xa9   : > { %9715 = vmatmul.mubr.msk.bf16.vlgmr.msra.gmra.mrb[64].mxu1 %vm287_vm3, %v11105_v25  ;;  %9730 = vmatprep.subr.bf16.mxu0 %v13413_v19  ;;  %v10488_v25 = vld [vmem:[%s10795_s5 + $0x24] sm:$0xff]  }
  0xaa   : > { %9725 = vmatpush3.bf16.msra.mxu1 %v2016_v35  ;;  %9726 = vmatprep.mubr.msk.bf16.mxu1 %vm10695_vm1, %v13413_v19 }
  0xab   : > { %9736 = vmatprep.subr.bf16.mxu1 %v13413_v19 }
  0xaf   : > { %9721 = vmatmul.mubr.msk.bf16.vlgmr.msra.gmra.mrb[68].mxu0 %vm287_vm3, %v11110_v47  ;;  %v10489_v47 = vld [vmem:[%s10795_s5 + $0x30] sm:$0xff]  }
  0xb0   : > { %9731 = vmatpush3.bf16.msra.mxu0 %v2016_v35  ;;  %9732 = vmatprep.mubr.msk.bf16.mxu0 %vm10695_vm1, %v13413_v19 }
  0xb1   : > { %9727 = vmatmul.mubr.msk.bf16.vlgmr.msra.gmra.mrb[68].mxu1 %vm287_vm3, %v11117_v30  ;;  %9742 = vmatprep.subr.bf16.mxu0 %v13413_v19  ;;  %v10490_v30 = vld [vmem:[%s10795_s5 + $0x3c] sm:$0xff]  }
  0xb2   : > { %9737 = vmatpush3.bf16.msra.mxu1 %v2016_v35  ;;  %9738 = vmatprep.mubr.msk.bf16.mxu1 %vm10695_vm1, %v13413_v19 }
  0xb3   : > { %9748 = vmatprep.subr.bf16.mxu1 %v13413_v19 }
  0xb7   : > { %9733 = vmatmul.mubr.msk.bf16.vlgmr.msra.gmra.mrb[72].mxu0 %vm287_vm3, %v11123_v26  ;;  %v10491_v26 = vld [vmem:[%s10795_s5 + $0x48] sm:$0xff]  }
  0xb8   : > { %9743 = vmatpush3.bf16.msra.mxu0 %v2016_v35  ;;  %9744 = vmatprep.mubr.msk.bf16.mxu0 %vm10695_vm1, %v13413_v19 }
  0xb9   : > { %9739 = vmatmul.mubr.msk.bf16.vlgmr.msra.gmra.mrb[72].mxu1 %vm287_vm3, %v11129_v22  ;;  %9754 = vmatprep.subr.bf16.mxu0 %v13413_v19 }
  0xba   : > { %9749 = vmatpush3.bf16.msra.mxu1 %v2016_v35  ;;  %9750 = vmatprep.mubr.msk.bf16.mxu1 %vm10695_vm1, %v13413_v19 }
  0xbb   : > { %9760 = vmatprep.subr.bf16.mxu1 %v13413_v19 }
  0xbf   : > { %9745 = vmatmul.mubr.msk.bf16.vlgmr.msra.gmra.mrb[76].mxu0 %vm287_vm3, %v11132_v40 }
  0xc0   : > { %9755 = vmatpush3.bf16.msra.mxu0 %v2016_v35  ;;  %9756 = vmatprep.mubr.msk.bf16.mxu0 %vm10695_vm1, %v13413_v19 }
  0xc1   : > { %9751 = vmatmul.mubr.msk.bf16.vlgmr.msra.gmra.mrb[76].mxu1 %vm287_vm3, %v11140_v17  ;;  %9766 = vmatprep.subr.bf16.mxu0 %v13413_v19  ;;  %v10492_v17 = vld [vmem:[%s10795_s5 + $0x54] sm:$0xff]  }
  0xc2   : > { %9761 = vmatpush3.bf16.msra.mxu1 %v2016_v35  ;;  %9762 = vmatprep.mubr.msk.bf16.mxu1 %vm10695_vm1, %v13413_v19 }
  0xc3   : > { %9772 = vmatprep.subr.bf16.mxu1 %v13413_v19 }
  0xc7   : > { %9757 = vmatmul.mubr.msk.bf16.vlgmr.msra.gmra.mrb[80].mxu0 %vm287_vm3, %v11152_v20 }
  0xc8   : > { %9767 = vmatpush3.bf16.msra.mxu0 %v2016_v35  ;;  %9768 = vmatprep.mubr.msk.bf16.mxu0 %vm10695_vm1, %v13413_v19 }
  0xc9   : > { %9763 = vmatmul.mubr.msk.bf16.vlgmr.msra.gmra.mrb[80].mxu1 %vm287_vm3, %v11161_v62  ;;  %9778 = vmatprep.subr.bf16.mxu0 %v13413_v19 }
  0xca   : > { %9773 = vmatpush3.bf16.msra.mxu1 %v2016_v35  ;;  %9774 = vmatprep.mubr.msk.bf16.mxu1 %vm10695_vm1, %v13413_v19 }
  0xcb   : > { %9784 = vmatprep.subr.bf16.mxu1 %v13413_v19 }
  0xcf   : > { %9769 = vmatmul.mubr.msk.bf16.vlgmr.msra.gmra.mrb[84].mxu0 %vm287_vm3, %v11167_v51 }
  0xd0   : > { %9779 = vmatpush3.bf16.msra.mxu0 %v2016_v35  ;;  %9780 = vmatprep.mubr.msk.bf16.mxu0 %vm10695_vm1, %v13413_v19 }
  0xd1   : > { %9775 = vmatmul.mubr.msk.bf16.vlgmr.msra.gmra.mrb[84].mxu1 %vm287_vm3, %v11171_v34  ;;  %9790 = vmatprep.subr.bf16.mxu0 %v13413_v19 }
  0xd2   : > { %9785 = vmatpush3.bf16.msra.mxu1 %v2016_v35  ;;  %9786 = vmatprep.mubr.msk.bf16.mxu1 %vm10695_vm1, %v13413_v19 }
  0xd3   : > { %9796 = vmatprep.subr.bf16.mxu1 %v13413_v19 }
  0xd7   : > { %9781 = vmatmul.mubr.msk.bf16.vlgmr.msra.gmra.mrb[88].mxu0 %vm287_vm3, %v11194_v1 }
  0xd8   : > { %9791 = vmatpush3.bf16.msra.mxu0 %v2016_v35  ;;  %9792 = vmatprep.mubr.msk.bf16.mxu0 %vm10695_vm1, %v13413_v19 }
  0xd9   : > { %9787 = vmatmul.mubr.msk.bf16.vlgmr.msra.gmra.mrb[88].mxu1 %vm287_vm3, %v11197_v52  ;;  %9802 = vmatprep.subr.bf16.mxu0 %v13413_v19 }
  0xda   : > { %9797 = vmatpush3.bf16.msra.mxu1 %v2016_v35  ;;  %9798 = vmatprep.mubr.msk.bf16.mxu1 %vm10695_vm1, %v13413_v19 }
  0xdb   : > { %9808 = vmatprep.subr.bf16.mxu1 %v13413_v19 }
  0xdf   : > { %9793 = vmatmul.mubr.msk.bf16.vlgmr.msra.gmra.mrb[92].mxu0 %vm287_vm3, %v11222_v39  ;;  %v10499_v39 = vld [vmem:[%s10795_s5 + $0xa8] sm:$0xff]  }
  0xe0   : > { %9803 = vmatpush3.bf16.msra.mxu0 %v11405_v9  ;;  %9804 = vmatprep.mubr.msk.bf16.mxu0 %vm10695_vm1, %v13413_v19 }
  0xe1   : > { %9799 = vmatmul.mubr.msk.bf16.vlgmr.msra.gmra.mrb[92].mxu1 %vm287_vm3, %v11225_v61  ;;  %9814 = vmatprep.subr.bf16.mxu0 %v13413_v19 }
  0xe2   : > { %9809 = vmatpush3.bf16.msra.mxu1 %v11405_v9  ;;  %9810 = vmatprep.mubr.msk.bf16.mxu1 %vm10695_vm1, %v13413_v19 }
  0xe3   : > { %9820 = vmatprep.subr.bf16.mxu1 %v13413_v19 }
  0xe7   : > { %9805 = vmatmul.mubr.msk.bf16.vlgmr.msra.gmra.mrb[96].mxu0 %vm287_vm3, %v10486_v7  ;;  %v8871_v7 = vld [vmem:[%s10795_s5 + $0x30] sm:$0xf] }
  0xe8   : > { %9815 = vmatpush3.bf16.msra.mxu0 %v11405_v9  ;;  %9816 = vmatprep.mubr.msk.bf16.mxu0 %vm10695_vm1, %v13413_v19 }
  0xe9   : > { %9811 = vmatmul.mubr.msk.bf16.vlgmr.msra.gmra.mrb[96].mxu1 %vm287_vm3, %v10487_v0  ;;  %9826 = vmatprep.subr.bf16.mxu0 %v13413_v19  ;;  %v11563_v0 = vld [vmem:[%s10795_s5 + $0x34] sm:$0xf] }
  0xea   : > { %9821 = vmatpush3.bf16.msra.mxu1 %v11405_v9  ;;  %9822 = vmatprep.mubr.msk.bf16.mxu1 %vm10695_vm1, %v13413_v19 }
  0xeb   : > { %9832 = vmatprep.subr.bf16.mxu1 %v13413_v19 }
  0xef   : > { %9817 = vmatmul.mubr.msk.bf16.vlgmr.msra.gmra.mrb[100].mxu0 %vm287_vm3, %v10488_v25 }
  0xf0   : > { %9827 = vmatpush3.bf16.msra.mxu0 %v11405_v9  ;;  %9828 = vmatprep.mubr.msk.bf16.mxu0 %vm10695_vm1, %v13413_v19 }
  0xf1   : > { %9823 = vmatmul.mubr.msk.bf16.vlgmr.msra.gmra.mrb[100].mxu1 %vm287_vm3, %v10489_v47  ;;  %9838 = vmatprep.subr.bf16.mxu0 %v13413_v19 }
  0xf2   : > { %9833 = vmatpush3.bf16.msra.mxu1 %v11405_v9  ;;  %9834 = vmatprep.mubr.msk.bf16.mxu1 %vm10695_vm1, %v13413_v19 }
  0xf3   : > { %9844 = vmatprep.subr.bf16.mxu1 %v13413_v19 }
  0xf7   : > { %9829 = vmatmul.mubr.msk.bf16.vlgmr.msra.gmra.mrb[104].mxu0 %vm287_vm3, %v10490_v30  ;;  %v3758_v30 = vrot.slane %v3756_v18, 1 }
  0xf8   : > { %9839 = vmatpush3.bf16.msra.mxu0 %v11405_v9  ;;  %9840 = vmatprep.mubr.msk.bf16.mxu0 %vm10695_vm1, %v13413_v19 }
  0xf9   : > { %9835 = vmatmul.mubr.msk.bf16.vlgmr.msra.gmra.mrb[104].mxu1 %vm287_vm3, %v10491_v26  ;;  %9850 = vmatprep.subr.bf16.mxu0 %v13413_v19  ;;  %v3761_v26 = vshll.u32 %v11540_v23, 16 }
  0xfa   : > { %9845 = vmatpush3.bf16.msra.mxu1 %v11405_v9  ;;  %v11452_v22 = vpop.f32.mrb[0].mxu0  ;;  %9846 = vmatprep.mubr.msk.bf16.mxu1 %vm10695_vm1, %v13413_v19 }
  0xfb   : > { %v9518_v40 = vpop.f32.mrb[1].mxu0  ;;  %9856 = vmatprep.subr.bf16.mxu1 %v13413_v19 }
  0xfc   : > { %v11458_v45 = vpop.f32.mrb[0].mxu1  ;;  %v11460_v20 = vpop.f32.mrb[2].mxu0  ;;  %v8917_v40 = vcombine.low %v8868_v55, %v11549_v12 }
  0xfd   : > { %v9524_v49 = vpop.f32.mrb[1].mxu1  ;;  %v9519_v63 = vpop.f32.mrb[3].mxu0 }
  0xfe   : > { %v11463_v60 = vpop.f32.mrb[2].mxu1  ;;  %v10501_v63 = vld [vmem:[%s10795_s5 + $0xc0] sm:$0xff]  }
  0xff   : > { %v9525_v62 = vpop.f32.mrb[3].mxu1  ;;  %9841 = vmatmul.mubr.msk.bf16.vlgmr.msra.gmra.mrb[108].mxu0 %vm287_vm3, %v10492_v17 }
 0x100   : > { %9851 = vmatpush3.bf16.msra.mxu0 %v11405_v9  ;;  %9852 = vmatprep.mubr.msk.bf16.mxu0 %vm10695_vm1, %v13413_v19 }
 0x101   : > { %9847 = vmatmul.mubr.msk.bf16.vlgmr.msra.gmra.mrb[108].mxu1 %vm287_vm3, %v10493_v31  ;;  %9862 = vmatprep.subr.bf16.mxu0 %v13413_v19  ;;  %v11573_v31 = vsel %vm291_vm0, %v8910_v28, 0  ;;  %v3885_v28 = vshrl.u32 %v8917_v40, 16 }
 0x102   : > { %9857 = vmatpush3.bf16.msra.mxu1 %v11405_v9  ;;  %v11472_v11 = vpop.f32.mrb[4].mxu0  ;;  %9858 = vmatprep.mubr.msk.bf16.mxu1 %vm10695_vm1, %v13413_v19 }
 0x103   : > { %v9530_v51 = vpop.f32.mrb[5].mxu0  ;;  %9868 = vmatprep.subr.bf16.mxu1 %v13413_v19 }
 0x104   : > { %v11478_v34 = vpop.f32.mrb[4].mxu1  ;;  %v11480_v42 = vpop.f32.mrb[6].mxu0  ;;  %v3821_v51 = vshrl.u32 %v8914_v5, 16 }
 0x105   : > { %v9536_v6 = vpop.f32.mrb[5].mxu1  ;;  %v9531_v56 = vpop.f32.mrb[7].mxu0 }
 0x106   : > { %v11483_v38 = vpop.f32.mrb[6].mxu1  ;;  %v3828_v6 = vshll.u32 %v11557_v33, 16  ;;  %v8920_v56 = vcombine.low %v8871_v7, %v11563_v0 }
 0x107   : > { %v9537_v48 = vpop.f32.mrb[7].mxu1  ;;  %9853 = vmatmul.mubr.msk.bf16.vlgmr.msra.gmra.mrb[112].mxu0 %vm287_vm3, %v10494_v15  ;;  %v3825_v15 = vrot.slane %v3823_v37, 1 }
 0x108   : > { %9863 = vmatpush3.bf16.msra.mxu0 %v11405_v9  ;;  %9864 = vmatprep.mubr.msk.bf16.mxu0 %vm10695_vm1, %v13413_v19  ;;  %v11581_v48 = vld [vmem:[%s10795_s5 + $0x2c] ss:$0 sps:$4 sm:$0x11]   ;;  %v3951_v3 = vshll.u32 %v8920_v56, 16 }
 0x109   : > { %9859 = vmatmul.mubr.msk.bf16.vlgmr.msra.gmra.mrb[112].mxu1 %vm287_vm3, %v10495_v43  ;;  %9874 = vmatprep.subr.bf16.mxu0 %v13413_v19  ;;  %v3892_v37 = vshll.u32 %v11581_v48, 16 }
 0x10a   : > { %9869 = vmatpush3.bf16.msra.mxu1 %v11405_v9  ;;  %v11492_v14 = vpop.f32.mrb[8].mxu0  ;;  %9870 = vmatprep.mubr.msk.bf16.mxu1 %vm10695_vm1, %v13413_v19 }
 0x10b   : > { %v9542_v4 = vpop.f32.mrb[9].mxu0  ;;  %9880 = vmatprep.subr.bf16.mxu1 %v13413_v19 }
 0x10c   : > { %v11498_v54 = vpop.f32.mrb[8].mxu1  ;;  %v11500_v24 = vpop.f32.mrb[10].mxu0 }
 0x10d   : > { %v9548_v36 = vpop.f32.mrb[9].mxu1  ;;  %v9543_v29 = vpop.f32.mrb[11].mxu0 }
 0x10e   : > { %v11503_v1 = vpop.f32.mrb[10].mxu1  ;;  %v3887_v36 = vshll.u32 %v8917_v40, 16  ;;  %v8874_v29 = vld [vmem:[%s10795_s5 + $0x3c] sm:$0xf] }
 0x10f   : > { %v9549_v52 = vpop.f32.mrb[11].mxu1  ;;  %9865 = vmatmul.mubr.msk.bf16.vlgmr.msra.gmra.mrb[116].mxu0 %vm287_vm3, %v10496_v44  ;;  %v3763_v44 = vrot.slane %v3761_v26, 1  ;;  %v3949_v26 = vshrl.u32 %v8920_v56, 16  ;;  %v11619_v40 = vld [vmem:[%s10795_s5 + $0x44] ss:$0 sps:$4 sm:$0x11]  }
 0x110   : > { %9875 = vmatpush3.bf16.msra.mxu0 %v11405_v9  ;;  %9876 = vmatprep.mubr.msk.bf16.mxu0 %vm10695_vm1, %v13413_v19  ;;  %v11593_v52 = vld [vmem:[%s10795_s5 + $0x38] ss:$0 sps:$4 sm:$0x11]   ;;  %v3889_v55 = vrot.slane %v3887_v36, 1  ;;  %13429 = vst [vmem:[#allocation5_spill] sm:$0xff] %v11619_v40 }
 0x111   : > { %9871 = vmatmul.mubr.msk.bf16.vlgmr.msra.gmra.mrb[116].mxu1 %vm287_vm3, %v10497_v46  ;;  %9886 = vmatprep.subr.bf16.mxu0 %v13413_v19  ;;  %v11588_v46 = vld [vmem:[%s10795_s5 + $0x40] sm:$0xf]  ;;  %v3956_v7 = vshll.u32 %v11593_v52, 16  ;;  %v11625_v56 = vld [vmem:[%s10795_s5 + $0x50] ss:$0 sps:$4 sm:$0x11]  }
 0x112   : > { %9881 = vmatpush3.bf16.msra.mxu1 %v11405_v9  ;;  %v11516_v50 = vpop.f32.mrb[12].mxu0  ;;  %9882 = vmatprep.mubr.msk.bf16.mxu1 %vm10695_vm1, %v13413_v19  ;;  %13430 = vst [vmem:[#allocation6_spill] sm:$0xff] %v11625_v56 }
 0x113   : > { %v9554_v10 = vpop.f32.mrb[13].mxu0  ;;  %9892 = vmatprep.subr.bf16.mxu1 %v13413_v19 }
 0x114   : > { %v11526_v2 = vpop.f32.mrb[12].mxu1  ;;  %v11528_v41 = vpop.f32.mrb[14].mxu0  ;;  %v3826_v10 = vor.u32 %v3825_v15, %v3821_v51  ;;  %v3890_v15 = vor.u32 %v3889_v55, %v3885_v28  ;;  %v4020_v28 = vshll.u32 %v11619_v40, 16 }
 0x115   : > { %v9560_v16 = vpop.f32.mrb[13].mxu1  ;;  %v9555_v27 = vpop.f32.mrb[15].mxu0 }
 0x116   : > { %v11532_v61 = vpop.f32.mrb[14].mxu1  ;;  %v8923_v16 = vcombine.low %v8874_v29, %v11588_v46  ;;  %v8877_v27 = vld [vmem:[%s10795_s5 + $0x48] sm:$0xf] }
 0x117   : > { %v9561_v13 = vpop.f32.mrb[15].mxu1  ;;  %9877 = vmatmul.mubr.msk.bf16.vlgmr.msra.gmra.mrb[120].mxu0 %vm287_vm3, %v10498_v21  ;;  %v3830_v21 = vrot.slane %v3828_v6, 1  ;;  %v3894_v6 = vrot.slane %v3892_v37, 1 }
 0x118   : > { %9887 = vmatpush3.bf16.msra.mxu0 %v11405_v9  ;;  %9888 = vmatprep.mubr.msk.bf16.mxu0 %vm10695_vm1, %v13413_v19  ;;  %v4015_v51 = vshll.u32 %v8923_v16, 16 }
 0x119   : > { %9883 = vmatmul.mubr.msk.bf16.vlgmr.msra.gmra.mrb[120].mxu1 %vm287_vm3, %v10499_v39  ;;  %9898 = vmatprep.subr.bf16.mxu0 %v13413_v19  ;;  %v11604_v39 = vld [vmem:[%s10795_s5 + $0x4c] sm:$0xf] }
 0x11a   : > { %9893 = vmatpush3.bf16.msra.mxu1 %v11405_v9  ;;  %v11552_v8 = vpop.f32.mrb[16].mxu0  ;;  %9894 = vmatprep.mubr.msk.bf16.mxu1 %vm10695_vm1, %v13413_v19  ;;  %v3754_v9 = vshrl.u32 %v8911_v53, 16 }
 0x11b   : > { %v9566_v35 = vpop.f32.mrb[17].mxu0  ;;  %9904 = vmatprep.subr.bf16.mxu1 %v13413_v19 }
 0x11c   : > { %v11565_v25 = vpop.f32.mrb[16].mxu1  ;;  %v11567_v47 = vpop.f32.mrb[18].mxu0  ;;  %v3759_v4 = vor.u32 %v3758_v30, %v3754_v9  ;;  %v3831_v30 = vsel %vm274_vm2, %v3826_v10, %v3830_v21  ;;  %v8883_v21 = vld [vmem:[%s10795_s5 + $0x60] sm:$0xf] }
 0x11d   : > { %v9572_v17 = vpop.f32.mrb[17].mxu1  ;;  %v9567_v49 = vpop.f32.mrb[19].mxu0 }
 0x11e   : > { %v11575_v62 = vpop.f32.mrb[18].mxu1  ;;  %v3764_v18 = vsel %vm274_vm2, %v3759_v4, %v3763_v44  ;;  %v3953_v17 = vrot.slane %v3951_v3, 1  ;;  %v8926_v49 = vcombine.low %v8877_v27, %v11604_v39  ;;  %v8880_v4 = vld [vmem:[%s10795_s5 + $0x54] sm:$0xf]  ;;  %v11631_v44 = vld [vmem:[%s10795_s5 + $0x58] sm:$0xf] }
 0x11f   : > { %v9573_v43 = vpop.f32.mrb[19].mxu1  ;;  %9889 = vmatmul.mubr.msk.bf16.vlgmr.msra.gmra.mrb[124].mxu0 %vm287_vm3, %v10500_v59  ;;  %13431 = vst [vmem:[#allocation7_spill] sm:$0xff] %v11631_v44  ;;  %v11640_v3 = vld [vmem:[%s10795_s5 + $0x64] sm:$0xf]  ;;  %v4013_v27 = vshrl.u32 %v8923_v16, 16 }
 0x120   : > { %9899 = vmatpush3.bf16.msra.mxu0 %v11573_v31  ;;  %9900 = vmatprep.mubr.msk.bf16.mxu0 %vm10695_vm1, %v13413_v19  ;;  %v3958_v43 = vrot.slane %v3956_v7, 1  ;;  %v3954_v29 = vor.u32 %v3953_v17, %v3949_v26  ;;  %v4079_v10 = vshll.u32 %v8926_v49, 16  ;;  %13432 = vst [vmem:[#allocation8_spill] sm:$0xff] %v11640_v3  ;;  %v8932_v26 = vcombine.low %v8883_v21, %v11640_v3 }
 0x121   : > { %9895 = vmatmul.mubr.msk.bf16.vlgmr.msra.gmra.mrb[124].mxu1 %vm287_vm3, %v10501_v63  ;;  %9910 = vmatprep.subr.bf16.mxu0 %v13413_v19 }
 0x122   : > { %9905 = vmatpush3.bf16.msra.mxu1 %v11573_v31  ;;  %v11596_v57 = vpop.f32.mrb[20].mxu0  ;;  %9906 = vmatprep.mubr.msk.bf16.mxu1 %vm10695_vm1, %v13413_v19  ;;  %v3959_v16 = vsel %vm274_vm2, %v3954_v29, %v3958_v43  ;;  %v8886_v29 = vld [vmem:[%s10795_s5 + $0x6c] sm:$0xf] }
 0x123   : > { %v9578_v53 = vpop.f32.mrb[21].mxu0  ;;  %9916 = vmatprep.subr.bf16.mxu1 %v13413_v19 }
 0x124   : > { %v11606_v5 = vpop.f32.mrb[20].mxu1  ;;  %v11608_v13 = vpop.f32.mrb[22].mxu0 }
 0x125   : > { %v9584_v35 = vpop.f32.mrb[21].mxu1  ;;  %v9579_v59 = vpop.f32.mrb[23].mxu0 }
 0x126   : > { %v11613_v9 = vpop.f32.mrb[22].mxu1  ;;  %v3895_v35 = vsel %vm274_vm2, %v3890_v15, %v3894_v6  ;;  %v8929_v59 = vcombine.low %v8880_v4, %v11631_v44  ;;  %v4022_v6 = vrot.slane %v4020_v28, 1  ;;  %v11657_v4 = vld [vmem:[%s10795_s5 + $0x5c] ss:$0 sps:$4 sm:$0x11]  }
 0x127   : > { %v9585_v63 = vpop.f32.mrb[23].mxu1  ;;  %9901 = vmatmul.mubr.msk.bf16.vlgmr.msra.gmra.mrb[128].mxu0 %vm287_vm3, %v3764_v18  ;;  %v4017_v18 = vrot.slane %v4015_v51, 1  ;;  %v4081_v51 = vrot.slane %v4079_v10, 1  ;;  %13434 = vst [vmem:[#allocation10_spill] sm:$0xff] %v11657_v4  ;;  %v11669_v10 = vld [vmem:[%s10795_s5 + $0x70] sm:$0xf] }
 0x128   : > { %9911 = vmatpush3.bf16.msra.mxu0 %v11573_v31  ;;  %9912 = vmatprep.mubr.msk.bf16.mxu0 %vm10695_vm1, %v13413_v19  ;;  %v4077_v63 = vshrl.u32 %v8926_v49, 16  ;;  %v4143_v43 = vshll.u32 %v8929_v59, 16  ;;  %v11663_v49 = vld [vmem:[%s10795_s5 + $0x68] ss:$0 sps:$4 sm:$0x11]   ;;  %13436 = vst [vmem:[#allocation12_spill] sm:$0xff] %v11669_v10 }
 0x129   : > { %9907 = vmatmul.mubr.msk.bf16.vlgmr.msra.gmra.mrb[128].mxu1 %vm287_vm3, %v3831_v30  ;;  %9922 = vmatprep.subr.bf16.mxu0 %v13413_v19  ;;  %v4018_v15 = vor.u32 %v4017_v18, %v4013_v27  ;;  %13435 = vst [vmem:[#allocation11_spill] sm:$0xff] %v11663_v49  ;;  %v4141_v44 = vshrl.u32 %v8929_v59, 16 }
 0x12a   : > { %9917 = vmatpush3.bf16.msra.mxu1 %v11573_v31  ;;  %v11634_v36 = vpop.f32.mrb[24].mxu0  ;;  %9918 = vmatprep.mubr.msk.bf16.mxu1 %vm10695_vm1, %v13413_v19  ;;  %v4082_v27 = vor.u32 %v4081_v51, %v4077_v63  ;;  %v8935_v63 = vcombine.low %v8886_v29, %v11669_v10  ;;  %v11702_v29 = vld [vmem:[%s10795_s5 + $0x74] ss:$0 sps:$4 sm:$0x11]  }
 0x12b   : > { %v9590_v53 = vpop.f32.mrb[25].mxu0  ;;  %9928 = vmatprep.subr.bf16.mxu1 %v13413_v19  ;;  %13443 = vst [vmem:[#allocation19_spill] sm:$0xff] %v11702_v29  ;;  %v4276_v10 = vshll.u32 %v11702_v29, 16 }
 0x12c   : > { %v11644_v55 = vpop.f32.mrb[24].mxu1  ;;  %v11646_v37 = vpop.f32.mrb[26].mxu0  ;;  %v4084_v53 = vshll.u32 %v11625_v56, 16  ;;  %v4148_v56 = vshll.u32 %v11657_v4, 16  ;;  %v11696_v4 = vld [vmem:[%s10795_s5 + $0x88] sm:$0xf] }
 0x12d   : > { %v9596_v7 = vpop.f32.mrb[25].mxu1  ;;  %v9591_v30 = vpop.f32.mrb[27].mxu0  ;;  %13442 = vst [vmem:[#allocation18_spill] sm:$0xff] %v11696_v4 }
 0x12e   : > { %v11651_v17 = vpop.f32.mrb[26].mxu1  ;;  %v4086_v18 = vrot.slane %v4084_v53, 1  ;;  %v8889_v7 = vld [vmem:[%s10795_s5 + $0x78] sm:$0xf]  ;;  %v11680_v30 = vld [vmem:[%s10795_s5 + $0x7c] sm:$0xf] }
 0x12f   : > { %13433 = vst [vmem:[#allocation9_spill] sm:$0xff] %v11651_v17  ;;  %v9597_v40 = vpop.f32.mrb[27].mxu1  ;;  %9913 = vmatmul.mubr.msk.bf16.vlgmr.msra.gmra.mrb[132].mxu0 %vm287_vm3, %v3895_v35  ;;  %v4023_v35 = vsel %vm274_vm2, %v4018_v15, %v4022_v6  ;;  %13438 = vst [vmem:[#allocation14_spill] sm:$0xff] %v11680_v30  ;;  %v4212_v6 = vshll.u32 %v11663_v49, 16 }
 0x130   : > { %9923 = vmatpush3.bf16.msra.mxu0 %v11573_v31  ;;  %9924 = vmatprep.mubr.msk.bf16.mxu0 %vm10695_vm1, %v13413_v19  ;;  %v4207_v40 = vshll.u32 %v8932_v26, 16 }
 0x131   : > { %9919 = vmatmul.mubr.msk.bf16.vlgmr.msra.gmra.mrb[132].mxu1 %vm287_vm3, %v3959_v16  ;;  %9934 = vmatprep.subr.bf16.mxu0 %v13413_v19 }
 0x132   : > { %9929 = vmatpush3.bf16.msra.mxu1 %v11573_v31  ;;  %v11672_v21 = vpop.f32.mrb[28].mxu0  ;;  %9930 = vmatprep.mubr.msk.bf16.mxu1 %vm10695_vm1, %v13413_v19  ;;  %v4209_v15 = vrot.slane %v4207_v40, 1  ;;  %v4150_v40 = vrot.slane %v4148_v56, 1 }
 0x133   : > { %13437 = vst [vmem:[#allocation13_spill] sm:$0xff] %v11672_v21  ;;  %v9602_v28 = vpop.f32.mrb[29].mxu0  ;;  %9940 = vmatprep.subr.bf16.mxu1 %v13413_v19  ;;  %v4145_v21 = vrot.slane %v4143_v43, 1  ;;  %v8892_v43 = vld [vmem:[%s10795_s5 + $0x84] sm:$0xf] }
 0x134   : > { %v11682_v16 = vpop.f32.mrb[28].mxu1  ;;  %v11684_v3 = vpop.f32.mrb[30].mxu0  ;;  %v4205_v28 = vshrl.u32 %v8932_v26, 16  ;;  %v11713_v56 = vcombine.low %v8892_v43, %v11696_v4 }
 0x135   : > { %13439 = vst [vmem:[#allocation15_spill] sm:$0xff] %v11682_v16  ;;  %13440 = vst [vmem:[#allocation16_spill] sm:$0xff] %v11684_v3  ;;  %v9608_v51 = vpop.f32.mrb[29].mxu1  ;;  %v9603_v53 = vpop.f32.mrb[31].mxu0  ;;  %v4087_v16 = vsel %vm274_vm2, %v4082_v27, %v4086_v18  ;;  %v8938_v3 = vcombine.low %v8889_v7, %v11680_v30  ;;  %v4146_v26 = vor.u32 %v4145_v21, %v4141_v44  ;;  %v4271_v27 = vshll.u32 %v8935_v63, 16 }
 0x136   : > { %v11689_v17 = vpop.f32.mrb[30].mxu1  ;;  %v4210_v18 = vor.u32 %v4209_v15, %v4205_v28  ;;  %v11707_v7 = vld [vmem:[%s10795_s5 + $0x80] ss:$0 sps:$4 sm:$0x11]   ;;  %v8895_v44 = vld [vmem:[%s10795_s5 + $0x90] sm:$0xf] }
 0x137   : > { %13441 = vst [vmem:[#allocation17_spill] sm:$0xff] %v11689_v17  ;;  %v9609_v59 = vpop.f32.mrb[31].mxu1  ;;  %9925 = vmatmul.mubr.msk.bf16.vlgmr.msra.gmra.mrb[136].mxu0 %vm287_vm3, %v4023_v35  ;;  %v4214_v35 = vrot.slane %v4212_v6, 1  ;;  %13444 = vst [vmem:[#allocation20_spill] sm:$0xff] %v11707_v7  ;;  %v4335_v53 = vshll.u32 %v8938_v3, 16  ;;  %v4269_v30 = vshrl.u32 %v8935_v63, 16 }
 0x138   : > { %9935 = vmatpush3.bf16.msra.mxu0 %v11573_v31  ;;  %9936 = vmatprep.mubr.msk.bf16.mxu0 %vm10695_vm1, %v13413_v19  ;;  %v11717_v21 = vld [vmem:[%s10795_s5 + $0x94] sm:$0xf]  ;;  %v4151_v59 = vsel %vm274_vm2, %v4146_v26, %v4150_v40  ;;  %v4273_v49 = vrot.slane %v4271_v27, 1  ;;  %v4333_v26 = vshrl.u32 %v8938_v3, 16  ;;  %v4340_v40 = vshll.u32 %v11707_v7, 16 }
 0x139   : > { %9931 = vmatmul.mubr.msk.bf16.vlgmr.msra.gmra.mrb[136].mxu1 %vm287_vm3, %v4087_v16  ;;  %9946 = vmatprep.subr.bf16.mxu0 %v13413_v19  ;;  %13445 = vst [vmem:[#allocation21_spill] sm:$0xff] %v11717_v21  ;;  %v4337_v63 = vrot.slane %v4335_v53, 1  ;;  %v11740_v27 = vld [vmem:[%s10795_s5 + $0x8c] ss:$0 sps:$4 sm:$0x11]  }
 0x13a   : > { %9941 = vmatpush3.bf16.msra.mxu1 %v11573_v31  ;;  %v1335_v51 = vpop.f32.mrb[32].mxu0  ;;  %9942 = vmatprep.mubr.msk.bf16.mxu1 %vm10695_vm1, %v13413_v19  ;;  %13447 = vst [vmem:[#allocation23_spill] sm:$0xff] %v11740_v27  ;;  %v4274_v3 = vor.u32 %v4273_v49, %v4269_v30  ;;  %v8898_v53 = vld [vmem:[%s10795_s5 + $0x9c] sm:$0xf]  ;;  %v4397_v30 = vshrl.u32 %v11713_v56, 16 }
 0x13b   : > { %v11720_v16 = vadd.f32 %v1335_v51, %v11452_v22  ;;  %v9614_v28 = vpop.f32.mrb[33].mxu0  ;;  %9952 = vmatprep.subr.bf16.mxu1 %v13413_v19  ;;  %v4215_v51 = vsel %vm274_vm2, %v4210_v18, %v4214_v35  ;;  %v4278_v18 = vrot.slane %v4276_v10, 1  ;;  %v11746_v35 = vld [vmem:[%s10795_s5 + $0x98] ss:$0 sps:$4 sm:$0x11]   ;;  %v4338_v49 = vor.u32 %v4337_v63, %v4333_v26 }
 0x13c   : > { %v1378_v15 = vpop.f32.mrb[32].mxu1  ;;  %v1338_v6 = vpop.f32.mrb[34].mxu0  ;;  %v8944_v28 = vcombine.low %v8895_v44, %v11717_v21  ;;  %v11752_v44 = vld [vmem:[%s10795_s5 + $0xa0] sm:$0xf]  ;;  %v4342_v10 = vrot.slane %v4340_v40, 1 }
 0x13d   : > { %13446 = vst [vmem:[#allocation22_spill] sm:$0xff] %v11720_v16  ;;  %v11726_v43 = vadd.f32 %v1378_v15, %v11458_v45  ;;  %v9620_v4 = vpop.f32.mrb[33].mxu1  ;;  %v11729_v17 = vadd.f32 %v1338_v6, %v11460_v20  ;;  %v9615_v22 = vpop.f32.mrb[35].mxu0  ;;  %v4399_v45 = vshll.u32 %v11713_v56, 16  ;;  %13448 = vst [vmem:[#allocation24_spill] sm:$0xff] %v11752_v44  ;;  %v4279_v29 = vsel %vm274_vm2, %v4274_v3, %v4278_v18 }
 0x13e   : > { %v1381_v16 = vpop.f32.mrb[34].mxu1  ;;  %v4404_v22 = vshll.u32 %v11740_v27, 16  ;;  %v4461_v26 = vshrl.u32 %v8944_v28, 16  ;;  %v8947_v63 = vcombine.low %v8898_v53, %v11752_v44 }
 0x13f   : > { %v11736_v4 = vadd.f32 %v1381_v16, %v11463_v60  ;;  %v9621_v20 = vpop.f32.mrb[35].mxu1  ;;  %9937 = vmatmul.mubr.msk.bf16.vlgmr.msra.gmra.mrb[140].mxu0 %vm287_vm3, %v4151_v59  ;;  %v4463_v60 = vshll.u32 %v8944_v28, 16  ;;  %v4401_v15 = vrot.slane %v4399_v45, 1 }
 0x140   : > { %9947 = vmatpush3.bf16.msra.mxu0 %v11573_v31  ;;  %9948 = vmatprep.mubr.msk.bf16.mxu0 %vm10695_vm1, %v13413_v19  ;;  %v11765_v20 = vld [vmem:[%s10795_s5 + $0xac] sm:$0xf]  ;;  %v4527_v18 = vshll.u32 %v8947_v63, 16 }
 0x141   : > { %9943 = vmatmul.mubr.msk.bf16.vlgmr.msra.gmra.mrb[140].mxu1 %vm287_vm3, %v4215_v51  ;;  %9958 = vmatprep.subr.bf16.mxu0 %v13413_v19  ;;  %v8901_v51 = vld [vmem:[%s10795_s5 + $0xa8] sm:$0xf]  ;;  %13450 = vst [vmem:[#allocation26_spill] sm:$0xff] %v11765_v20 }
 0x142   : > { %9953 = vmatpush3.bf16.msra.mxu1 %v11573_v31  ;;  %v1421_v16 = vpop.f32.mrb[36].mxu0  ;;  %9954 = vmatprep.mubr.msk.bf16.mxu1 %vm10695_vm1, %v13413_v19  ;;  %v8950_v28 = vcombine.low %v8901_v51, %v11765_v20  ;;  %v11807_v51 = vld [vmem:[%s10795_s5 + $0xc4] sm:$0xf] }
 0x143   : > { %v11759_v6 = vadd.f32 %v1421_v16, %v11472_v11  ;;  %v9626_v59 = vpop.f32.mrb[37].mxu0  ;;  %9964 = vmatprep.subr.bf16.mxu1 %v13413_v19  ;;  %v4465_v16 = vrot.slane %v4463_v60, 1  ;;  %v11792_v60 = vld [vmem:[%s10795_s5 + $0xb8] sm:$0xf]  ;;  %13452 = vst [vmem:[#allocation28_spill] sm:$0xff] %v11807_v51 }
 0x144   : > { %v1464_v21 = vpop.f32.mrb[36].mxu1  ;;  %v1424_v7 = vpop.f32.mrb[38].mxu0  ;;  %v4468_v59 = vshll.u32 %v11746_v35, 16  ;;  %v4589_v44 = vshrl.u32 %v8950_v28, 16 }
 0x145   : > { %13449 = vst [vmem:[#allocation25_spill] sm:$0xff] %v11759_v6  ;;  %v11770_v56 = vadd.f32 %v1464_v21, %v11478_v34  ;;  %v9632_v11 = vpop.f32.mrb[37].mxu1  ;;  %v11773_v40 = vadd.f32 %v1424_v7, %v11480_v42  ;;  %v9627_v45 = vpop.f32.mrb[39].mxu0  ;;  %v4343_v6 = vsel %vm274_vm2, %v4338_v49, %v4342_v10  ;;  %v4402_v42 = vor.u32 %v4401_v15, %v4397_v30  ;;  %v11786_v21 = vld [vmem:[%s10795_s5 + $0xa4] ss:$0 sps:$4 sm:$0x11]  }
 0x146   : > { %v1467_v27 = vpop.f32.mrb[38].mxu1  ;;  %v4406_v7 = vrot.slane %v4404_v22, 1  ;;  %v11798_v49 = vld [vmem:[%s10795_s5 + $0xb0] ss:$0 sps:$4 sm:$0x11]   ;;  %v4591_v10 = vshll.u32 %v8950_v28, 16 }
 0x147   : > { %v11779_v3 = vadd.f32 %v1467_v27, %v11483_v38  ;;  %v9633_v34 = vpop.f32.mrb[39].mxu1  ;;  %9949 = vmatmul.mubr.msk.bf16.vlgmr.msra.gmra.mrb[144].mxu0 %vm287_vm3, %v4279_v29  ;;  %v4466_v38 = vor.u32 %v4465_v16, %v4461_v26  ;;  %v4470_v27 = vrot.slane %v4468_v59, 1  ;;  %v8904_v29 = vld [vmem:[%s10795_s5 + $0xb4] sm:$0xf]  ;;  %v8907_v22 = vld [vmem:[%s10795_s5 + $0xc0] sm:$0xf] }
 0x148   : > { %9959 = vmatpush3.bf16.msra.mxu0 %v11573_v31  ;;  %9960 = vmatprep.mubr.msk.bf16.mxu0 %vm10695_vm1, %v13413_v19  ;;  %v4525_v45 = vshrl.u32 %v8947_v63, 16  ;;  %v4529_v16 = vrot.slane %v4527_v18, 1  ;;  %v4532_v59 = vshll.u32 %v11786_v21, 16  ;;  %v8953_v34 = vcombine.low %v8904_v29, %v11792_v60  ;;  %v11828_v28 = vld [vmem:[%s10795_s5 + $0xbc] ss:$0 sps:$4 sm:$0x11]  }
 0x149   : > { %9955 = vmatmul.mubr.msk.bf16.vlgmr.msra.gmra.mrb[144].mxu1 %vm287_vm3, %v4343_v6  ;;  %9970 = vmatprep.subr.bf16.mxu0 %v13413_v19  ;;  %v4407_v6 = vsel %vm274_vm2, %v4402_v42, %v4406_v7  ;;  %v4471_v7 = vsel %vm274_vm2, %v4466_v38, %v4470_v27  ;;  %v4596_v63 = vshll.u32 %v11798_v49, 16  ;;  %v8956_v18 = vcombine.low %v8907_v22, %v11807_v51  ;;  %v11836_v22 = vld [vmem:[%s10795_s5 + $0xc8] ss:$0 sps:$4 sm:$0x11]  }
 0x14a   : > { %9965 = vmatpush3.bf16.msra.mxu1 %v11573_v31  ;;  %v1507_v53 = vpop.f32.mrb[40].mxu0  ;;  %9966 = vmatprep.mubr.msk.bf16.mxu1 %vm10695_vm1, %v13413_v19  ;;  %v4534_v38 = vrot.slane %v4532_v59, 1  ;;  %v4655_v27 = vshll.u32 %v8953_v34, 16 }
 0x14b   : > { %v11801_v30 = vadd.f32 %v1507_v53, %v11492_v14  ;;  %v9638_v15 = vpop.f32.mrb[41].mxu0  ;;  %9976 = vmatprep.subr.bf16.mxu1 %v13413_v19 }
 0x14c   : > { %v1550_v26 = vpop.f32.mrb[40].mxu1  ;;  %v1510_v11 = vpop.f32.mrb[42].mxu0 }
 0x14d   : > { %13451 = vst [vmem:[#allocation27_spill] sm:$0xff] %v11801_v30  ;;  %v11812_v20 = vadd.f32 %v1550_v26, %v11498_v54  ;;  %v9644_v14 = vpop.f32.mrb[41].mxu1  ;;  %v11815_v53 = vadd.f32 %v1510_v11, %v11500_v24  ;;  %v9639_v42 = vpop.f32.mrb[43].mxu0  ;;  %v4593_v30 = vrot.slane %v4591_v10, 1  ;;  %v4530_v24 = vor.u32 %v4529_v16, %v4525_v45 }
 0x14e   : > { %v1553_v15 = vpop.f32.mrb[42].mxu1  ;;  %v4719_v26 = vshll.u32 %v8956_v18, 16  ;;  %v4653_v42 = vshrl.u32 %v8953_v34, 16 }
 0x14f   : > { %v11821_v29 = vadd.f32 %v1553_v15, %v11503_v1  ;;  %v9645_v54 = vpop.f32.mrb[43].mxu1  ;;  %9961 = vmatmul.mubr.msk.bf16.vlgmr.msra.gmra.mrb[148].mxu0 %vm287_vm3, %v4407_v6  ;;  %v4594_v10 = vor.u32 %v4593_v30, %v4589_v44  ;;  %v4598_v6 = vrot.slane %v4596_v63, 1  ;;  %v4535_v14 = vsel %vm274_vm2, %v4530_v24, %v4534_v38 }
 0x150   : > { %9971 = vmatpush3.bf16.msra.mxu0 %v11573_v31  ;;  %9972 = vmatprep.mubr.msk.bf16.mxu0 %vm10695_vm1, %v13413_v19  ;;  %v4660_v15 = vshll.u32 %v11828_v28, 16  ;;  %v4721_v51 = vrot.slane %v4719_v26, 1  ;;  %v4724_v24 = vshll.u32 %v11836_v22, 16 }
 0x151   : > { %9967 = vmatmul.mubr.msk.bf16.vlgmr.msra.gmra.mrb[148].mxu1 %vm287_vm3, %v4471_v7  ;;  %9982 = vmatprep.subr.bf16.mxu0 %v13413_v19  ;;  %v4657_v7 = vrot.slane %v4655_v27, 1 }
 0x152   : > { %9977 = vmatpush3.bf16.msra.mxu1 %v11573_v31  ;;  %v1593_v1 = vpop.f32.mrb[44].mxu0  ;;  %9978 = vmatprep.mubr.msk.bf16.mxu1 %vm10695_vm1, %v13413_v19 }
 0x153   : > { %v11839_v11 = vadd.f32 %v1593_v1, %v11516_v50  ;;  %v9650_v45 = vpop.f32.mrb[45].mxu0  ;;  %9988 = vmatprep.subr.bf16.mxu1 %v13413_v19  ;;  %v4599_v1 = vsel %vm274_vm2, %v4594_v10, %v4598_v6  ;;  %v4726_v10 = vrot.slane %v4724_v24, 1  ;;  %v8975_v6 = vld [vmem:[%s13351_s1 + $0xa] sm:$0x3] }
 0x154   : > { %v1636_v16 = vpop.f32.mrb[44].mxu1  ;;  %v1596_v59 = vpop.f32.mrb[46].mxu0  ;;  %v4717_v45 = vshrl.u32 %v8956_v18, 16  ;;  %v8959_v18 = vld [vmem:[%s10795_s5 + $0xc] sm:$0xe] }
 0x155   : > { %v11845_v44 = vadd.f32 %v1636_v16, %v11526_v2  ;;  %v9656_v30 = vpop.f32.mrb[45].mxu1  ;;  %v11848_v63 = vadd.f32 %v1596_v59, %v11528_v41  ;;  %v9651_v50 = vpop.f32.mrb[47].mxu0  ;;  %v4658_v2 = vor.u32 %v4657_v7, %v4653_v42  ;;  %v4662_v41 = vrot.slane %v4660_v15, 1  ;;  %v8960_v59 = vld [vmem:[%s10795_s5 + $0x18] sm:$0xe] }
 0x156   : > { %v1639_v54 = vpop.f32.mrb[46].mxu1  ;;  %v4722_v27 = vor.u32 %v4721_v51, %v4717_v45  ;;  %v8976_v7 = vcombine.low %v8959_v18, %v11513_v58  ;;  %v11882_v50 = vsel %vm291_vm0, %v8975_v6, 0  ;;  %v8978_v45 = vcombine.low %v8960_v59, %v11524_v32 }
 0x157   : > { %v11853_v34 = vadd.f32 %v1639_v54, %v11532_v61  ;;  %v9657_v38 = vpop.f32.mrb[47].mxu1  ;;  %9973 = vmatmul.mubr.msk.bf16.vlgmr.msra.gmra.mrb[152].mxu0 %vm287_vm3, %v4535_v14  ;;  %v4663_v42 = vsel %vm274_vm2, %v4658_v2, %v4662_v41  ;;  %v8962_v2 = vld [vmem:[%s10795_s5 + $0x30] sm:$0xe]  ;;  %v4879_v41 = vrot.slane %v11557_v33, 1 }
 0x158   : > { %9983 = vmatpush3.bf16.msra.mxu0 %v11573_v31  ;;  %9984 = vmatprep.mubr.msk.bf16.mxu0 %vm10695_vm1, %v13413_v19  ;;  %v4826_v38 = vrot.slane %v11540_v23, 1 }
 0x159   : > { %9979 = vmatmul.mubr.msk.bf16.vlgmr.msra.gmra.mrb[152].mxu1 %vm287_vm3, %v4599_v1  ;;  %9994 = vmatprep.subr.bf16.mxu0 %v13413_v19  ;;  %v4727_v1 = vsel %vm274_vm2, %v4722_v27, %v4726_v10  ;;  %v8982_v27 = vcombine.low %v8962_v2, %v11563_v0  ;;  %v4979_v2 = vrot.slane %v11593_v52, 1 }
 0x15a   : > { %9989 = vmatpush3.bf16.msra.mxu1 %v11573_v31  ;;  %v1679_v61 = vpop.f32.mrb[48].mxu0  ;;  %9990 = vmatprep.mubr.msk.bf16.mxu1 %vm10695_vm1, %v13413_v19 }
 0x15b   : > { %v11869_v26 = vadd.f32 %v1679_v61, %v11552_v8  ;;  %v9662_v16 = vpop.f32.mrb[49].mxu0  ;;  %10000 = vmatprep.subr.bf16.mxu1 %v13413_v19 }
 0x15c   : > { %v1722_v14 = vpop.f32.mrb[48].mxu1  ;;  %v1682_v31 = vpop.f32.mrb[50].mxu0 }
 0x15d   : > { %v11876_v51 = vadd.f32 %v1722_v14, %v11565_v25  ;;  %v9668_v15 = vpop.f32.mrb[49].mxu1  ;;  %v11879_v30 = vadd.f32 %v1682_v31, %v11567_v47  ;;  %v9663_v8 = vpop.f32.mrb[51].mxu0  ;;  %v8961_v25 = vld [vmem:[%s10795_s5 + $0x24] sm:$0xe]  ;;  %v4825_v47 = vrot.slane %v8976_v7, 1 }
 0x15e   : > { %v1725_v54 = vpop.f32.mrb[50].mxu1  ;;  %v8980_v18 = vcombine.low %v8961_v25, %v11549_v12  ;;  %v11918_v7 = vld [vmem:[%s10795_s5 + $0x20] ss:$0 sps:$4 sm:$0x11]   ;;  %v11925_v8 = vld [vmem:[%s10795_s5 + $0x1c] sm:$0xf] }
 0x15f   : > { %v11887_v24 = vadd.f32 %v1725_v54, %v11575_v62  ;;  %v9669_v58 = vpop.f32.mrb[51].mxu1  ;;  %9985 = vmatmul.mubr.msk.bf16.vlgmr.msra.gmra.mrb[156].mxu0 %vm287_vm3, %v4663_v42  ;;  %v4878_v62 = vrot.slane %v8978_v45, 1  ;;  %v4827_v16 = vsel %vm2008_vm4, %v4825_v47, %v4826_v38  ;;  %v4929_v42 = vrot.slane %v11581_v48, 1  ;;  %13453 = vst [vmem:[#allocation29_spill] sm:$0xff] %v11918_v7  ;;  %v9170_v54 = vld [vmem:[%s10795_s5 + $0x18] sm:$0xe] }
 0x160   : > { %9995 = vmatpush3.bf16.msra.mxu0 %v11882_v50  ;;  %9996 = vmatprep.mubr.msk.bf16.mxu0 %vm10695_vm1, %v13413_v19  ;;  %v4928_v0 = vrot.slane %v8980_v18, 1  ;;  %v8963_v48 = vld [vmem:[%s10795_s5 + $0x3c] sm:$0xe]  ;;  %v7642_v45 = vrot.slane %v11918_v7, 1  ;;  %v8964_v58 = vld [vmem:[%s10795_s5 + $0x48] sm:$0xe] }
 0x161   : > { %9991 = vmatmul.mubr.msk.bf16.vlgmr.msra.gmra.mrb[156].mxu1 %vm287_vm3, %v4727_v1  ;;  %10006 = vmatprep.subr.bf16.mxu0 %v13413_v19  ;;  %v4880_v31 = vsel %vm2008_vm4, %v4878_v62, %v4879_v41  ;;  %v9187_v1 = vcombine.low %v9170_v54, %v11925_v8  ;;  %v11941_v25 = vld [vmem:[%s10795_s5 + $0x28] sm:$0xf]  ;;  %v9171_v47 = vld [vmem:[%s10795_s5 + $0x24] sm:$0xe]  ;;  %v8986_v52 = vcombine.low %v8964_v58, %v11604_v39  ;;  %v13459_v54 = vld [vmem:[#allocation9_spill] sm:$0xff] }
 0x162   : > { %10001 = vmatpush3.bf16.msra.mxu1 %v11882_v50  ;;  %v1765_v32 = vpop.f32.mrb[52].mxu0  ;;  %10002 = vmatprep.mubr.msk.bf16.mxu1 %vm10695_vm1, %v13413_v19  ;;  %13455 = vst [vmem:[#allocation31_spill] sm:$0xff] %v11941_v25  ;;  %v9189_v62 = vcombine.low %v9171_v47, %v11941_v25  ;;  %v11971_v39 = vld [vmem:[%s10795_s5 + $0x38] ss:$0 sps:$4 sm:$0x11]  }
 0x163   : > { %v11904_v61 = vadd.f32 %v1765_v32, %v11596_v57  ;;  %v9674_v23 = vpop.f32.mrb[53].mxu0  ;;  %10012 = vmatprep.subr.bf16.mxu1 %v13413_v19  ;;  %v7641_v32 = vrot.slane %v9187_v1, 1  ;;  %13458 = vst [vmem:[#allocation34_spill] sm:$0xff] %v11971_v39  ;;  %v11978_v1 = vld [vmem:[%s10795_s5 + $0x34] sm:$0xf]  ;;  %v5078_v47 = vrot.slane %v8986_v52, 1 }
 0x164   : > { %v1808_v10 = vpop.f32.mrb[52].mxu1  ;;  %v1768_v6 = vpop.f32.mrb[54].mxu0  ;;  %13460 = vst [vmem:[#allocation9_spill] sm:$0xff] %v11978_v1 }
 0x165   : > { %v11910_v59 = vadd.f32 %v1808_v10, %v11606_v5  ;;  %v9680_v33 = vpop.f32.mrb[53].mxu1  ;;  %v11913_v12 = vadd.f32 %v1768_v6, %v11608_v13  ;;  %v9675_v57 = vpop.f32.mrb[55].mxu0  ;;  %v4978_v13 = vrot.slane %v8982_v27, 1  ;;  %v8984_v27 = vcombine.low %v8963_v48, %v11588_v46 }
 0x166   : > { %v1811_v14 = vpop.f32.mrb[54].mxu1  ;;  %v11958_v33 = vsel %vm2008_vm4, %v7641_v32, %v7642_v45  ;;  %v7694_v57 = vrot.slane %v9189_v62, 1  ;;  %v9172_v45 = vld [vmem:[%s10795_s5 + $0x30] sm:$0xe]  ;;  %v8965_v62 = vld [vmem:[%s10795_s5 + $0x54] sm:$0xe] }
 0x167   : > { %v11921_v5 = vadd.f32 %v1811_v14, %v11613_v9  ;;  %v9681_v15 = vpop.f32.mrb[55].mxu1  ;;  %9997 = vmatmul.mubr.msk.bf16.vlgmr.msra.gmra.mrb[160].mxu0 %vm287_vm3, %v4827_v16  ;;  %v11935_v9 = vld [vmem:[%s10795_s5 + $0x2c] ss:$0 sps:$4 sm:$0x11]   ;;  %v4930_v16 = vsel %vm2008_vm4, %v4928_v0, %v4929_v42  ;;  %13456 = vst [vmem:[#allocation32_spill] sm:$0xff] %v11958_v33  ;;  %v4980_v0 = vsel %vm2008_vm4, %v4978_v13, %v4979_v2  ;;  %v13461_v13 = vld [vmem:[#allocation5_spill] sm:$0xff] }
 0x168   : > { %10007 = vmatpush3.bf16.msra.mxu0 %v11882_v50  ;;  %10008 = vmatprep.mubr.msk.bf16.mxu0 %vm10695_vm1, %v13413_v19  ;;  %13454 = vst [vmem:[#allocation30_spill] sm:$0xff] %v11935_v9  ;;  %v7695_v41 = vrot.slane %v11935_v9, 1  ;;  %v5029_v58 = vrot.slane %v13461_v13, 1  ;;  %v7745_v2 = vrot.slane %v11971_v39, 1  ;;  %v13466_v13 = vld [vmem:[#allocation7_spill] sm:$0xff]  ;;  %v13470_v39 = vld [vmem:[#allocation8_spill] sm:$0xff] }
 0x169   : > { %10003 = vmatmul.mubr.msk.bf16.vlgmr.msra.gmra.mrb[160].mxu1 %vm287_vm3, %v4880_v31  ;;  %10018 = vmatprep.subr.bf16.mxu0 %v13413_v19  ;;  %v11988_v32 = vld [vmem:[%s10795_s5 + $0x44] ss:$0 sps:$4 sm:$0x11]  }
 0x16a   : > { %10013 = vmatpush3.bf16.msra.mxu1 %v11882_v50  ;;  %v1851_v38 = vpop.f32.mrb[56].mxu0  ;;  %10014 = vmatprep.mubr.msk.bf16.mxu1 %vm10695_vm1, %v13413_v19  ;;  %v11968_v42 = vsel %vm2008_vm4, %v7694_v57, %v7695_v41  ;;  %13462 = vst [vmem:[#allocation5_spill] sm:$0xff] %v11988_v32  ;;  %v11994_v41 = vld [vmem:[%s10795_s5 + $0x40] sm:$0xf] }
 0x16b   : > { %v11951_v18 = vadd.f32 %v1851_v38, %v11634_v36  ;;  %v9686_v23 = vpop.f32.mrb[57].mxu0  ;;  %10024 = vmatprep.subr.bf16.mxu1 %v13413_v19  ;;  %13457 = vst [vmem:[#allocation33_spill] sm:$0xff] %v11968_v42  ;;  %v9191_v38 = vcombine.low %v9172_v45, %v11978_v1  ;;  %13463 = vst [vmem:[#allocation35_spill] sm:$0xff] %v11994_v41  ;;  %v13468_v42 = vld [vmem:[#allocation15_spill] sm:$0xff] }
 0x16c   : > { %v1894_v10 = vpop.f32.mrb[56].mxu1  ;;  %v1854_v6 = vpop.f32.mrb[58].mxu0  ;;  %v9173_v23 = vld [vmem:[%s10795_s5 + $0x3c] sm:$0xe] }
 0x16d   : > { %v11961_v36 = vadd.f32 %v1894_v10, %v11644_v55  ;;  %v9692_v14 = vpop.f32.mrb[57].mxu1  ;;  %v11964_v31 = vadd.f32 %v1854_v6, %v11646_v37  ;;  %v9687_v46 = vpop.f32.mrb[59].mxu0  ;;  %v5028_v37 = vrot.slane %v8984_v27, 1  ;;  %v13464_v10 = vld [vmem:[#allocation6_spill] sm:$0xff]  ;;  %v7744_v52 = vrot.slane %v9191_v38, 1 }
 0x16e   : > { %v1897_v15 = vpop.f32.mrb[58].mxu1  ;;  %v5079_v6 = vrot.slane %v13464_v10, 1  ;;  %v9193_v57 = vcombine.low %v9173_v23, %v11994_v41  ;;  %v7795_v14 = vrot.slane %v11988_v32, 1  ;;  %v13465_v46 = vld [vmem:[#allocation13_spill] sm:$0xff]  ;;  %v8988_v10 = vcombine.low %v8965_v62, %v13466_v13 }
 0x16f   : > { %v11974_v48 = vadd.f32 %v1897_v15, %v13459_v54  ;;  %v9693_v55 = vpop.f32.mrb[59].mxu1  ;;  %10009 = vmatmul.mubr.msk.bf16.vlgmr.msra.gmra.mrb[164].mxu0 %vm287_vm3, %v4930_v16  ;;  %v8966_v16 = vld [vmem:[%s10795_s5 + $0x60] sm:$0xe]  ;;  %v5030_v45 = vsel %vm2008_vm4, %v5028_v37, %v5029_v58  ;;  %v12011_v38 = vsel %vm2008_vm4, %v7744_v52, %v7745_v2  ;;  %v8967_v58 = vld [vmem:[%s10795_s5 + $0x6c] sm:$0xe]  ;;  %v13473_v52 = vld [vmem:[#allocation17_spill] sm:$0xff] }
 0x170   : > { %10019 = vmatpush3.bf16.msra.mxu0 %v11882_v50  ;;  %10020 = vmatprep.mubr.msk.bf16.mxu0 %vm10695_vm1, %v13413_v19  ;;  %13467 = vst [vmem:[#allocation6_spill] sm:$0xff] %v12011_v38  ;;  %v7794_v23 = vrot.slane %v9193_v57, 1  ;;  %v8990_v41 = vcombine.low %v8966_v16, %v13470_v39  ;;  %v5080_v37 = vsel %vm2008_vm4, %v5078_v47, %v5079_v6  ;;  %v12026_v62 = vld [vmem:[%s10795_s5 + $0x50] ss:$0 sps:$4 sm:$0x11]   ;;  %v5128_v47 = vrot.slane %v8988_v10, 1 }
 0x171   : > { %10015 = vmatmul.mubr.msk.bf16.vlgmr.msra.gmra.mrb[164].mxu1 %vm287_vm3, %v4980_v0  ;;  %10030 = vmatprep.subr.bf16.mxu0 %v13413_v19  ;;  %13472 = vst [vmem:[#allocation7_spill] sm:$0xff] %v12026_v62  ;;  %v9174_v39 = vld [vmem:[%s10795_s5 + $0x48] sm:$0xe]  ;;  %v13475_v6 = vld [vmem:[#allocation10_spill] sm:$0xff] }
 0x172   : > { %10025 = vmatpush3.bf16.msra.mxu1 %v11882_v50  ;;  %v1937_v27 = vpop.f32.mrb[60].mxu0  ;;  %10026 = vmatprep.mubr.msk.bf16.mxu1 %vm10695_vm1, %v13413_v19  ;;  %v12023_v2 = vsel %vm2008_vm4, %v7794_v23, %v7795_v14  ;;  %v5129_v16 = vrot.slane %v13475_v6, 1  ;;  %v7845_v14 = vrot.slane %v12026_v62, 1  ;;  %v12049_v23 = vld [vmem:[%s10795_s5 + $0x58] sm:$0xf] }
 0x173   : > { %v12005_v15 = vadd.f32 %v1937_v27, %v13465_v46  ;;  %v9698_v0 = vpop.f32.mrb[61].mxu0  ;;  %10036 = vmatprep.subr.bf16.mxu1 %v13413_v19  ;;  %13471 = vst [vmem:[#allocation13_spill] sm:$0xff] %v12023_v2  ;;  %13478 = vst [vmem:[#allocation8_spill] sm:$0xff] %v12049_v23 }
 0x174   : > { %v1980_v54 = vpop.f32.mrb[60].mxu1  ;;  %v1940_v55 = vpop.f32.mrb[62].mxu0  ;;  %v13469_v0 = vld [vmem:[#allocation16_spill] sm:$0xff]  ;;  %v5130_v62 = vsel %vm2008_vm4, %v5128_v47, %v5129_v16  ;;  %v8969_v16 = vld [vmem:[%s10795_s5 + $0x84] sm:$0xe] }
 0x175   : > { %v12014_v27 = vadd.f32 %v1980_v54, %v13468_v42  ;;  %v9704_v46 = vpop.f32.mrb[61].mxu1  ;;  %v12017_v33 = vadd.f32 %v1940_v55, %v13469_v0  ;;  %v9699_v32 = vpop.f32.mrb[63].mxu0  ;;  %v12043_v54 = vld [vmem:[%s10795_s5 + $0x5c] ss:$0 sps:$4 sm:$0x11]   ;;  %v5178_v55 = vrot.slane %v8990_v41, 1 }
 0x176   : > { %v1983_v9 = vpop.f32.mrb[62].mxu1  ;;  %v12033_v32 = vld [vmem:[%s10795_s5 + $0x4c] sm:$0xf]  ;;  %13476 = vst [vmem:[#allocation16_spill] sm:$0xff] %v12043_v54  ;;  %v9175_v46 = vld [vmem:[%s10795_s5 + $0x54] sm:$0xe] }
 0x177   : > { %v12029_v42 = vadd.f32 %v1983_v9, %v13473_v52  ;;  %v9705_v57 = vpop.f32.mrb[63].mxu1  ;;  %10021 = vmatmul.mubr.msk.bf16.vlgmr.msra.gmra.mrb[168].mxu0 %vm287_vm3, %v5030_v45  ;;  %13474 = vst [vmem:[#allocation15_spill] sm:$0xff] %v12033_v32  ;;  %v9195_v9 = vcombine.low %v9174_v39, %v12033_v32  ;;  %v13477_v45 = vld [vmem:[#allocation12_spill] sm:$0xff]  ;;  %v13479_v0 = vld [vmem:[#allocation11_spill] sm:$0xff]  ;;  %v7895_v6 = vrot.slane %v12043_v54, 1  ;;  %v13480_v41 = vld [vmem:[#allocation22_spill] sm:$0xff] }
 0x178   : > { %10031 = vmatpush3.bf16.msra.mxu0 %v11882_v50  ;;  %10032 = vmatprep.mubr.msk.bf16.mxu0 %vm10695_vm1, %v13413_v19  ;;  %v8992_v13 = vcombine.low %v8967_v58, %v13477_v45  ;;  %v5179_v52 = vrot.slane %v13479_v0, 1  ;;  %v8968_v57 = vld [vmem:[%s10795_s5 + $0x78] sm:$0xe] }
 0x179   : > { %10027 = vmatmul.mubr.msk.bf16.vlgmr.msra.gmra.mrb[168].mxu1 %vm287_vm3, %v5080_v37  ;;  %10042 = vmatprep.subr.bf16.mxu0 %v13413_v19  ;;  %v7844_v39 = vrot.slane %v9195_v9, 1  ;;  %v9197_v37 = vcombine.low %v9175_v46, %v12049_v23  ;;  %v13482_v23 = vld [vmem:[#allocation14_spill] sm:$0xff] }
 0x17a   : > { %10037 = vmatpush3.bf16.msra.mxu1 %v11882_v50  ;;  %v2052_v10 = vpop.f32.mrb[64].mxu0  ;;  %10038 = vmatprep.mubr.msk.bf16.mxu1 %vm10695_vm1, %v13413_v19  ;;  %v5228_v54 = vrot.slane %v8992_v13, 1  ;;  %v8994_v32 = vcombine.low %v8968_v57, %v13482_v23  ;;  %v5180_v47 = vsel %vm2008_vm4, %v5178_v55, %v5179_v52  ;;  %v12088_v23 = vld [vmem:[%s10795_s5 + $0x64] sm:$0xf]  ;;  %v9176_v57 = vld [vmem:[%s10795_s5 + $0x60] sm:$0xe] }
 0x17b   : > { %v12060_v2 = vadd.f32 %v2052_v10, %v13480_v41  ;;  %v9710_v58 = vpop.f32.mrb[65].mxu0  ;;  %10048 = vmatprep.subr.bf16.mxu1 %v13413_v19  ;;  %v12065_v0 = vsel %vm2008_vm4, %v7844_v39, %v7845_v14  ;;  %v7894_v9 = vrot.slane %v9197_v37, 1  ;;  %13486 = vst [vmem:[#allocation11_spill] sm:$0xff] %v12088_v23  ;;  %v8970_v55 = vld [vmem:[%s10795_s5 + $0x90] sm:$0xe]  ;;  %v9199_v52 = vcombine.low %v9176_v57, %v12088_v23  ;;  %v13488_v37 = vld [vmem:[#allocation20_spill] sm:$0xff] }
 0x17c   : > { %v2102_v45 = vpop.f32.mrb[64].mxu1  ;;  %v2055_v38 = vpop.f32.mrb[66].mxu0  ;;  %13481 = vst [vmem:[#allocation17_spill] sm:$0xff] %v12065_v0  ;;  %v13492_v0 = vld [vmem:[#allocation21_spill] sm:$0xff] }
 0x17d   : > { %v12068_v46 = vadd.f32 %v2102_v45, %v11726_v43  ;;  %v9716_v10 = vpop.f32.mrb[65].mxu1  ;;  %v12071_v41 = vadd.f32 %v2055_v38, %v11729_v17  ;;  %v9711_v58 = vpop.f32.mrb[67].mxu0  ;;  %v12077_v14 = vsel %vm2008_vm4, %v7894_v9, %v7895_v6  ;;  %v12080_v43 = vld [vmem:[%s10795_s5 + $0x68] ss:$0 sps:$4 sm:$0x11]   ;;  %v13485_v38 = vld [vmem:[#allocation19_spill] sm:$0xff] }
 0x17e   : > { %v2105_v1 = vpop.f32.mrb[66].mxu1  ;;  %13483 = vst [vmem:[#allocation10_spill] sm:$0xff] %v12077_v14  ;;  %13484 = vst [vmem:[#allocation12_spill] sm:$0xff] %v12080_v43  ;;  %v5229_v13 = vrot.slane %v13485_v38, 1  ;;  %v5279_v6 = vrot.slane %v13488_v37, 1  ;;  %v13490_v58 = vld [vmem:[#allocation18_spill] sm:$0xff] }
 0x17f   : > { %v12083_v39 = vadd.f32 %v2105_v1, %v11736_v4  ;;  %v9717_v17 = vpop.f32.mrb[67].mxu1  ;;  %10033 = vmatmul.mubr.msk.bf16.vlgmr.msra.gmra.mrb[172].mxu0 %vm287_vm3, %v5130_v62  ;;  %v7945_v4 = vrot.slane %v12080_v43, 1  ;;  %v12098_v1 = vld [vmem:[%s10795_s5 + $0x74] ss:$0 sps:$4 sm:$0x11]   ;;  %v5278_v62 = vrot.slane %v8994_v32, 1  ;;  %v8998_v43 = vcombine.low %v8970_v55, %v13492_v0 }
 0x180   : > { %10043 = vmatpush3.bf16.msra.mxu0 %v11882_v50  ;;  %10044 = vmatprep.mubr.msk.bf16.mxu0 %vm10695_vm1, %v13413_v19  ;;  %13487 = vst [vmem:[#allocation22_spill] sm:$0xff] %v12098_v1  ;;  %v12104_v45 = vld [vmem:[%s10795_s5 + $0x70] sm:$0xf]  ;;  %v9177_v9 = vld [vmem:[%s10795_s5 + $0x6c] sm:$0xe]  ;;  %v8996_v17 = vcombine.low %v8969_v16, %v13490_v58  ;;  %v7944_v38 = vrot.slane %v9199_v52, 1  ;;  %v5230_v25 = vsel %vm2008_vm4, %v5228_v54, %v5229_v13 }
 0x181   : > { %10039 = vmatmul.mubr.msk.bf16.vlgmr.msra.gmra.mrb[172].mxu1 %vm287_vm3, %v5180_v47  ;;  %10054 = vmatprep.subr.bf16.mxu0 %v13413_v19  ;;  %13489 = vst [vmem:[#allocation14_spill] sm:$0xff] %v12104_v45  ;;  %v9201_v57 = vcombine.low %v9177_v9, %v12104_v45  ;;  %v7995_v47 = vrot.slane %v12098_v1, 1  ;;  %v13491_v14 = vld [vmem:[#allocation25_spill] sm:$0xff]  ;;  %v5280_v55 = vsel %vm2008_vm4, %v5278_v62, %v5279_v6  ;;  %v13494_v13 = vld [vmem:[#allocation23_spill] sm:$0xff]  ;;  %v9178_v62 = vld [vmem:[%s10795_s5 + $0x78] sm:$0xe] }
 0x182   : > { %10049 = vmatpush3.bf16.msra.mxu1 %v11882_v50  ;;  %v2152_v10 = vpop.f32.mrb[68].mxu0  ;;  %10050 = vmatprep.mubr.msk.bf16.mxu1 %vm10695_vm1, %v13413_v19  ;;  %v12120_v16 = vsel %vm2008_vm4, %v7944_v38, %v7945_v4  ;;  %v5328_v54 = vrot.slane %v8996_v17, 1  ;;  %v5329_v4 = vrot.slane %v13494_v13, 1  ;;  %v8971_v6 = vld [vmem:[%s10795_s5 + $0x9c] sm:$0xe] }
 0x183   : > { %v12114_v32 = vadd.f32 %v2152_v10, %v13491_v14  ;;  %v9722_v37 = vpop.f32.mrb[69].mxu0  ;;  %10060 = vmatprep.subr.bf16.mxu1 %v13413_v19  ;;  %13493 = vst [vmem:[#allocation19_spill] sm:$0xff] %v12120_v16  ;;  %v7994_v52 = vrot.slane %v9201_v57, 1  ;;  %v12134_v57 = vld [vmem:[%s10795_s5 + $0x80] ss:$0 sps:$4 sm:$0x11]  }
 0x184   : > { %v2202_v23 = vpop.f32.mrb[68].mxu1  ;;  %v2155_v7 = vpop.f32.mrb[70].mxu0  ;;  %13496 = vst [vmem:[#allocation18_spill] sm:$0xff] %v12134_v57  ;;  %v9179_v37 = vld [vmem:[%s10795_s5 + $0x84] sm:$0xe]  ;;  %v13500_v45 = vld [vmem:[#allocation26_spill] sm:$0xff] }
 0x185   : > { %v12123_v9 = vadd.f32 %v2202_v23, %v11770_v56  ;;  %v9728_v14 = vpop.f32.mrb[69].mxu1  ;;  %v12126_v10 = vadd.f32 %v2155_v7, %v11773_v40  ;;  %v9723_v58 = vpop.f32.mrb[71].mxu0  ;;  %v12131_v38 = vsel %vm2008_vm4, %v7994_v52, %v7995_v47  ;;  %v5378_v7 = vrot.slane %v8998_v43, 1  ;;  %v12141_v23 = vld [vmem:[%s10795_s5 + $0x7c] sm:$0xf] }
 0x186   : > { %v2205_v0 = vpop.f32.mrb[70].mxu1  ;;  %13495 = vst [vmem:[#allocation20_spill] sm:$0xff] %v12131_v38  ;;  %13497 = vst [vmem:[#allocation25_spill] sm:$0xff] %v12141_v23  ;;  %v9203_v17 = vcombine.low %v9178_v62, %v12141_v23  ;;  %v8045_v47 = vrot.slane %v12134_v57, 1  ;;  %v12157_v43 = vld [vmem:[%s10795_s5 + $0x88] sm:$0xf]  ;;  %v5330_v23 = vsel %vm2008_vm4, %v5328_v54, %v5329_v4 }
 0x187   : > { %v12137_v56 = vadd.f32 %v2205_v0, %v11779_v3  ;;  %v9729_v40 = vpop.f32.mrb[71].mxu1  ;;  %10045 = vmatmul.mubr.msk.bf16.vlgmr.msra.gmra.mrb[176].mxu0 %vm287_vm3, %v5230_v25  ;;  %v12151_v3 = vld [vmem:[%s10795_s5 + $0x8c] ss:$0 sps:$4 sm:$0x11]   ;;  %v8972_v25 = vld [vmem:[%s10795_s5 + $0xa8] sm:$0xe]  ;;  %v9205_v0 = vcombine.low %v9179_v37, %v12157_v43 }
 0x188   : > { %10055 = vmatpush3.bf16.msra.mxu0 %v11882_v50  ;;  %10056 = vmatprep.mubr.msk.bf16.mxu0 %vm10695_vm1, %v13413_v19  ;;  %v5379_v14 = vrot.slane %v11746_v35, 1  ;;  %v8044_v58 = vrot.slane %v9203_v17, 1  ;;  %v8095_v13 = vrot.slane %v12151_v3, 1  ;;  %v13499_v38 = vld [vmem:[#allocation24_spill] sm:$0xff]  ;;  %v9002_v35 = vcombine.low %v8972_v25, %v13500_v45 }
 0x189   : > { %10051 = vmatmul.mubr.msk.bf16.vlgmr.msra.gmra.mrb[176].mxu1 %vm287_vm3, %v5280_v55  ;;  %10066 = vmatprep.subr.bf16.mxu0 %v13413_v19  ;;  %v13498_v55 = vld [vmem:[#allocation27_spill] sm:$0xff]  ;;  %v9000_v16 = vcombine.low %v8971_v6, %v13499_v38  ;;  %v8094_v37 = vrot.slane %v9205_v0, 1  ;;  %v12187_v45 = vld [vmem:[%s10795_s5 + $0x98] ss:$0 sps:$4 sm:$0x11]  }
 0x18a   : > { %10061 = vmatpush3.bf16.msra.mxu1 %v11882_v50  ;;  %v2252_v52 = vpop.f32.mrb[72].mxu0  ;;  %10062 = vmatprep.mubr.msk.bf16.mxu1 %vm10695_vm1, %v13413_v19  ;;  %v12174_v17 = vsel %vm2008_vm4, %v8044_v58, %v8045_v47  ;;  %v5380_v54 = vsel %vm2008_vm4, %v5378_v7, %v5379_v14  ;;  %13503 = vst [vmem:[#allocation27_spill] sm:$0xff] %v12187_v45  ;;  %v5429_v7 = vrot.slane %v11786_v21, 1  ;;  %v5478_v25 = vrot.slane %v9002_v35, 1  ;;  %v9181_v0 = vld [vmem:[%s10795_s5 + $0x9c] sm:$0xe] }
 0x18b   : > { %v12167_v40 = vadd.f32 %v2252_v52, %v13498_v55  ;;  %v9734_v62 = vpop.f32.mrb[73].mxu0  ;;  %10072 = vmatprep.subr.bf16.mxu1 %v13413_v19  ;;  %13501 = vst [vmem:[#allocation21_spill] sm:$0xff] %v12174_v17  ;;  %v12184_v4 = vsel %vm2008_vm4, %v8094_v37, %v8095_v13  ;;  %v8145_v14 = vrot.slane %v12187_v45, 1  ;;  %v12204_v58 = vld [vmem:[%s10795_s5 + $0xa4] ss:$0 sps:$4 sm:$0x11]  }
 0x18c   : > { %v2302_v57 = vpop.f32.mrb[72].mxu1  ;;  %v2255_v1 = vpop.f32.mrb[74].mxu0  ;;  %13502 = vst [vmem:[#allocation23_spill] sm:$0xff] %v12184_v4  ;;  %13504 = vst [vmem:[#allocation24_spill] sm:$0xff] %v12204_v58  ;;  %v5479_v21 = vrot.slane %v11798_v49, 1 }
 0x18d   : > { %v12177_v52 = vadd.f32 %v2302_v57, %v11812_v20  ;;  %v9740_v55 = vpop.f32.mrb[73].mxu1  ;;  %v12180_v62 = vadd.f32 %v2255_v1, %v11815_v53  ;;  %v9735_v38 = vpop.f32.mrb[75].mxu0  ;;  %v5428_v53 = vrot.slane %v9000_v16, 1  ;;  %v12194_v1 = vld [vmem:[%s10795_s5 + $0x94] sm:$0xf] }
 0x18e   : > { %v2305_v6 = vpop.f32.mrb[74].mxu1  ;;  %v9180_v57 = vld [vmem:[%s10795_s5 + $0x90] sm:$0xe]  ;;  %v8973_v16 = vld [vmem:[%s10795_s5 + $0xb4] sm:$0xe]  ;;  %v8195_v38 = vrot.slane %v12204_v58, 1 }
 0x18f   : > { %v12190_v47 = vadd.f32 %v2305_v6, %v11821_v29  ;;  %v9741_v20 = vpop.f32.mrb[75].mxu1  ;;  %10057 = vmatmul.mubr.msk.bf16.vlgmr.msra.gmra.mrb[180].mxu0 %vm287_vm3, %v5330_v23  ;;  %v9207_v29 = vcombine.low %v9180_v57, %v12194_v1  ;;  %v12210_v23 = vld [vmem:[%s10795_s5 + $0xa0] sm:$0xf]  ;;  %v5430_v4 = vsel %vm2008_vm4, %v5428_v53, %v5429_v7  ;;  %v9004_v49 = vcombine.low %v8973_v16, %v11792_v60  ;;  %v13506_v58 = vld [vmem:[#allocation28_spill] sm:$0xff] }
 0x190   : > { %10067 = vmatpush3.bf16.msra.mxu0 %v11882_v50  ;;  %10068 = vmatprep.mubr.msk.bf16.mxu0 %vm10695_vm1, %v13413_v19  ;;  %v8974_v35 = vld [vmem:[%s10795_s5 + $0xc0] sm:$0xe]  ;;  %v9209_v55 = vcombine.low %v9181_v0, %v12210_v23  ;;  %v5480_v7 = vsel %vm2008_vm4, %v5478_v25, %v5479_v21  ;;  %v5529_v21 = vrot.slane %v11828_v28, 1  ;;  %v5579_v28 = vrot.slane %v11836_v22, 1 }
 0x191   : > { %10063 = vmatmul.mubr.msk.bf16.vlgmr.msra.gmra.mrb[180].mxu1 %vm287_vm3, %v5380_v54  ;;  %10078 = vmatprep.subr.bf16.mxu0 %v13413_v19  ;;  %v8144_v37 = vrot.slane %v9207_v29, 1  ;;  %v9006_v45 = vcombine.low %v8974_v35, %v13506_v58  ;;  %v9182_v58 = vld [vmem:[%s10795_s5 + $0xa8] sm:$0xe]  ;;  %v5528_v25 = vrot.slane %v9004_v49, 1 }
 0x192   : > { %10073 = vmatpush3.bf16.msra.mxu1 %v11882_v50  ;;  %v2352_v13 = vpop.f32.mrb[76].mxu0  ;;  %10074 = vmatprep.mubr.msk.bf16.mxu1 %vm10695_vm1, %v13413_v19  ;;  %v8194_v0 = vrot.slane %v9209_v55, 1  ;;  %v12263_v55 = vld [vmem:[%s10795_s5 + $0xb8] sm:$0xf] }
 0x193   : > { %v12221_v6 = vadd.f32 %v2352_v13, %v11839_v11  ;;  %v9746_v54 = vpop.f32.mrb[77].mxu0  ;;  %10084 = vmatprep.subr.bf16.mxu1 %v13413_v19  ;;  %v12227_v29 = vsel %vm2008_vm4, %v8144_v37, %v8145_v14  ;;  %v12241_v14 = vld [vmem:[%s10795_s5 + $0xb0] ss:$0 sps:$4 sm:$0x11]   ;;  %v5530_v22 = vsel %vm2008_vm4, %v5528_v25, %v5529_v21 }
 0x194   : > { %v2402_v20 = vpop.f32.mrb[76].mxu1  ;;  %v2355_v57 = vpop.f32.mrb[78].mxu0  ;;  %13505 = vst [vmem:[#allocation26_spill] sm:$0xff] %v12227_v29  ;;  %v12238_v60 = vsel %vm2008_vm4, %v8194_v0, %v8195_v38  ;;  %v12258_v37 = vld [vmem:[%s10795_s5 + $0xbc] ss:$0 sps:$4 sm:$0x11]  }
 0x195   : > { %v12230_v17 = vadd.f32 %v2402_v20, %v11845_v44  ;;  %v9752_v11 = vpop.f32.mrb[77].mxu1  ;;  %v12233_v13 = vadd.f32 %v2355_v57, %v11848_v63  ;;  %v9747_v54 = vpop.f32.mrb[79].mxu0  ;;  %13507 = vst [vmem:[#allocation28_spill] sm:$0xff] %v12238_v60  ;;  %v12248_v63 = vld [vmem:[%s10795_s5 + $0xac] sm:$0xf] }
 0x196   : > { %v2405_v53 = vpop.f32.mrb[78].mxu1  ;;  %v9211_v35 = vcombine.low %v9182_v58, %v12248_v63  ;;  %v9183_v38 = vld [vmem:[%s10795_s5 + $0xb4] sm:$0xe]  ;;  %v9040_v57 = vld [vmem:[%s13351_s1 + $0xc] sm:$0x3] }
 0x197   : > { %v12244_v44 = vadd.f32 %v2405_v53, %v11853_v34  ;;  %v9753_v16 = vpop.f32.mrb[79].mxu1  ;;  %10069 = vmatmul.mubr.msk.bf16.vlgmr.msra.gmra.mrb[184].mxu0 %vm287_vm3, %v5430_v4  ;;  %v8245_v34 = vrot.slane %v12241_v14, 1  ;;  %v5578_v4 = vrot.slane %v9006_v45, 1  ;;  %v9213_v0 = vcombine.low %v9183_v38, %v12263_v55 }
 0x198   : > { %10079 = vmatpush3.bf16.msra.mxu0 %v11882_v50  ;;  %10080 = vmatprep.mubr.msk.bf16.mxu0 %vm10695_vm1, %v13413_v19  ;;  %v8244_v49 = vrot.slane %v9211_v35, 1  ;;  %v8295_v45 = vrot.slane %v12258_v37, 1 }
 0x199   : > { %10075 = vmatmul.mubr.msk.bf16.vlgmr.msra.gmra.mrb[184].mxu1 %vm287_vm3, %v5480_v7  ;;  %10090 = vmatprep.subr.bf16.mxu0 %v13413_v19  ;;  %v8294_v16 = vrot.slane %v9213_v0, 1  ;;  %v5580_v25 = vsel %vm2008_vm4, %v5578_v4, %v5579_v28  ;;  %v12313_v0 = vld [vmem:[%s10795_s5 + $0xd4] ss:$0 sps:$4 sm:$0x11]  }
 0x19a   : > { %10085 = vmatpush3.bf16.msra.mxu1 %v11882_v50  ;;  %v2452_v20 = vpop.f32.mrb[80].mxu0  ;;  %10086 = vmatprep.mubr.msk.bf16.mxu1 %vm10695_vm1, %v13413_v19  ;;  %v12281_v7 = vsel %vm2008_vm4, %v8244_v49, %v8245_v34  ;;  %v12297_v34 = vld [vmem:[%s10795_s5 + $0xc8] ss:$0 sps:$4 sm:$0x11]   ;;  %v12304_v49 = vld [vmem:[%s10795_s5 + $0xc4] sm:$0xf] }
 0x19b   : > { %v12276_v11 = vadd.f32 %v2452_v20, %v11869_v26  ;;  %v9758_v50 = vpop.f32.mrb[81].mxu0  ;;  %10096 = vmatprep.subr.bf16.mxu1 %v13413_v19  ;;  %13508 = vst [vmem:[#allocation36_spill] sm:$0xff] %v12281_v7  ;;  %v12290_v20 = vsel %vm291_vm0, %v9040_v57, 0  ;;  %v12294_v21 = vsel %vm2008_vm4, %v8294_v16, %v8295_v45  ;;  %13510 = vst [vmem:[#allocation38_spill] sm:$0xff] %v12297_v34  ;;  %v9184_v57 = vld [vmem:[%s10795_s5 + $0xc0] sm:$0xe] }
 0x19c   : > { %v2502_v54 = vpop.f32.mrb[80].mxu1  ;;  %v2455_v53 = vpop.f32.mrb[82].mxu0  ;;  %13509 = vst [vmem:[#allocation37_spill] sm:$0xff] %v12294_v21  ;;  %v9215_v4 = vcombine.low %v9184_v57, %v12304_v49  ;;  %v8345_v28 = vrot.slane %v12297_v34, 1  ;;  %13511 = vst [vmem:[#allocation39_spill] sm:$0xff] %v12313_v0  ;;  %v8395_v16 = vrot.slane %v12313_v0, 1 }
 0x19d   : > { %v12284_v58 = vadd.f32 %v2502_v54, %v11876_v51  ;;  %v9764_v35 = vpop.f32.mrb[81].mxu1  ;;  %v12287_v26 = vadd.f32 %v2455_v53, %v11879_v30  ;;  %v9759_v38 = vpop.f32.mrb[83].mxu0  ;;  %v9185_v45 = vld [vmem:[%s10795_s5 + $0xcc] sm:$0xe]  ;;  %v13522_v34 = vld [vmem:[#allocation35_spill] sm:$0xff] }
 0x19e   : > { %v2505_v50 = vpop.f32.mrb[82].mxu1  ;;  %v8344_v53 = vrot.slane %v9215_v4, 1 }
 0x19f   : > { %v12300_v51 = vadd.f32 %v2505_v50, %v11887_v24  ;;  %v9765_v30 = vpop.f32.mrb[83].mxu1  ;;  %10081 = vmatmul.mubr.msk.bf16.vlgmr.msra.gmra.mrb[188].mxu0 %vm287_vm3, %v5530_v22  ;;  %v12318_v24 = vld [vmem:[%s10795_s5 + $0xd0] sm:$0xf]  ;;  %v10550_v50 = vld [vmem:[%s10795_s5 + $0x18] sm:$0xff]  }
 0x1a0   : > { %10091 = vmatpush3.bf16.msra.mxu0 %v12290_v20  ;;  %10092 = vmatprep.mubr.msk.bf16.mxu0 %vm10695_vm1, %v13413_v19  ;;  %v9217_v22 = vcombine.low %v9185_v45, %v12318_v24  ;;  %v12332_v57 = vsel %vm2008_vm4, %v8344_v53, %v8345_v28 }
 0x1a1   : > { %10087 = vmatmul.mubr.msk.bf16.vlgmr.msra.gmra.mrb[188].mxu1 %vm287_vm3, %v5580_v25  ;;  %10102 = vmatprep.subr.bf16.mxu0 %v13413_v19  ;;  %13512 = vst [vmem:[#allocation40_spill] sm:$0xff] %v12332_v57 }
 0x1a2   : > { %10097 = vmatpush3.bf16.msra.mxu1 %v12290_v20  ;;  %v2552_v54 = vpop.f32.mrb[84].mxu0  ;;  %10098 = vmatprep.mubr.msk.bf16.mxu1 %vm10695_vm1, %v13413_v19  ;;  %v8394_v21 = vrot.slane %v9217_v22, 1 }
 0x1a3   : > { %v12327_v35 = vadd.f32 %v2552_v54, %v11904_v61  ;;  %v9770_v38 = vpop.f32.mrb[85].mxu0  ;;  %10108 = vmatprep.subr.bf16.mxu1 %v13413_v19  ;;  %v10551_v61 = vld [vmem:[%s10795_s5 + $0x24] sm:$0xff]  }
 0x1a4   : > { %v2602_v25 = vpop.f32.mrb[84].mxu1  ;;  %v2555_v30 = vpop.f32.mrb[86].mxu0  ;;  %v12342_v38 = vsel %vm2008_vm4, %v8394_v21, %v8395_v16 }
 0x1a5   : > { %v12335_v7 = vadd.f32 %v2602_v25, %v11910_v59  ;;  %v9776_v4 = vpop.f32.mrb[85].mxu1  ;;  %v12338_v45 = vadd.f32 %v2555_v30, %v11913_v12  ;;  %v9771_v60 = vpop.f32.mrb[87].mxu0  ;;  %13513 = vst [vmem:[#allocation41_spill] sm:$0xff] %v12342_v38  ;;  %v10553_v30 = vld [vmem:[%s10795_s5 + $0x3c] sm:$0xff]  }
 0x1a6   : > { %v2605_v54 = vpop.f32.mrb[86].mxu1  ;;  %v10552_v60 = vld [vmem:[%s10795_s5 + $0x30] sm:$0xff]  }
 0x1a7   : > { %v12345_v29 = vadd.f32 %v2605_v54, %v11921_v5  ;;  %v9777_v28 = vpop.f32.mrb[87].mxu1  ;;  %10093 = vmatmul.mubr.msk.bf16.vlgmr.msra.gmra.mrb[192].mxu0 %vm287_vm3, %v10550_v50  ;;  %v10554_v54 = vld [vmem:[%s10795_s5 + $0x48] sm:$0xff]  }
 0x1a8   : > { %10103 = vmatpush3.bf16.msra.mxu0 %v12290_v20  ;;  %10104 = vmatprep.mubr.msk.bf16.mxu0 %vm10695_vm1, %v13413_v19 }
 0x1a9   : > { %10099 = vmatmul.mubr.msk.bf16.vlgmr.msra.gmra.mrb[192].mxu1 %vm287_vm3, %v10551_v61  ;;  %10114 = vmatprep.subr.bf16.mxu0 %v13413_v19 }
 0x1aa   : > { %10109 = vmatpush3.bf16.msra.mxu1 %v12290_v20  ;;  %v2652_v59 = vpop.f32.mrb[88].mxu0  ;;  %10110 = vmatprep.mubr.msk.bf16.mxu1 %vm10695_vm1, %v13413_v19 }
 0x1ab   : > { %v12357_v12 = vadd.f32 %v2652_v59, %v11951_v18  ;;  %v9782_v5 = vpop.f32.mrb[89].mxu0  ;;  %10120 = vmatprep.subr.bf16.mxu1 %v13413_v19 }
 0x1ac   : > { %v2702_v21 = vpop.f32.mrb[88].mxu1  ;;  %v2655_v53 = vpop.f32.mrb[90].mxu0 }
 0x1ad   : > { %v12362_v22 = vadd.f32 %v2702_v21, %v11961_v36  ;;  %v9788_v16 = vpop.f32.mrb[89].mxu1  ;;  %v12365_v50 = vadd.f32 %v2655_v53, %v11964_v31  ;;  %v9783_v25 = vpop.f32.mrb[91].mxu0 }
 0x1ae   : > { %v2705_v4 = vpop.f32.mrb[90].mxu1  ;;  %v10555_v16 = vld [vmem:[%s10795_s5 + $0x54] sm:$0xff]  }
 0x1af   : > { %v12369_v18 = vadd.f32 %v2705_v4, %v11974_v48  ;;  %v9789_v61 = vpop.f32.mrb[91].mxu1  ;;  %10105 = vmatmul.mubr.msk.bf16.vlgmr.msra.gmra.mrb[196].mxu0 %vm287_vm3, %v10552_v60  ;;  %v10556_v4 = vld [vmem:[%s10795_s5 + $0x60] sm:$0xff]  }
 0x1b0   : > { %10115 = vmatpush3.bf16.msra.mxu0 %v12290_v20  ;;  %10116 = vmatprep.mubr.msk.bf16.mxu0 %vm10695_vm1, %v13413_v19 }
 0x1b1   : > { %10111 = vmatmul.mubr.msk.bf16.vlgmr.msra.gmra.mrb[196].mxu1 %vm287_vm3, %v10553_v30  ;;  %10126 = vmatprep.subr.bf16.mxu0 %v13413_v19 }
 0x1b2   : > { %10121 = vmatpush3.bf16.msra.mxu1 %v12290_v20  ;;  %v2752_v36 = vpop.f32.mrb[92].mxu0  ;;  %10122 = vmatprep.mubr.msk.bf16.mxu1 %vm10695_vm1, %v13413_v19 }
 0x1b3   : > { %v12381_v31 = vadd.f32 %v2752_v36, %v12005_v15  ;;  %v9794_v48 = vpop.f32.mrb[93].mxu0  ;;  %10132 = vmatprep.subr.bf16.mxu1 %v13413_v19 }
 0x1b4   : > { %v2802_v28 = vpop.f32.mrb[92].mxu1  ;;  %v2755_v59 = vpop.f32.mrb[94].mxu0 }
 0x1b5   : > { %v12386_v5 = vadd.f32 %v2802_v28, %v12014_v27  ;;  %v9800_v60 = vpop.f32.mrb[93].mxu1  ;;  %v12389_v21 = vadd.f32 %v2755_v59, %v12017_v33  ;;  %v9795_v53 = vpop.f32.mrb[95].mxu0 }
 0x1b6   : > { %v2805_v25 = vpop.f32.mrb[94].mxu1  ;;  %v10557_v60 = vld [vmem:[%s10795_s5 + $0x6c] sm:$0xff]  }
 0x1b7   : > { %v12393_v15 = vadd.f32 %v2805_v25, %v12029_v42  ;;  %v9801_v30 = vpop.f32.mrb[95].mxu1  ;;  %10117 = vmatmul.mubr.msk.bf16.vlgmr.msra.gmra.mrb[200].mxu0 %vm287_vm3, %v10554_v54  ;;  %v10558_v25 = vld [vmem:[%s10795_s5 + $0x78] sm:$0xff]  }
 0x1b8   : > { %10127 = vmatpush3.bf16.msra.mxu0 %v12290_v20  ;;  %10128 = vmatprep.mubr.msk.bf16.mxu0 %vm10695_vm1, %v13413_v19 }
 0x1b9   : > { %10123 = vmatmul.mubr.msk.bf16.vlgmr.msra.gmra.mrb[200].mxu1 %vm287_vm3, %v10555_v16  ;;  %10138 = vmatprep.subr.bf16.mxu0 %v13413_v19 }
 0x1ba   : > { %10133 = vmatpush3.bf16.msra.mxu1 %v12290_v20  ;;  %v2921_v33 = vpop.f32.mrb[96].mxu0  ;;  %10134 = vmatprep.mubr.msk.bf16.mxu1 %vm10695_vm1, %v13413_v19 }
 0x1bb   : > { %v12405_v27 = vadd.f32 %v2921_v33, %v12060_v2  ;;  %v9806_v42 = vpop.f32.mrb[97].mxu0  ;;  %10144 = vmatprep.subr.bf16.mxu1 %v13413_v19 }
 0x1bc   : > { %v2970_v61 = vpop.f32.mrb[96].mxu1  ;;  %v2924_v36 = vpop.f32.mrb[98].mxu0 }
 0x1bd   : > { %v12410_v48 = vadd.f32 %v2970_v61, %v12068_v46  ;;  %v9812_v54 = vpop.f32.mrb[97].mxu1  ;;  %v12413_v28 = vadd.f32 %v2924_v36, %v12071_v41  ;;  %v9807_v59 = vpop.f32.mrb[99].mxu0 }
 0x1be   : > { %v2973_v53 = vpop.f32.mrb[98].mxu1  ;;  %v10559_v54 = vld [vmem:[%s10795_s5 + $0x84] sm:$0xff]  }
 0x1bf   : > { %v12417_v2 = vadd.f32 %v2973_v53, %v12083_v39  ;;  %v9813_v16 = vpop.f32.mrb[99].mxu1  ;;  %10129 = vmatmul.mubr.msk.bf16.vlgmr.msra.gmra.mrb[204].mxu0 %vm287_vm3, %v10556_v4  ;;  %v10560_v53 = vld [vmem:[%s10795_s5 + $0x90] sm:$0xff]  }
 0x1c0   : > { %10139 = vmatpush3.bf16.msra.mxu0 %v12290_v20  ;;  %10140 = vmatprep.mubr.msk.bf16.mxu0 %vm10695_vm1, %v13413_v19 }
 0x1c1   : > { %10135 = vmatmul.mubr.msk.bf16.vlgmr.msra.gmra.mrb[204].mxu1 %vm287_vm3, %v10557_v60  ;;  %10150 = vmatprep.subr.bf16.mxu0 %v13413_v19 }
 0x1c2   : > { %10145 = vmatpush3.bf16.msra.mxu1 %v12290_v20  ;;  %v3019_v46 = vpop.f32.mrb[100].mxu0  ;;  %10146 = vmatprep.mubr.msk.bf16.mxu1 %vm10695_vm1, %v13413_v19 }
 0x1c3   : > { %v12429_v41 = vadd.f32 %v3019_v46, %v12114_v32  ;;  %v9818_v39 = vpop.f32.mrb[101].mxu0  ;;  %10156 = vmatprep.subr.bf16.mxu1 %v13413_v19 }
 0x1c4   : > { %v3068_v30 = vpop.f32.mrb[100].mxu1  ;;  %v3022_v33 = vpop.f32.mrb[102].mxu0 }
 0x1c5   : > { %v12434_v42 = vadd.f32 %v3068_v30, %v12123_v9  ;;  %v9824_v4 = vpop.f32.mrb[101].mxu1  ;;  %v12437_v61 = vadd.f32 %v3022_v33, %v12126_v10  ;;  %v9819_v36 = vpop.f32.mrb[103].mxu0 }
 0x1c6   : > { %v3071_v59 = vpop.f32.mrb[102].mxu1  ;;  %v10561_v4 = vld [vmem:[%s10795_s5 + $0x9c] sm:$0xff]  }
 0x1c7   : > { %v12441_v32 = vadd.f32 %v3071_v59, %v12137_v56  ;;  %v9825_v60 = vpop.f32.mrb[103].mxu1  ;;  %10141 = vmatmul.mubr.msk.bf16.vlgmr.msra.gmra.mrb[208].mxu0 %vm287_vm3, %v10558_v25 }
 0x1c8   : > { %10151 = vmatpush3.bf16.msra.mxu0 %v12290_v20  ;;  %10152 = vmatprep.mubr.msk.bf16.mxu0 %vm10695_vm1, %v13413_v19  ;;  %v10562_v60 = vld [vmem:[%s10795_s5 + $0xa8] sm:$0xff]  }
 0x1c9   : > { %10147 = vmatmul.mubr.msk.bf16.vlgmr.msra.gmra.mrb[208].mxu1 %vm287_vm3, %v10559_v54  ;;  %10162 = vmatprep.subr.bf16.mxu0 %v13413_v19 }
 0x1ca   : > { %10157 = vmatpush3.bf16.msra.mxu1 %v12290_v20  ;;  %v3117_v9 = vpop.f32.mrb[104].mxu0  ;;  %10158 = vmatprep.mubr.msk.bf16.mxu1 %vm10695_vm1, %v13413_v19 }
 0x1cb   : > { %v12453_v10 = vadd.f32 %v3117_v9, %v12167_v40  ;;  %v9830_v56 = vpop.f32.mrb[105].mxu0  ;;  %10168 = vmatprep.subr.bf16.mxu1 %v13413_v19  ;;  %v9076_v9 = vld [vmem:[%s10795_s5 + $0x24] sm:$0xf] }
 0x1cc   : > { %v3166_v16 = vpop.f32.mrb[104].mxu1  ;;  %v3120_v46 = vpop.f32.mrb[106].mxu0 }
 0x1cd   : > { %v12458_v39 = vadd.f32 %v3166_v16, %v12177_v52  ;;  %v9836_v25 = vpop.f32.mrb[105].mxu1  ;;  %v12461_v30 = vadd.f32 %v3120_v46, %v12180_v62  ;;  %v9831_v33 = vpop.f32.mrb[107].mxu0  ;;  %v9073_v52 = vld [vmem:[%s10795_s5 + $0x18] sm:$0xf] }
 0x1ce   : > { %v3169_v36 = vpop.f32.mrb[106].mxu1  ;;  %v9122_v16 = vcombine.low %v9073_v52, %v11925_v8 }
 0x1cf   : > { %v12465_v40 = vadd.f32 %v3169_v36, %v12190_v47  ;;  %v9837_v54 = vpop.f32.mrb[107].mxu1  ;;  %10153 = vmatmul.mubr.msk.bf16.vlgmr.msra.gmra.mrb[212].mxu0 %vm287_vm3, %v10560_v53 }
 0x1d0   : > { %10163 = vmatpush3.bf16.msra.mxu0 %v12290_v20  ;;  %10164 = vmatprep.mubr.msk.bf16.mxu0 %vm10695_vm1, %v13413_v19  ;;  %v13516_v54 = vld [vmem:[#allocation31_spill] sm:$0xff]  ;;  %v6572_v8 = vshll.u32 %v9122_v16, 16 }
 0x1d1   : > { %10159 = vmatmul.mubr.msk.bf16.vlgmr.msra.gmra.mrb[212].mxu1 %vm287_vm3, %v10561_v4  ;;  %10174 = vmatprep.subr.bf16.mxu0 %v13413_v19 }
 0x1d2   : > { %10169 = vmatpush3.bf16.msra.mxu1 %v12290_v20  ;;  %v3215_v62 = vpop.f32.mrb[108].mxu0  ;;  %10170 = vmatprep.mubr.msk.bf16.mxu1 %vm10695_vm1, %v13413_v19 }
 0x1d3   : > { %v12478_v47 = vadd.f32 %v3215_v62, %v12221_v6  ;;  %v9842_v59 = vpop.f32.mrb[109].mxu0  ;;  %10180 = vmatprep.subr.bf16.mxu1 %v13413_v19  ;;  %v10563_v6 = vld [vmem:[%s10795_s5 + $0xb4] sm:$0xff]   ;;  %v9125_v62 = vcombine.low %v9076_v9, %v13516_v54  ;;  %v10564_v9 = vld [vmem:[%s10795_s5 + $0xc0] sm:$0xff]  }
 0x1d4   : > { %v3264_v56 = vpop.f32.mrb[108].mxu1  ;;  %v3218_v53 = vpop.f32.mrb[110].mxu0  ;;  %v13520_v54 = vld [vmem:[#allocation9_spill] sm:$0xff] }
 0x1d5   : > { %v12485_v46 = vadd.f32 %v3264_v56, %v12230_v17  ;;  %v9848_v25 = vpop.f32.mrb[109].mxu1  ;;  %v12488_v33 = vadd.f32 %v3218_v53, %v12233_v13  ;;  %v9843_v4 = vpop.f32.mrb[111].mxu0  ;;  %v9079_v17 = vld [vmem:[%s10795_s5 + $0x30] sm:$0xf]  ;;  %v9082_v56 = vld [vmem:[%s10795_s5 + $0x3c] sm:$0xf] }
 0x1d6   : > { %v3267_v36 = vpop.f32.mrb[110].mxu1  ;;  %v6570_v25 = vshrl.u32 %v9122_v16, 16  ;;  %v6574_v4 = vrot.slane %v6572_v8, 1  ;;  %v9128_v57 = vcombine.low %v9079_v17, %v13520_v54  ;;  %v6637_v16 = vshrl.u32 %v9125_v62, 16 }
 0x1d7   : > { %13514 = vst [vmem:[#allocation42_spill] sm:$0xff] %v12485_v46  ;;  %13515 = vst [vmem:[#allocation43_spill] sm:$0xff] %v12488_v33  ;;  %v12493_v59 = vadd.f32 %v3267_v36, %v12244_v44  ;;  %v9849_v38 = vpop.f32.mrb[111].mxu1  ;;  %10165 = vmatmul.mubr.msk.bf16.vlgmr.msra.gmra.mrb[216].mxu0 %vm287_vm3, %v10562_v60  ;;  %v9121_v44 = vld [vmem:[%s13351_s1 + $0xe] sm:$0x3]  ;;  %v13521_v46 = vld [vmem:[#allocation30_spill] sm:$0xff]  ;;  %v9131_v17 = vcombine.low %v9082_v56, %v13522_v34 }
 0x1d8   : > { %10175 = vmatpush3.bf16.msra.mxu0 %v12290_v20  ;;  %10176 = vmatprep.mubr.msk.bf16.mxu0 %vm10695_vm1, %v13413_v19  ;;  %v6639_v38 = vshll.u32 %v9125_v62, 16  ;;  %v6703_v62 = vshll.u32 %v9128_v57, 16 }
 0x1d9   : > { %13517 = vst [vmem:[#allocation31_spill] sm:$0xff] %v12493_v59  ;;  %10171 = vmatmul.mubr.msk.bf16.vlgmr.msra.gmra.mrb[216].mxu1 %vm287_vm3, %v10563_v6  ;;  %10186 = vmatprep.subr.bf16.mxu0 %v13413_v19  ;;  %v13519_v6 = vld [vmem:[#allocation29_spill] sm:$0xff] }
 0x1da   : > { %10181 = vmatpush3.bf16.msra.mxu1 %v12290_v20  ;;  %v3313_v13 = vpop.f32.mrb[112].mxu0  ;;  %10182 = vmatprep.mubr.msk.bf16.mxu1 %vm10695_vm1, %v13413_v19  ;;  %v6577_v36 = vshll.u32 %v13519_v6, 16  ;;  %v6641_v8 = vrot.slane %v6639_v38, 1  ;;  %v6644_v6 = vshll.u32 %v13521_v46, 16  ;;  %v9085_v38 = vld [vmem:[%s10795_s5 + $0x48] sm:$0xf] }
 0x1db   : > { %v12509_v52 = vadd.f32 %v3313_v13, %v12276_v11  ;;  %v9854_v60 = vpop.f32.mrb[113].mxu0  ;;  %10192 = vmatprep.subr.bf16.mxu1 %v13413_v19 }
 0x1dc   : > { %v3362_v53 = vpop.f32.mrb[112].mxu1  ;;  %v3316_v20 = vpop.f32.mrb[114].mxu0  ;;  %v10565_v60 = vld [vmem:[%s10795_s5 + $0xcc] sm:$0xff]   ;;  %v6646_v46 = vrot.slane %v6644_v6, 1 }
 0x1dd   : > { %13518 = vst [vmem:[#allocation44_spill] sm:$0xff] %v12509_v52  ;;  %v12517_v59 = vadd.f32 %v3362_v53, %v12284_v58  ;;  %v9860_v0 = vpop.f32.mrb[113].mxu1  ;;  %v12520_v11 = vadd.f32 %v3316_v20, %v12287_v26  ;;  %v9855_v13 = vpop.f32.mrb[115].mxu0  ;;  %v12524_v52 = vsel %vm291_vm0, %v9121_v44, 0  ;;  %v6575_v26 = vor.u32 %v6574_v4, %v6570_v25  ;;  %v13525_v20 = vld [vmem:[#allocation15_spill] sm:$0xff] }
 0x1de   : > { %v3365_v33 = vpop.f32.mrb[114].mxu1  ;;  %v6579_v44 = vrot.slane %v6577_v36, 1  ;;  %v9134_v25 = vcombine.low %v9085_v38, %v13525_v20  ;;  %v6701_v13 = vshrl.u32 %v9128_v57, 16  ;;  %v6765_v20 = vshrl.u32 %v9131_v17, 16  ;;  %v13528_v57 = vld [vmem:[#allocation5_spill] sm:$0xff] }
 0x1df   : > { %v12529_v58 = vadd.f32 %v3365_v33, %v12300_v51  ;;  %v9861_v0 = vpop.f32.mrb[115].mxu1  ;;  %10177 = vmatmul.mubr.msk.bf16.vlgmr.msra.gmra.mrb[220].mxu0 %vm287_vm3, %v10564_v9  ;;  %v6642_v51 = vor.u32 %v6641_v8, %v6637_v16  ;;  %v6767_v33 = vshll.u32 %v9131_v17, 16  ;;  %v9088_v9 = vld [vmem:[%s10795_s5 + $0x54] sm:$0xf] }
 0x1e0   : > { %10187 = vmatpush3.bf16.msra.mxu0 %v12524_v52  ;;  %10188 = vmatprep.mubr.msk.bf16.mxu0 %vm10695_vm1, %v13413_v19  ;;  %v6580_v54 = vsel %vm274_vm2, %v6575_v26, %v6579_v44  ;;  %v13526_v0 = vld [vmem:[#allocation34_spill] sm:$0xff]  ;;  %v6772_v44 = vshll.u32 %v13528_v57, 16  ;;  %v13531_v57 = vld [vmem:[#allocation11_spill] sm:$0xff] }
 0x1e1   : > { %13523 = vst [vmem:[#allocation29_spill] sm:$0xff] %v12529_v58  ;;  %10183 = vmatmul.mubr.msk.bf16.vlgmr.msra.gmra.mrb[220].mxu1 %vm287_vm3, %v10565_v60  ;;  %10198 = vmatprep.subr.bf16.mxu0 %v13413_v19  ;;  %v6705_v60 = vrot.slane %v6703_v62, 1  ;;  %v6708_v58 = vshll.u32 %v13526_v0, 16  ;;  %v6647_v38 = vsel %vm274_vm2, %v6642_v51, %v6646_v46  ;;  %v6769_v26 = vrot.slane %v6767_v33, 1  ;;  %v9091_v51 = vld [vmem:[%s10795_s5 + $0x60] sm:$0xf] }
 0x1e2   : > { %10193 = vmatpush3.bf16.msra.mxu1 %v12524_v52  ;;  %v3411_v34 = vpop.f32.mrb[116].mxu0  ;;  %10194 = vmatprep.mubr.msk.bf16.mxu1 %vm10695_vm1, %v13413_v19  ;;  %v6774_v33 = vrot.slane %v6772_v44, 1  ;;  %v9094_v0 = vld [vmem:[%s10795_s5 + $0x6c] sm:$0xf] }
 0x1e3   : > { %v12543_v56 = vadd.f32 %v3411_v34, %v12327_v35  ;;  %v9866_v53 = vpop.f32.mrb[117].mxu0  ;;  %10204 = vmatprep.subr.bf16.mxu1 %v13413_v19  ;;  %v13527_v34 = vld [vmem:[#allocation8_spill] sm:$0xff]  ;;  %v6770_v46 = vor.u32 %v6769_v26, %v6765_v20 }
 0x1e4   : > { %v3460_v4 = vpop.f32.mrb[116].mxu1  ;;  %v3414_v36 = vpop.f32.mrb[118].mxu0  ;;  %v9137_v53 = vcombine.low %v9088_v9, %v13527_v34  ;;  %v6710_v9 = vrot.slane %v6708_v58, 1  ;;  %v6829_v58 = vshrl.u32 %v9134_v25, 16 }
 0x1e5   : > { %13524 = vst [vmem:[#allocation9_spill] sm:$0xff] %v12543_v56  ;;  %v12550_v16 = vadd.f32 %v3460_v4, %v12335_v7  ;;  %v9872_v8 = vpop.f32.mrb[117].mxu1  ;;  %v12553_v35 = vadd.f32 %v3414_v36, %v12338_v45  ;;  %v9867_v6 = vpop.f32.mrb[119].mxu0  ;;  %v6831_v4 = vshll.u32 %v9134_v25, 16  ;;  %v6706_v45 = vor.u32 %v6705_v60, %v6701_v13  ;;  %v13530_v13 = vld [vmem:[#allocation7_spill] sm:$0xff] }
 0x1e6   : > { %v3463_v56 = vpop.f32.mrb[118].mxu1  ;;  %v6895_v17 = vshll.u32 %v9137_v53, 16  ;;  %v6836_v60 = vshll.u32 %v13530_v13, 16  ;;  %v6775_v13 = vsel %vm274_vm2, %v6770_v46, %v6774_v33 }
 0x1e7   : > { %v12559_v62 = vadd.f32 %v3463_v56, %v12345_v29  ;;  %v9873_v7 = vpop.f32.mrb[119].mxu1  ;;  %10189 = vmatmul.mubr.msk.bf16.vlgmr.msra.gmra.mrb[224].mxu0 %vm287_vm3, %v6580_v54  ;;  %v6833_v54 = vrot.slane %v6831_v4, 1  ;;  %v6711_v34 = vsel %vm274_vm2, %v6706_v45, %v6710_v9  ;;  %v13532_v4 = vld [vmem:[#allocation16_spill] sm:$0xff] }
 0x1e8   : > { %10199 = vmatpush3.bf16.msra.mxu0 %v12524_v52  ;;  %10200 = vmatprep.mubr.msk.bf16.mxu0 %vm10695_vm1, %v13413_v19  ;;  %v9140_v7 = vcombine.low %v9091_v51, %v13531_v57  ;;  %v6897_v25 = vrot.slane %v6895_v17, 1  ;;  %v6838_v51 = vrot.slane %v6836_v60, 1  ;;  %v13534_v57 = vld [vmem:[#allocation12_spill] sm:$0xff] }
 0x1e9   : > { %10195 = vmatmul.mubr.msk.bf16.vlgmr.msra.gmra.mrb[224].mxu1 %vm287_vm3, %v6647_v38  ;;  %10210 = vmatprep.subr.bf16.mxu0 %v13413_v19  ;;  %v6893_v38 = vshrl.u32 %v9137_v53, 16 }
 0x1ea   : > { %10205 = vmatpush3.bf16.msra.mxu1 %v12524_v52  ;;  %v3509_v29 = vpop.f32.mrb[120].mxu0  ;;  %10206 = vmatprep.mubr.msk.bf16.mxu1 %vm10695_vm1, %v13413_v19 }
 0x1eb   : > { %v12572_v56 = vadd.f32 %v3509_v29, %v12357_v12  ;;  %v9878_v36 = vpop.f32.mrb[121].mxu0  ;;  %10216 = vmatprep.subr.bf16.mxu1 %v13413_v19  ;;  %v6900_v29 = vshll.u32 %v13532_v4, 16  ;;  %v6898_v17 = vor.u32 %v6897_v25, %v6893_v38 }
 0x1ec   : > { %v3558_v8 = vpop.f32.mrb[120].mxu1  ;;  %v3512_v6 = vpop.f32.mrb[122].mxu0 }
 0x1ed   : > { %13529 = vst [vmem:[#allocation30_spill] sm:$0xff] %v12572_v56  ;;  %v12580_v20 = vadd.f32 %v3558_v8, %v12362_v22  ;;  %v9884_v12 = vpop.f32.mrb[121].mxu1  ;;  %v12583_v26 = vadd.f32 %v3512_v6, %v12365_v50  ;;  %v9879_v44 = vpop.f32.mrb[123].mxu0  ;;  %v13533_v56 = vld [vmem:[#allocation14_spill] sm:$0xff]  ;;  %v6834_v22 = vor.u32 %v6833_v54, %v6829_v58  ;;  %v6959_v50 = vshll.u32 %v9140_v7, 16 }
 0x1ee   : > { %v3561_v36 = vpop.f32.mrb[122].mxu1  ;;  %v9143_v45 = vcombine.low %v9094_v0, %v13533_v56  ;;  %v6902_v46 = vrot.slane %v6900_v29, 1  ;;  %v9100_v0 = vld [vmem:[%s10795_s5 + $0x84] sm:$0xf]  ;;  %v6964_v12 = vshll.u32 %v13534_v57, 16  ;;  %v13535_v44 = vld [vmem:[#allocation25_spill] sm:$0xff] }
 0x1ef   : > { %v12589_v53 = vadd.f32 %v3561_v36, %v12369_v18  ;;  %v9885_v9 = vpop.f32.mrb[123].mxu1  ;;  %10201 = vmatmul.mubr.msk.bf16.vlgmr.msra.gmra.mrb[228].mxu0 %vm287_vm3, %v6711_v34  ;;  %v9097_v18 = vld [vmem:[%s10795_s5 + $0x78] sm:$0xf]  ;;  %v6839_v60 = vsel %vm274_vm2, %v6834_v22, %v6838_v51  ;;  %v6957_v34 = vshrl.u32 %v9140_v7, 16  ;;  %v6961_v38 = vrot.slane %v6959_v50, 1 }
 0x1f0   : > { %10211 = vmatpush3.bf16.msra.mxu0 %v12524_v52  ;;  %10212 = vmatprep.mubr.msk.bf16.mxu0 %vm10695_vm1, %v13413_v19  ;;  %v7023_v56 = vshll.u32 %v9143_v45, 16  ;;  %v9146_v25 = vcombine.low %v9097_v18, %v13535_v44  ;;  %v7021_v22 = vshrl.u32 %v9143_v45, 16  ;;  %v13536_v7 = vld [vmem:[#allocation22_spill] sm:$0xff] }
 0x1f1   : > { %10207 = vmatmul.mubr.msk.bf16.vlgmr.msra.gmra.mrb[228].mxu1 %vm287_vm3, %v6775_v13  ;;  %10222 = vmatprep.subr.bf16.mxu0 %v13413_v19  ;;  %v6903_v13 = vsel %vm274_vm2, %v6898_v17, %v6902_v46  ;;  %v7028_v50 = vshll.u32 %v13536_v7, 16  ;;  %v6966_v17 = vrot.slane %v6964_v12, 1  ;;  %v9103_v46 = vld [vmem:[%s10795_s5 + $0x90] sm:$0xf] }
 0x1f2   : > { %10217 = vmatpush3.bf16.msra.mxu1 %v12524_v52  ;;  %v3607_v33 = vpop.f32.mrb[124].mxu0  ;;  %10218 = vmatprep.mubr.msk.bf16.mxu1 %vm10695_vm1, %v13413_v19  ;;  %v7025_v51 = vrot.slane %v7023_v56, 1  ;;  %v7087_v45 = vshll.u32 %v9146_v25, 16  ;;  %v7085_v12 = vshrl.u32 %v9146_v25, 16  ;;  %v7156_v25 = vshll.u32 %v12151_v3, 16 }
 0x1f3   : > { %v12602_v58 = vadd.f32 %v3607_v33, %v12381_v31  ;;  %v9890_v54 = vpop.f32.mrb[125].mxu0  ;;  %10228 = vmatprep.subr.bf16.mxu1 %v13413_v19  ;;  %v9149_v33 = vcombine.low %v9100_v0, %v12157_v43  ;;  %v7030_v56 = vrot.slane %v7028_v50, 1 }
 0x1f4   : > { %v3656_v8 = vpop.f32.mrb[124].mxu1  ;;  %v3610_v6 = vpop.f32.mrb[126].mxu0  ;;  %v7089_v44 = vrot.slane %v7087_v45, 1 }
 0x1f5   : > { %v12610_v4 = vadd.f32 %v3656_v8, %v12386_v5  ;;  %v9896_v29 = vpop.f32.mrb[125].mxu1  ;;  %v12613_v31 = vadd.f32 %v3610_v6, %v12389_v21  ;;  %v9891_v36 = vpop.f32.mrb[127].mxu0  ;;  %v6962_v21 = vor.u32 %v6961_v38, %v6957_v34  ;;  %v7151_v54 = vshll.u32 %v9149_v33, 16 }
 0x1f6   : > { %v3659_v9 = vpop.f32.mrb[126].mxu1  ;;  %v9152_v6 = vcombine.low %v9103_v46, %v12194_v1  ;;  %v13537_v29 = vld [vmem:[#allocation18_spill] sm:$0xff]  ;;  %v7149_v50 = vshrl.u32 %v9149_v33, 16  ;;  %v9109_v33 = vld [vmem:[%s10795_s5 + $0xa8] sm:$0xf]  ;;  %v7158_v46 = vrot.slane %v7156_v25, 1 }
 0x1f7   : > { %v12619_v18 = vadd.f32 %v3659_v9, %v12393_v15  ;;  %v9897_v5 = vpop.f32.mrb[127].mxu1  ;;  %10213 = vmatmul.mubr.msk.bf16.vlgmr.msra.gmra.mrb[232].mxu0 %vm287_vm3, %v6839_v60  ;;  %v7026_v15 = vor.u32 %v7025_v51, %v7021_v22  ;;  %v9106_v60 = vld [vmem:[%s10795_s5 + $0x9c] sm:$0xf]  ;;  %v6967_v57 = vsel %vm274_vm2, %v6962_v21, %v6966_v17  ;;  %v7092_v36 = vshll.u32 %v13537_v29, 16 }
 0x1f8   : > { %10223 = vmatpush3.bf16.msra.mxu0 %v12524_v52  ;;  %10224 = vmatprep.mubr.msk.bf16.mxu0 %vm10695_vm1, %v13413_v19  ;;  %v9155_v51 = vcombine.low %v9106_v60, %v12210_v23  ;;  %v7153_v5 = vrot.slane %v7151_v54, 1  ;;  %v7215_v17 = vshll.u32 %v9152_v6, 16  ;;  %v7090_v23 = vor.u32 %v7089_v44, %v7085_v12  ;;  %v13538_v60 = vld [vmem:[#allocation27_spill] sm:$0xff]  ;;  %v13539_v44 = vld [vmem:[#allocation24_spill] sm:$0xff] }
 0x1f9   : > { %10219 = vmatmul.mubr.msk.bf16.vlgmr.msra.gmra.mrb[232].mxu1 %vm287_vm3, %v6903_v13  ;;  %10234 = vmatprep.subr.bf16.mxu0 %v13413_v19  ;;  %v7031_v1 = vsel %vm274_vm2, %v7026_v15, %v7030_v56  ;;  %v7213_v56 = vshrl.u32 %v9152_v6, 16  ;;  %v7284_v29 = vshll.u32 %v13539_v44, 16 }
 0x1fa   : > { %10229 = vmatpush3.bf16.msra.mxu1 %v12524_v52  ;;  %v3805_v43 = vpop.f32.mrb[128].mxu0  ;;  %10230 = vmatprep.mubr.msk.bf16.mxu1 %vm10695_vm1, %v13413_v19  ;;  %v7279_v3 = vshll.u32 %v9155_v51, 16  ;;  %v7154_v45 = vor.u32 %v7153_v5, %v7149_v50  ;;  %v7217_v54 = vrot.slane %v7215_v17, 1 }
 0x1fb   : > { %v12633_v0 = vadd.f32 %v3805_v43, %v12405_v27  ;;  %v9902_v8 = vpop.f32.mrb[129].mxu0  ;;  %10240 = vmatprep.subr.bf16.mxu1 %v13413_v19 }
 0x1fc   : > { %v3869_v34 = vpop.f32.mrb[128].mxu1  ;;  %v3808_v38 = vpop.f32.mrb[130].mxu0  ;;  %v7220_v8 = vshll.u32 %v13538_v60, 16  ;;  %v7159_v5 = vsel %vm274_vm2, %v7154_v45, %v7158_v46  ;;  %v9118_v45 = vld [vmem:[%s10795_s5 + $0xcc] sm:$0xf]  ;;  %v7348_v60 = vshll.u32 %v12241_v14, 16 }
 0x1fd   : > { %v12640_v13 = vadd.f32 %v3869_v34, %v12410_v48  ;;  %v9908_v9 = vpop.f32.mrb[129].mxu1  ;;  %v12643_v27 = vadd.f32 %v3808_v38, %v12413_v28  ;;  %v9903_v22 = vpop.f32.mrb[131].mxu0  ;;  %v7094_v28 = vrot.slane %v7092_v36, 1  ;;  %v9112_v34 = vld [vmem:[%s10795_s5 + $0xb4] sm:$0xf]  ;;  %v9158_v36 = vcombine.low %v9109_v33, %v12248_v63 }
 0x1fe   : > { %v3872_v7 = vpop.f32.mrb[130].mxu1  ;;  %v9161_v25 = vcombine.low %v9112_v34, %v12263_v55  ;;  %v7222_v17 = vrot.slane %v7220_v8, 1 }
 0x1ff   : > { %v12649_v21 = vadd.f32 %v3872_v7, %v12417_v2  ;;  %v9909_v48 = vpop.f32.mrb[131].mxu1  ;;  %10225 = vmatmul.mubr.msk.bf16.vlgmr.msra.gmra.mrb[236].mxu0 %vm287_vm3, %v6967_v57  ;;  %v7095_v12 = vsel %vm274_vm2, %v7090_v23, %v7094_v28  ;;  %v7277_v7 = vshrl.u32 %v9155_v51, 16  ;;  %v7286_v51 = vrot.slane %v7284_v29, 1 }
 0x200   : > { %10235 = vmatpush3.bf16.msra.mxu0 %v12524_v52  ;;  %10236 = vmatprep.mubr.msk.bf16.mxu0 %vm10695_vm1, %v13413_v19  ;;  %v7407_v28 = vshll.u32 %v9161_v25, 16  ;;  %v7405_v29 = vshrl.u32 %v9161_v25, 16 }
 0x201   : > { %10231 = vmatmul.mubr.msk.bf16.vlgmr.msra.gmra.mrb[236].mxu1 %vm287_vm3, %v7031_v1  ;;  %10246 = vmatprep.subr.bf16.mxu0 %v13413_v19  ;;  %v7281_v1 = vrot.slane %v7279_v3, 1 }
 0x202   : > { %10241 = vmatpush3.bf16.msra.mxu1 %v12524_v52  ;;  %v3933_v2 = vpop.f32.mrb[132].mxu0  ;;  %10242 = vmatprep.mubr.msk.bf16.mxu1 %vm10695_vm1, %v13413_v19 }
 0x203   : > { %v12662_v43 = vadd.f32 %v3933_v2, %v12429_v41  ;;  %v9914_v15 = vpop.f32.mrb[133].mxu0  ;;  %10252 = vmatprep.subr.bf16.mxu1 %v13413_v19  ;;  %v7282_v55 = vor.u32 %v7281_v1, %v7277_v7 }
 0x204   : > { %v3997_v38 = vpop.f32.mrb[132].mxu1  ;;  %v3936_v57 = vpop.f32.mrb[134].mxu0 }
 0x205   : > { %v12671_v9 = vadd.f32 %v3997_v38, %v12434_v42  ;;  %v9920_v41 = vpop.f32.mrb[133].mxu1  ;;  %v12674_v22 = vadd.f32 %v3936_v57, %v12437_v61  ;;  %v9915_v6 = vpop.f32.mrb[135].mxu0  ;;  %v7218_v42 = vor.u32 %v7217_v54, %v7213_v56  ;;  %v7343_v61 = vshll.u32 %v9158_v36, 16 }
 0x206   : > { %v4000_v50 = vpop.f32.mrb[134].mxu1  ;;  %v7341_v56 = vshrl.u32 %v9158_v36, 16  ;;  %v7409_v41 = vrot.slane %v7407_v28, 1  ;;  %v7412_v36 = vshll.u32 %v12258_v37, 16  ;;  %v9167_v6 = vcombine.low %v9118_v45, %v12318_v24 }
 0x207   : > { %v12679_v48 = vadd.f32 %v4000_v50, %v12441_v32  ;;  %v9921_v63 = vpop.f32.mrb[135].mxu1  ;;  %10237 = vmatmul.mubr.msk.bf16.vlgmr.msra.gmra.mrb[240].mxu0 %vm287_vm3, %v7095_v12  ;;  %v9115_v32 = vld [vmem:[%s10795_s5 + $0xc0] sm:$0xf]  ;;  %v7223_v2 = vsel %vm274_vm2, %v7218_v42, %v7222_v17  ;;  %v7345_v54 = vrot.slane %v7343_v61, 1  ;;  %v7287_v12 = vsel %vm274_vm2, %v7282_v55, %v7286_v51  ;;  %v13540_v55 = vld [vmem:[#allocation38_spill] sm:$0xff]  ;;  %s199_s5 = sand.u32 1, %s10676_s13  }
 0x208   : > { %10247 = vmatpush3.bf16.msra.mxu0 %v12524_v52  ;;  %10248 = vmatprep.mubr.msk.bf16.mxu0 %vm10695_vm1, %v13413_v19  ;;  %v9164_v8 = vcombine.low %v9115_v32, %v12304_v49  ;;  %v7410_v24 = vor.u32 %v7409_v41, %v7405_v29  ;;  %v7535_v1 = vshll.u32 %v9167_v6, 16  ;;  %v7476_v51 = vshll.u32 %v13540_v55, 16  ;;  %v13541_v32 = vld [vmem:[#allocation42_spill] sm:$0xff]  ;;  %s8697_s8 = sshll.u32 %s199_s5, 8  ;;  %s13304_s15 = scalar_lea.sflag [#allocation3], %s199_s5 }
 0x209   : > { %10243 = vmatmul.mubr.msk.bf16.vlgmr.msra.gmra.mrb[240].mxu1 %vm287_vm3, %v7159_v5  ;;  %10258 = vmatprep.subr.bf16.mxu0 %v13413_v19  ;;  %s13202_s9 = scalar_lea.vmem [#allocation2], %s8697_s8 }
 0x20a   : > { %10253 = vmatpush3.bf16.msra.mxu1 %v12524_v52  ;;  %v4061_v23 = vpop.f32.mrb[136].mxu0  ;;  %10254 = vmatprep.mubr.msk.bf16.mxu1 %vm10695_vm1, %v13413_v19  ;;  %v7471_v7 = vshll.u32 %v9164_v8, 16  ;;  %v7469_v17 = vshrl.u32 %v9164_v8, 16  ;;  %s8591_s11 = sshll.u32 %s13202_s9, 4  ;;  %s13297_s11 = int_to_ptr.vmem [resolvable:$true] %s8591_s11 }
 0x20b   : > { %v12692_v3 = vadd.f32 %v4061_v23, %v12453_v10  ;;  %v9926_v33 = vpop.f32.mrb[137].mxu0  ;;  %10264 = vmatprep.subr.bf16.mxu1 %v13413_v19  ;;  %s10614_s23 = scalar_lea.vmem %s13297_s11, 4096  ;;  %p10621_p1 = scmp.lt.s32.totalorder %s13297_s11, %s10619_s27 }
 0x20c   : > { %v4125_v46 = vpop.f32.mrb[136].mxu1  ;;  %v4064_v15 = vpop.f32.mrb[138].mxu0  ;;  %v7473_v61 = vrot.slane %v7471_v7, 1  ;;  %v13542_v33 = vld [vmem:[#allocation43_spill] sm:$0xff]  ;;  %p10615_p12 = scmp.ne.s32.totalorder %s13297_s11, %s10614_s23  ;;  %p10622_p2 = scmp.lt.s32.totalorder %s10620_s28, %s10614_s23 }
 0x20d   : > { %v12700_v34 = vadd.f32 %v4125_v46, %v12458_v39  ;;  %v9932_v38 = vpop.f32.mrb[137].mxu1  ;;  %v12703_v10 = vadd.f32 %v4064_v15, %v12461_v30  ;;  %v9927_v57 = vpop.f32.mrb[139].mxu0  ;;  %v7346_v39 = vor.u32 %v7345_v54, %v7341_v56  ;;  %v7350_v30 = vrot.slane %v7348_v60, 1  ;;  %v13543_v54 = vld [vmem:[#allocation39_spill] sm:$0xff] }
 0x20e   : > { %v4128_v44 = vpop.f32.mrb[138].mxu1  ;;  %v7533_v15 = vshrl.u32 %v9167_v6, 16  ;;  %v7537_v56 = vrot.slane %v7535_v1, 1  ;;  %v7540_v60 = vshll.u32 %v13543_v54, 16  ;;  %v13544_v38 = vld [vmem:[#allocation31_spill] sm:$0xff]  ;;  %p10616_p13 = pnand %p10615_p12, %p10759_p4  ;;  %p10623_p3 = por %p10622_p2, %p10621_p1 }
 0x20f   : > { %v12709_v14 = vadd.f32 %v4128_v44, %v12465_v40  ;;  %v9933_v49 = vpop.f32.mrb[139].mxu1  ;;  %10249 = vmatmul.mubr.msk.bf16.vlgmr.msra.gmra.mrb[244].mxu0 %vm287_vm3, %v7223_v2  ;;  %v7414_v40 = vrot.slane %v7412_v36, 1  ;;  %v7351_v42 = vsel %vm274_vm2, %v7346_v39, %v7350_v30  ;;  %v7478_v44 = vrot.slane %v7476_v51, 1  ;;  %v9186_v6 = vld [vmem:[%s13351_s1 + $0x10] sm:$0x3] }
 0x210   : > { %10259 = vmatpush3.bf16.msra.mxu0 %v12524_v52  ;;  %10260 = vmatprep.mubr.msk.bf16.mxu0 %vm10695_vm1, %v13413_v19  ;;  %v7538_v41 = vor.u32 %v7537_v56, %v7533_v15  ;;  %v7542_v36 = vrot.slane %v7540_v60, 1  ;;  %v13545_v49 = vld [vmem:[#allocation44_spill] sm:$0xff]  ;;  %p10617_p0 = pneg %p10616_p13 }
 0x211   : > { %10255 = vmatmul.mubr.msk.bf16.vlgmr.msra.gmra.mrb[244].mxu1 %vm287_vm3, %v7287_v12  ;;  %10270 = vmatprep.subr.bf16.mxu0 %v13413_v19  ;;  %v7415_v46 = vsel %vm274_vm2, %v7410_v24, %v7414_v40  ;;  %v7474_v12 = vor.u32 %v7473_v61, %v7469_v17  ;;  %v13546_v17 = vld [vmem:[#allocation29_spill] sm:$0xff] }
 0x212   : > { %10265 = vmatpush3.bf16.msra.mxu1 %v12524_v52  ;;  %v4189_v37 = vpop.f32.mrb[140].mxu0  ;;  %10266 = vmatprep.mubr.msk.bf16.mxu1 %vm10695_vm1, %v13413_v19  ;;  %p10624_p5 = pnand %p10623_p3, %p10617_p0 }
 0x213   : > { %v12721_v50 = vadd.f32 %v4189_v37, %v12478_v47  ;;  %v9938_v5 = vpop.f32.mrb[141].mxu0  ;;  %10276 = vmatprep.subr.bf16.mxu1 %v13413_v19 }
 0x214   : > { %v4253_v25 = vpop.f32.mrb[140].mxu1  ;;  %v4192_v63 = vpop.f32.mrb[142].mxu0 }
 0x215   : > { %v12727_v23 = vadd.f32 %v4253_v25, %v13541_v32  ;;  %v9944_v28 = vpop.f32.mrb[141].mxu1  ;;  %v12730_v2 = vadd.f32 %v4192_v63, %v13542_v33  ;;  %v9939_v47 = vpop.f32.mrb[143].mxu0  ;;  %v12761_v25 = vsel %vm291_vm0, %v9186_v6, 0 }
 0x216   : > { %v4256_v45 = vpop.f32.mrb[142].mxu1 }
 0x217   : > { %v12735_v8 = vadd.f32 %v4256_v45, %v13544_v38  ;;  %v9945_v57 = vpop.f32.mrb[143].mxu1  ;;  %10261 = vmatmul.mubr.msk.bf16.vlgmr.msra.gmra.mrb[248].mxu0 %vm287_vm3, %v7351_v42  ;;  %v7543_v42 = vsel %vm274_vm2, %v7538_v41, %v7542_v36  ;;  %v13548_v38 = vld [vmem:[#allocation32_spill] sm:$0xff] }
 0x218   : > { %10271 = vmatpush3.bf16.msra.mxu0 %v12524_v52  ;;  %10272 = vmatprep.mubr.msk.bf16.mxu0 %vm10695_vm1, %v13413_v19 }
 0x219   : > { %10267 = vmatmul.mubr.msk.bf16.vlgmr.msra.gmra.mrb[248].mxu1 %vm287_vm3, %v7415_v46  ;;  %10282 = vmatprep.subr.bf16.mxu0 %v13413_v19 }
 0x21a   : > { %10277 = vmatpush3.bf16.msra.mxu1 %v12524_v52  ;;  %v4317_v29 = vpop.f32.mrb[144].mxu0  ;;  %10278 = vmatprep.mubr.msk.bf16.mxu1 %vm10695_vm1, %v13413_v19  ;;  %v7479_v52 = vsel %vm274_vm2, %v7474_v12, %v7478_v44 }
 0x21b   : > { %v12750_v39 = vadd.f32 %v4317_v29, %v13545_v49  ;;  %v9950_v30 = vpop.f32.mrb[145].mxu0  ;;  %10288 = vmatprep.subr.bf16.mxu1 %v13413_v19 }
 0x21c   : > { %v4381_v7 = vpop.f32.mrb[144].mxu1  ;;  %v4320_v37 = vpop.f32.mrb[146].mxu0 }
 0x21d   : > { %v12755_v24 = vadd.f32 %v4381_v7, %v12517_v59  ;;  %v9956_v40 = vpop.f32.mrb[145].mxu1  ;;  %v12758_v1 = vadd.f32 %v4320_v37, %v12520_v11  ;;  %v9951_v5 = vpop.f32.mrb[147].mxu0  ;;  %v13547_v11 = vld [vmem:[#allocation9_spill] sm:$0xff] }
 0x21e   : > { %v4384_v63 = vpop.f32.mrb[146].mxu1 }
 0x21f   : > { %v12765_v61 = vadd.f32 %v4384_v63, %v13546_v17  ;;  %v9957_v55 = vpop.f32.mrb[147].mxu1  ;;  %10273 = vmatmul.mubr.msk.bf16.vlgmr.msra.gmra.mrb[252].mxu0 %vm287_vm3, %v7479_v52  ;;  %v13551_v52 = vld [vmem:[#allocation6_spill] sm:$0xff] }
 0x220   : > { %10283 = vmatpush3.bf16.msra.mxu0 %v12761_v25  ;;  %10284 = vmatprep.mubr.msk.bf16.mxu0 %vm10695_vm1, %v13413_v19 }
 0x221   : > { %10279 = vmatmul.mubr.msk.bf16.vlgmr.msra.gmra.mrb[252].mxu1 %vm287_vm3, %v7543_v42  ;;  %10294 = vmatprep.subr.bf16.mxu0 %v13413_v19 }
 0x222   : > { %10289 = vmatpush3.bf16.msra.mxu1 %v12761_v25  ;;  %v4445_v59 = vpop.f32.mrb[148].mxu0  ;;  %10290 = vmatprep.mubr.msk.bf16.mxu1 %vm10695_vm1, %v13413_v19 }
 0x223   : > { %v12777_v51 = vadd.f32 %v4445_v59, %v13547_v11  ;;  %v9962_v32 = vpop.f32.mrb[149].mxu0  ;;  %10300 = vmatprep.subr.bf16.mxu1 %v13413_v19 }
 0x224   : > { %v4509_v28 = vpop.f32.mrb[148].mxu1  ;;  %v4448_v33 = vpop.f32.mrb[150].mxu0 }
 0x225   : > { %v12781_v47 = vadd.f32 %v4509_v28, %v12550_v16  ;;  %v9968_v45 = vpop.f32.mrb[149].mxu1  ;;  %v12784_v46 = vadd.f32 %v4448_v33, %v12553_v35  ;;  %v9963_v15 = vpop.f32.mrb[151].mxu0  ;;  %v13549_v16 = vld [vmem:[#allocation33_spill] sm:$0xff] }
 0x226   : > { %v4512_v56 = vpop.f32.mrb[150].mxu1 }
 0x227   : > { %v12787_v54 = vadd.f32 %v4512_v56, %v12559_v62  ;;  %v9969_v60 = vpop.f32.mrb[151].mxu1  ;;  %10285 = vmatmul.mubr.msk.bf16.vlgmr.msra.gmra.mrb[0].mxu0 %vm287_vm3, %v13548_v38  ;;  %v13550_v62 = vld [vmem:[#allocation30_spill] sm:$0xff] }
 0x228   : > { %10295 = vmatpush3.bf16.msra.mxu0 %v12761_v25  ;;  %10296 = vmatprep.mubr.msk.bf16.mxu0 %vm10695_vm1, %v13413_v19 }
 0x229   : > { %10291 = vmatmul.mubr.msk.bf16.vlgmr.msra.gmra.mrb[0].mxu1 %vm287_vm3, %v13549_v16  ;;  %10306 = vmatprep.subr.bf16.mxu0 %v13413_v19 }
 0x22a   : > { %10301 = vmatpush3.bf16.msra.mxu1 %v12761_v25  ;;  %v4573_v35 = vpop.f32.mrb[152].mxu0  ;;  %10302 = vmatprep.mubr.msk.bf16.mxu1 %vm10695_vm1, %v13413_v19 }
 0x22b   : > { %v12801_v57 = vadd.f32 %v4573_v35, %v13550_v62  ;;  %v9974_v12 = vpop.f32.mrb[153].mxu0  ;;  %10312 = vmatprep.subr.bf16.mxu1 %v13413_v19 }
 0x22c   : > { %v4637_v44 = vpop.f32.mrb[152].mxu1  ;;  %v4576_v29 = vpop.f32.mrb[154].mxu0 }
 0x22d   : > { %v12805_v41 = vadd.f32 %v4637_v44, %v12580_v20  ;;  %v9980_v36 = vpop.f32.mrb[153].mxu1  ;;  %v12808_v6 = vadd.f32 %v4576_v29, %v12583_v26  ;;  %v9975_v49 = vpop.f32.mrb[155].mxu0  ;;  %v13552_v20 = vld [vmem:[#allocation13_spill] sm:$0xff] }
 0x22e   : > { %v4640_v30 = vpop.f32.mrb[154].mxu1 }
 0x22f   : > { %v12811_v7 = vadd.f32 %v4640_v30, %v12589_v53  ;;  %v9981_v37 = vpop.f32.mrb[155].mxu1  ;;  %10297 = vmatmul.mubr.msk.bf16.vlgmr.msra.gmra.mrb[4].mxu0 %vm287_vm3, %v13551_v52 }
 0x230   : > { %10307 = vmatpush3.bf16.msra.mxu0 %v12761_v25  ;;  %10308 = vmatprep.mubr.msk.bf16.mxu0 %vm10695_vm1, %v13413_v19 }
 0x231   : > { %10303 = vmatmul.mubr.msk.bf16.vlgmr.msra.gmra.mrb[4].mxu1 %vm287_vm3, %v13552_v20  ;;  %10318 = vmatprep.subr.bf16.mxu0 %v13413_v19 }
 0x232   : > { %10313 = vmatpush3.bf16.msra.mxu1 %v12761_v25  ;;  %v4701_v26 = vpop.f32.mrb[156].mxu0  ;;  %10314 = vmatprep.mubr.msk.bf16.mxu1 %vm10695_vm1, %v13413_v19 }
 0x233   : > { %v12825_v53 = vadd.f32 %v4701_v26, %v12602_v58  ;;  %v9986_v40 = vpop.f32.mrb[157].mxu0  ;;  %10324 = vmatprep.subr.bf16.mxu1 %v13413_v19  ;;  %v13553_v58 = vld [vmem:[#allocation17_spill] sm:$0xff] }
 0x234   : > { %v4765_v5 = vpop.f32.mrb[156].mxu1  ;;  %v4704_v63 = vpop.f32.mrb[158].mxu0 }
 0x235   : > { %v12829_v42 = vadd.f32 %v4765_v5, %v12610_v4  ;;  %v9992_v17 = vpop.f32.mrb[157].mxu1  ;;  %v12832_v55 = vadd.f32 %v4704_v63, %v12613_v31  ;;  %v9987_v59 = vpop.f32.mrb[159].mxu0  ;;  %v13554_v4 = vld [vmem:[#allocation10_spill] sm:$0xff] }
 0x236   : > { %v4768_v11 = vpop.f32.mrb[158].mxu1 }
 0x237   : > { %v12835_v32 = vadd.f32 %v4768_v11, %v12619_v18  ;;  %v9993_v28 = vpop.f32.mrb[159].mxu1  ;;  %10309 = vmatmul.mubr.msk.bf16.vlgmr.msra.gmra.mrb[8].mxu0 %vm287_vm3, %v13553_v58 }
 0x238   : > { %10319 = vmatpush3.bf16.msra.mxu0 %v12761_v25  ;;  %10320 = vmatprep.mubr.msk.bf16.mxu0 %vm10695_vm1, %v13413_v19 }
 0x239   : > { %10315 = vmatmul.mubr.msk.bf16.vlgmr.msra.gmra.mrb[8].mxu1 %vm287_vm3, %v13554_v4  ;;  %10330 = vmatprep.subr.bf16.mxu0 %v13413_v19 }
 0x23a   : > { %10325 = vmatpush3.bf16.msra.mxu1 %v12761_v25  ;;  %v4868_v31 = vpop.f32.mrb[160].mxu0  ;;  %10326 = vmatprep.mubr.msk.bf16.mxu1 %vm10695_vm1, %v13413_v19 }
 0x23b   : > { %v12849_v18 = vadd.f32 %v4868_v31, %v12633_v0  ;;  %v9998_v33 = vpop.f32.mrb[161].mxu0  ;;  %10336 = vmatprep.subr.bf16.mxu1 %v13413_v19  ;;  %v13555_v0 = vld [vmem:[#allocation19_spill] sm:$0xff] }
 0x23c   : > { %v4918_v45 = vpop.f32.mrb[160].mxu1  ;;  %v4871_v15 = vpop.f32.mrb[162].mxu0 }
 0x23d   : > { %v12853_v56 = vadd.f32 %v4918_v45, %v12640_v13  ;;  %v10004_v60 = vpop.f32.mrb[161].mxu1  ;;  %v12856_v38 = vadd.f32 %v4871_v15, %v12643_v27  ;;  %v9999_v16 = vpop.f32.mrb[163].mxu0  ;;  %v13556_v13 = vld [vmem:[#allocation20_spill] sm:$0xff] }
 0x23e   : > { %v4921_v35 = vpop.f32.mrb[162].mxu1 }
 0x23f   : > { %v12859_v62 = vadd.f32 %v4921_v35, %v12649_v21  ;;  %v10005_v12 = vpop.f32.mrb[163].mxu1  ;;  %10321 = vmatmul.mubr.msk.bf16.vlgmr.msra.gmra.mrb[12].mxu0 %vm287_vm3, %v13555_v0 }
 0x240   : > { %10331 = vmatpush3.bf16.msra.mxu0 %v12761_v25  ;;  %10332 = vmatprep.mubr.msk.bf16.mxu0 %vm10695_vm1, %v13413_v19 }
 0x241   : > { %10327 = vmatmul.mubr.msk.bf16.vlgmr.msra.gmra.mrb[12].mxu1 %vm287_vm3, %v13556_v13  ;;  %10342 = vmatprep.subr.bf16.mxu0 %v13413_v19 }
 0x242   : > { %10337 = vmatpush3.bf16.msra.mxu1 %v12761_v25  ;;  %v4968_v27 = vpop.f32.mrb[164].mxu0  ;;  %10338 = vmatprep.mubr.msk.bf16.mxu1 %vm10695_vm1, %v13413_v19 }
 0x243   : > { %v12873_v21 = vadd.f32 %v4968_v27, %v12662_v43  ;;  %v10010_v44 = vpop.f32.mrb[165].mxu0  ;;  %10348 = vmatprep.subr.bf16.mxu1 %v13413_v19  ;;  %v13557_v43 = vld [vmem:[#allocation21_spill] sm:$0xff] }
 0x244   : > { %v5018_v29 = vpop.f32.mrb[164].mxu1  ;;  %v4971_v36 = vpop.f32.mrb[166].mxu0 }
 0x245   : > { %v12877_v49 = vadd.f32 %v5018_v29, %v12671_v9  ;;  %v10016_v30 = vpop.f32.mrb[165].mxu1  ;;  %v12880_v37 = vadd.f32 %v4971_v36, %v12674_v22  ;;  %v10011_v52 = vpop.f32.mrb[167].mxu0  ;;  %v13558_v9 = vld [vmem:[#allocation23_spill] sm:$0xff] }
 0x246   : > { %v5021_v20 = vpop.f32.mrb[166].mxu1 }
 0x247   : > { %v12883_v26 = vadd.f32 %v5021_v20, %v12679_v48  ;;  %v10017_v40 = vpop.f32.mrb[167].mxu1  ;;  %10333 = vmatmul.mubr.msk.bf16.vlgmr.msra.gmra.mrb[16].mxu0 %vm287_vm3, %v13557_v43 }
 0x248   : > { %10343 = vmatpush3.bf16.msra.mxu0 %v12761_v25  ;;  %10344 = vmatprep.mubr.msk.bf16.mxu0 %vm10695_vm1, %v13413_v19 }
 0x249   : > { %10339 = vmatmul.mubr.msk.bf16.vlgmr.msra.gmra.mrb[16].mxu1 %vm287_vm3, %v13558_v9  ;;  %10354 = vmatprep.subr.bf16.mxu0 %v13413_v19 }
 0x24a   : > { %10349 = vmatpush3.bf16.msra.mxu1 %v12761_v25  ;;  %v5068_v22 = vpop.f32.mrb[168].mxu0  ;;  %10350 = vmatprep.mubr.msk.bf16.mxu1 %vm10695_vm1, %v13413_v19 }
 0x24b   : > { %v12897_v48 = vadd.f32 %v5068_v22, %v12692_v3  ;;  %v10022_v5 = vpop.f32.mrb[169].mxu0  ;;  %10360 = vmatprep.subr.bf16.mxu1 %v13413_v19  ;;  %v13559_v3 = vld [vmem:[#allocation26_spill] sm:$0xff] }
 0x24c   : > { %v5118_v63 = vpop.f32.mrb[168].mxu1  ;;  %v5071_v17 = vpop.f32.mrb[170].mxu0 }
 0x24d   : > { %v12901_v59 = vadd.f32 %v5118_v63, %v12700_v34  ;;  %v10028_v11 = vpop.f32.mrb[169].mxu1  ;;  %v12904_v28 = vadd.f32 %v5071_v17, %v12703_v10  ;;  %v10023_v58 = vpop.f32.mrb[171].mxu0  ;;  %v13560_v34 = vld [vmem:[#allocation28_spill] sm:$0xff] }
 0x24e   : > { %v5121_v4 = vpop.f32.mrb[170].mxu1 }
 0x24f   : > { %v12907_v31 = vadd.f32 %v5121_v4, %v12709_v14  ;;  %v10029_v33 = vpop.f32.mrb[171].mxu1  ;;  %10345 = vmatmul.mubr.msk.bf16.vlgmr.msra.gmra.mrb[20].mxu0 %vm287_vm3, %v13559_v3 }
 0x250   : > { %10355 = vmatpush3.bf16.msra.mxu0 %v12761_v25  ;;  %10356 = vmatprep.mubr.msk.bf16.mxu0 %vm10695_vm1, %v13413_v19 }
 0x251   : > { %10351 = vmatmul.mubr.msk.bf16.vlgmr.msra.gmra.mrb[20].mxu1 %vm287_vm3, %v13560_v34  ;;  %10366 = vmatprep.subr.bf16.mxu0 %v13413_v19 }
 0x252   : > { %10361 = vmatpush3.bf16.msra.mxu1 %v12761_v25  ;;  %v5168_v10 = vpop.f32.mrb[172].mxu0  ;;  %10362 = vmatprep.mubr.msk.bf16.mxu1 %vm10695_vm1, %v13413_v19 }
 0x253   : > { %v12921_v14 = vadd.f32 %v5168_v10, %v12721_v50  ;;  %v10034_v45 = vpop.f32.mrb[173].mxu0  ;;  %10372 = vmatprep.subr.bf16.mxu1 %v13413_v19  ;;  %v13561_v50 = vld [vmem:[#allocation36_spill] sm:$0xff] }
 0x254   : > { %v5218_v15 = vpop.f32.mrb[172].mxu1  ;;  %v5171_v60 = vpop.f32.mrb[174].mxu0 }
 0x255   : > { %v12925_v16 = vadd.f32 %v5218_v15, %v12727_v23  ;;  %v10040_v35 = vpop.f32.mrb[173].mxu1  ;;  %v12928_v12 = vadd.f32 %v5171_v60, %v12730_v2  ;;  %v10035_v0 = vpop.f32.mrb[175].mxu0  ;;  %v13562_v23 = vld [vmem:[#allocation37_spill] sm:$0xff] }
 0x256   : > { %v5221_v13 = vpop.f32.mrb[174].mxu1 }
 0x257   : > { %v12931_v27 = vadd.f32 %v5221_v13, %v12735_v8  ;;  %v10041_v44 = vpop.f32.mrb[175].mxu1  ;;  %10357 = vmatmul.mubr.msk.bf16.vlgmr.msra.gmra.mrb[24].mxu0 %vm287_vm3, %v13561_v50 }
 0x258   : > { %10367 = vmatpush3.bf16.msra.mxu0 %v12761_v25  ;;  %10368 = vmatprep.mubr.msk.bf16.mxu0 %vm10695_vm1, %v13413_v19 }
 0x259   : > { %10363 = vmatmul.mubr.msk.bf16.vlgmr.msra.gmra.mrb[24].mxu1 %vm287_vm3, %v13562_v23 }
 0x25a   : > { %10373 = vmatpush3.bf16.msra.mxu1 %v12761_v25  ;;  %v5268_v2 = vpop.f32.mrb[176].mxu0  ;;  %10374 = vmatprep.mubr.msk.bf16.mxu1 %vm10695_vm1, %v13413_v19  ;;  %v13563_v19 = vld [vmem:[#allocation40_spill] sm:$0xff] }
 0x25b   : > { %v12944_v8 = vadd.f32 %v5268_v2, %v12750_v39  ;;  %v10046_v29 = vpop.f32.mrb[177].mxu0  ;;  %v13564_v39 = vld [vmem:[#allocation41_spill] sm:$0xff] }
 0x25c   : > { %v5318_v36 = vpop.f32.mrb[176].mxu1  ;;  %v5271_v30 = vpop.f32.mrb[178].mxu0 }
 0x25d   : > { %v12947_v52 = vadd.f32 %v5318_v36, %v12755_v24  ;;  %v10052_v20 = vpop.f32.mrb[177].mxu1  ;;  %v12950_v40 = vadd.f32 %v5271_v30, %v12758_v1  ;;  %v10047_v43 = vpop.f32.mrb[179].mxu0 }
 0x25e   : > { %v5321_v9 = vpop.f32.mrb[178].mxu1 }
 0x25f   : > { %v12953_v25 = vadd.f32 %v5321_v9, %v12765_v61  ;;  %v10053_v22 = vpop.f32.mrb[179].mxu1  ;;  %10369 = vmatmul.mubr.msk.bf16.vlgmr.msra.gmra.mrb[28].mxu0 %vm287_vm3, %v13563_v19 }
 0x261   : > { %10375 = vmatmul.mubr.msk.bf16.vlgmr.msra.gmra.mrb[28].mxu1 %vm287_vm3, %v13564_v39 }
 0x262   : > { %v5368_v5 = vpop.f32.mrb[180].mxu0 }
 0x263   : > { %v12960_v24 = vadd.f32 %v5368_v5, %v12777_v51  ;;  %v10058_v63 = vpop.f32.mrb[181].mxu0 }
 0x264   : > { %v5418_v17 = vpop.f32.mrb[180].mxu1  ;;  %v5371_v1 = vpop.f32.mrb[182].mxu0 }
 0x265   : > { %v12963_v11 = vadd.f32 %v5418_v17, %v12781_v47  ;;  %v10064_v58 = vpop.f32.mrb[181].mxu1  ;;  %v12966_v61 = vadd.f32 %v5371_v1, %v12784_v46  ;;  %v10059_v4 = vpop.f32.mrb[183].mxu0 }
 0x266   : > { %v5421_v33 = vpop.f32.mrb[182].mxu1 }
 0x267   : > { %v12969_v3 = vadd.f32 %v5421_v33, %v12787_v54  ;;  %v10065_v34 = vpop.f32.mrb[183].mxu1 }
 0x26a   : > { %v5468_v10 = vpop.f32.mrb[184].mxu0 }
 0x26b   : > { %v12972_v51 = vadd.f32 %v5468_v10, %v12801_v57  ;;  %v10070_v45 = vpop.f32.mrb[185].mxu0 }
 0x26c   : > { %v5518_v15 = vpop.f32.mrb[184].mxu1  ;;  %v5471_v60 = vpop.f32.mrb[186].mxu0 }
 0x26d   : > { %v12975_v47 = vadd.f32 %v5518_v15, %v12805_v41  ;;  %v10076_v35 = vpop.f32.mrb[185].mxu1  ;;  %v12978_v46 = vadd.f32 %v5471_v60, %v12808_v6  ;;  %v10071_v0 = vpop.f32.mrb[187].mxu0 }
 0x26e   : > { %v5521_v13 = vpop.f32.mrb[186].mxu1 }
 0x26f   : > { %v12981_v54 = vadd.f32 %v5521_v13, %v12811_v7  ;;  %v10077_v44 = vpop.f32.mrb[187].mxu1 }
 0x272   : > { %v5568_v50 = vpop.f32.mrb[188].mxu0 }
 0x273   : > { %v12984_v57 = vadd.f32 %v5568_v50, %v12825_v53  ;;  %v10082_v23 = vpop.f32.mrb[189].mxu0 }
 0x274   : > { %v5618_v2 = vpop.f32.mrb[188].mxu1  ;;  %v5571_v29 = vpop.f32.mrb[190].mxu0 }
 0x275   : > { %v12987_v41 = vadd.f32 %v5618_v2, %v12829_v42  ;;  %v10088_v36 = vpop.f32.mrb[189].mxu1  ;;  %v12990_v6 = vadd.f32 %v5571_v29, %v12832_v55  ;;  %v10083_v30 = vpop.f32.mrb[191].mxu0 }
 0x276   : > { %v5621_v20 = vpop.f32.mrb[190].mxu1 }
 0x277   : > { %v12993_v7 = vadd.f32 %v5621_v20, %v12835_v32  ;;  %v10089_v43 = vpop.f32.mrb[191].mxu1 }
 0x27a   : > { %v5737_v9 = vpop.f32.mrb[192].mxu0 }
 0x27b   : > { %v12996_v53 = vadd.f32 %v5737_v9, %v12849_v18  ;;  %v10094_v22 = vpop.f32.mrb[193].mxu0 }
 0x27c   : > { %v5786_v19 = vpop.f32.mrb[192].mxu1  ;;  %v5740_v39 = vpop.f32.mrb[194].mxu0 }
 0x27d   : > { %v12999_v42 = vadd.f32 %v5786_v19, %v12853_v56  ;;  %v10100_v5 = vpop.f32.mrb[193].mxu1  ;;  %v13002_v55 = vadd.f32 %v5740_v39, %v12856_v38  ;;  %v10095_v63 = vpop.f32.mrb[195].mxu0 }
 0x27e   : > { %v5789_v17 = vpop.f32.mrb[194].mxu1 }
 0x27f   : > { %v13005_v32 = vadd.f32 %v5789_v17, %v12859_v62  ;;  %v10101_v1 = vpop.f32.mrb[195].mxu1 }
 0x282   : > { %v5835_v58 = vpop.f32.mrb[196].mxu0 }
 0x283   : > { %v13008_v18 = vadd.f32 %v5835_v58, %v12873_v21  ;;  %v10106_v4 = vpop.f32.mrb[197].mxu0 }
 0x284   : > { %v5884_v33 = vpop.f32.mrb[196].mxu1  ;;  %v5838_v34 = vpop.f32.mrb[198].mxu0 }
 0x285   : > { %v13011_v56 = vadd.f32 %v5884_v33, %v12877_v49  ;;  %v10112_v10 = vpop.f32.mrb[197].mxu1  ;;  %v13014_v38 = vadd.f32 %v5838_v34, %v12880_v37  ;;  %v10107_v45 = vpop.f32.mrb[199].mxu0 }
 0x286   : > { %v5887_v15 = vpop.f32.mrb[198].mxu1 }
 0x287   : > { %v13017_v62 = vadd.f32 %v5887_v15, %v12883_v26  ;;  %v10113_v60 = vpop.f32.mrb[199].mxu1 }
 0x28a   : > { %v5933_v35 = vpop.f32.mrb[200].mxu0 }
 0x28b   : > { %v13020_v21 = vadd.f32 %v5933_v35, %v12897_v48  ;;  %v10118_v0 = vpop.f32.mrb[201].mxu0 }
 0x28c   : > { %v5982_v13 = vpop.f32.mrb[200].mxu1  ;;  %v5936_v44 = vpop.f32.mrb[202].mxu0 }
 0x28d   : > { %v13023_v49 = vadd.f32 %v5982_v13, %v12901_v59  ;;  %v10124_v50 = vpop.f32.mrb[201].mxu1  ;;  %v13026_v37 = vadd.f32 %v5936_v44, %v12904_v28  ;;  %v10119_v23 = vpop.f32.mrb[203].mxu0 }
 0x28e   : > { %v5985_v2 = vpop.f32.mrb[202].mxu1 }
 0x28f   : > { %v13029_v26 = vadd.f32 %v5985_v2, %v12907_v31  ;;  %v10125_v29 = vpop.f32.mrb[203].mxu1 }
 0x292   : > { %v6031_v36 = vpop.f32.mrb[204].mxu0 }
 0x293   : > { %v13032_v48 = vadd.f32 %v6031_v36, %v12921_v14  ;;  %v10130_v30 = vpop.f32.mrb[205].mxu0 }
 0x294   : > { %v6080_v20 = vpop.f32.mrb[204].mxu1  ;;  %v6034_v43 = vpop.f32.mrb[206].mxu0 }
 0x295   : > { %v13035_v59 = vadd.f32 %v6080_v20, %v12925_v16  ;;  %v10136_v9 = vpop.f32.mrb[205].mxu1  ;;  %v13038_v28 = vadd.f32 %v6034_v43, %v12928_v12  ;;  %v10131_v22 = vpop.f32.mrb[207].mxu0 }
 0x296   : > { %v6083_v19 = vpop.f32.mrb[206].mxu1 }
 0x297   : > { %v13041_v31 = vadd.f32 %v6083_v19, %v12931_v27  ;;  %v10137_v39 = vpop.f32.mrb[207].mxu1 }
 0x29a   : > { %v6129_v5 = vpop.f32.mrb[208].mxu0 }
 0x29b   : > { %v13044_v14 = vadd.f32 %v6129_v5, %v12944_v8  ;;  %v10142_v63 = vpop.f32.mrb[209].mxu0 }
 0x29c   : > { %v6178_v17 = vpop.f32.mrb[208].mxu1  ;;  %v6132_v1 = vpop.f32.mrb[210].mxu0 }
 0x29d   : > { %v13047_v16 = vadd.f32 %v6178_v17, %v12947_v52  ;;  %v10148_v58 = vpop.f32.mrb[209].mxu1  ;;  %v13050_v12 = vadd.f32 %v6132_v1, %v12950_v40  ;;  %v10143_v4 = vpop.f32.mrb[211].mxu0 }
 0x29e   : > { %v6181_v33 = vpop.f32.mrb[210].mxu1 }
 0x29f   : > { %v13053_v27 = vadd.f32 %v6181_v33, %v12953_v25  ;;  %v10149_v34 = vpop.f32.mrb[211].mxu1 }
 0x2a2   : > { %v6227_v10 = vpop.f32.mrb[212].mxu0 }
 0x2a3   : > { %v13056_v8 = vadd.f32 %v6227_v10, %v12960_v24  ;;  %v10154_v45 = vpop.f32.mrb[213].mxu0 }
 0x2a4   : > { %v6276_v15 = vpop.f32.mrb[212].mxu1  ;;  %v6230_v60 = vpop.f32.mrb[214].mxu0 }
 0x2a5   : > { %v13059_v52 = vadd.f32 %v6276_v15, %v12963_v11  ;;  %v10160_v35 = vpop.f32.mrb[213].mxu1  ;;  %v13062_v40 = vadd.f32 %v6230_v60, %v12966_v61  ;;  %v10155_v0 = vpop.f32.mrb[215].mxu0 }
 0x2a6   : > { %v6279_v13 = vpop.f32.mrb[214].mxu1 }
 0x2a7   : > { %v13065_v25 = vadd.f32 %v6279_v13, %v12969_v3  ;;  %v10161_v44 = vpop.f32.mrb[215].mxu1 }
 0x2aa   : > { %v6325_v50 = vpop.f32.mrb[216].mxu0 }
 0x2ab   : > { %v13068_v24 = vadd.f32 %v6325_v50, %v12972_v51  ;;  %v10166_v23 = vpop.f32.mrb[217].mxu0 }
 0x2ac   : > { %v6374_v2 = vpop.f32.mrb[216].mxu1  ;;  %v6328_v29 = vpop.f32.mrb[218].mxu0 }
 0x2ad   : > { %v13071_v11 = vadd.f32 %v6374_v2, %v12975_v47  ;;  %v10172_v36 = vpop.f32.mrb[217].mxu1  ;;  %v13074_v61 = vadd.f32 %v6328_v29, %v12978_v46  ;;  %v10167_v30 = vpop.f32.mrb[219].mxu0 }
 0x2ae   : > { %v6377_v20 = vpop.f32.mrb[218].mxu1 }
 0x2af   : > { %v13077_v3 = vadd.f32 %v6377_v20, %v12981_v54  ;;  %v10173_v43 = vpop.f32.mrb[219].mxu1 }
 0x2b2   : > { %v6423_v9 = vpop.f32.mrb[220].mxu0 }
 0x2b3   : > { %v13080_v51 = vadd.f32 %v6423_v9, %v12984_v57  ;;  %v10178_v22 = vpop.f32.mrb[221].mxu0 }
 0x2b4   : > { %v6472_v19 = vpop.f32.mrb[220].mxu1  ;;  %v6426_v39 = vpop.f32.mrb[222].mxu0 }
 0x2b5   : > { %v13083_v47 = vadd.f32 %v6472_v19, %v12987_v41  ;;  %v10184_v5 = vpop.f32.mrb[221].mxu1  ;;  %v13086_v46 = vadd.f32 %v6426_v39, %v12990_v6  ;;  %v10179_v63 = vpop.f32.mrb[223].mxu0 }
 0x2b6   : > { %v6475_v17 = vpop.f32.mrb[222].mxu1 }
 0x2b7   : > { %v13089_v54 = vadd.f32 %v6475_v17, %v12993_v7  ;;  %v10185_v1 = vpop.f32.mrb[223].mxu1 }
 0x2ba   : > { %v6621_v58 = vpop.f32.mrb[224].mxu0 }
 0x2bb   : > { %v13092_v57 = vadd.f32 %v6621_v58, %v12996_v53  ;;  %v10190_v4 = vpop.f32.mrb[225].mxu0 }
 0x2bc   : > { %v6685_v33 = vpop.f32.mrb[224].mxu1  ;;  %v6624_v34 = vpop.f32.mrb[226].mxu0 }
 0x2bd   : > { %v13095_v41 = vadd.f32 %v6685_v33, %v12999_v42  ;;  %v10196_v10 = vpop.f32.mrb[225].mxu1  ;;  %v13098_v6 = vadd.f32 %v6624_v34, %v13002_v55  ;;  %v10191_v45 = vpop.f32.mrb[227].mxu0 }
 0x2be   : > { %v6688_v15 = vpop.f32.mrb[226].mxu1 }
 0x2bf   : > { %v13101_v7 = vadd.f32 %v6688_v15, %v13005_v32  ;;  %v10197_v60 = vpop.f32.mrb[227].mxu1 }
 0x2c2   : > { %v6749_v35 = vpop.f32.mrb[228].mxu0 }
 0x2c3   : > { %v13104_v53 = vadd.f32 %v6749_v35, %v13008_v18  ;;  %v10202_v0 = vpop.f32.mrb[229].mxu0 }
 0x2c4   : > { %v6813_v13 = vpop.f32.mrb[228].mxu1  ;;  %v6752_v44 = vpop.f32.mrb[230].mxu0 }
 0x2c5   : > { %v13107_v42 = vadd.f32 %v6813_v13, %v13011_v56  ;;  %v10208_v50 = vpop.f32.mrb[229].mxu1  ;;  %v13110_v55 = vadd.f32 %v6752_v44, %v13014_v38  ;;  %v10203_v23 = vpop.f32.mrb[231].mxu0 }
 0x2c6   : > { %v6816_v2 = vpop.f32.mrb[230].mxu1 }
 0x2c7   : > { %v13113_v32 = vadd.f32 %v6816_v2, %v13017_v62  ;;  %v10209_v29 = vpop.f32.mrb[231].mxu1 }
 0x2ca   : > { %v6877_v36 = vpop.f32.mrb[232].mxu0 }
 0x2cb   : > { %v13116_v18 = vadd.f32 %v6877_v36, %v13020_v21  ;;  %v10214_v30 = vpop.f32.mrb[233].mxu0 }
 0x2cc   : > { %v6941_v20 = vpop.f32.mrb[232].mxu1  ;;  %v6880_v43 = vpop.f32.mrb[234].mxu0 }
 0x2cd   : > { %v13119_v56 = vadd.f32 %v6941_v20, %v13023_v49  ;;  %v10220_v9 = vpop.f32.mrb[233].mxu1  ;;  %v13122_v38 = vadd.f32 %v6880_v43, %v13026_v37  ;;  %v10215_v22 = vpop.f32.mrb[235].mxu0 }
 0x2ce   : > { %v6944_v19 = vpop.f32.mrb[234].mxu1 }
 0x2cf   : > { %v13125_v62 = vadd.f32 %v6944_v19, %v13029_v26  ;;  %v10221_v39 = vpop.f32.mrb[235].mxu1 }
 0x2d2   : > { %v7005_v5 = vpop.f32.mrb[236].mxu0 }
 0x2d3   : > { %v13128_v21 = vadd.f32 %v7005_v5, %v13032_v48  ;;  %v10226_v63 = vpop.f32.mrb[237].mxu0 }
 0x2d4   : > { %v7069_v17 = vpop.f32.mrb[236].mxu1  ;;  %v7008_v1 = vpop.f32.mrb[238].mxu0 }
 0x2d5   : > { %v13131_v49 = vadd.f32 %v7069_v17, %v13035_v59  ;;  %v10232_v58 = vpop.f32.mrb[237].mxu1  ;;  %v13134_v37 = vadd.f32 %v7008_v1, %v13038_v28  ;;  %v10227_v4 = vpop.f32.mrb[239].mxu0 }
 0x2d6   : > { %v7072_v33 = vpop.f32.mrb[238].mxu1 }
 0x2d7   : > { %v13137_v26 = vadd.f32 %v7072_v33, %v13041_v31  ;;  %v10233_v34 = vpop.f32.mrb[239].mxu1 }
 0x2da   : > { %v7133_v10 = vpop.f32.mrb[240].mxu0 }
 0x2db   : > { %v13140_v48 = vadd.f32 %v7133_v10, %v13044_v14  ;;  %v10238_v45 = vpop.f32.mrb[241].mxu0 }
 0x2dc   : > { %v7197_v15 = vpop.f32.mrb[240].mxu1  ;;  %v7136_v60 = vpop.f32.mrb[242].mxu0 }
 0x2dd   : > { %v13143_v59 = vadd.f32 %v7197_v15, %v13047_v16  ;;  %v10244_v35 = vpop.f32.mrb[241].mxu1  ;;  %v13146_v28 = vadd.f32 %v7136_v60, %v13050_v12  ;;  %v10239_v0 = vpop.f32.mrb[243].mxu0 }
 0x2de   : > { %v7200_v13 = vpop.f32.mrb[242].mxu1 }
 0x2df   : > { %v13149_v31 = vadd.f32 %v7200_v13, %v13053_v27  ;;  %v10245_v44 = vpop.f32.mrb[243].mxu1 }
 0x2e2   : > { %v7261_v50 = vpop.f32.mrb[244].mxu0 }
 0x2e3   : > { %v13152_v14 = vadd.f32 %v7261_v50, %v13056_v8  ;;  %v10250_v23 = vpop.f32.mrb[245].mxu0 }
 0x2e4   : > { %v7325_v2 = vpop.f32.mrb[244].mxu1  ;;  %v7264_v29 = vpop.f32.mrb[246].mxu0 }
 0x2e5   : > { %v13155_v16 = vadd.f32 %v7325_v2, %v13059_v52  ;;  %v10256_v36 = vpop.f32.mrb[245].mxu1  ;;  %v13158_v12 = vadd.f32 %v7264_v29, %v13062_v40  ;;  %v10251_v30 = vpop.f32.mrb[247].mxu0 }
 0x2e6   : > { %v7328_v20 = vpop.f32.mrb[246].mxu1 }
 0x2e7   : > { %v13161_v27 = vadd.f32 %v7328_v20, %v13065_v25  ;;  %v10257_v43 = vpop.f32.mrb[247].mxu1 }
 0x2ea   : > { %v7389_v9 = vpop.f32.mrb[248].mxu0 }
 0x2eb   : > { %v13164_v8 = vadd.f32 %v7389_v9, %v13068_v24  ;;  %v10262_v22 = vpop.f32.mrb[249].mxu0 }
 0x2ec   : > { %v7453_v19 = vpop.f32.mrb[248].mxu1  ;;  %v7392_v39 = vpop.f32.mrb[250].mxu0 }
 0x2ed   : > { %v13167_v52 = vadd.f32 %v7453_v19, %v13071_v11  ;;  %v10268_v5 = vpop.f32.mrb[249].mxu1  ;;  %v13170_v40 = vadd.f32 %v7392_v39, %v13074_v61  ;;  %v10263_v63 = vpop.f32.mrb[251].mxu0 }
 0x2ee   : > { %v7456_v17 = vpop.f32.mrb[250].mxu1 }
 0x2ef   : > { %v13173_v25 = vadd.f32 %v7456_v17, %v13077_v3  ;;  %v10269_v1 = vpop.f32.mrb[251].mxu1 }
 0x2f2   : > { %v7517_v24 = vpop.f32.mrb[252].mxu0 }
 0x2f3   : > { %v13176_v58 = vadd.f32 %v7517_v24, %v13080_v51  ;;  %v10274_v4 = vpop.f32.mrb[253].mxu0  ;;  %v13191_v51 = vld [vmem:[%s13352_s2] ss:$0 sm:$0xff] }
 0x2f4   : > { %v7581_v33 = vpop.f32.mrb[252].mxu1  ;;  %v7520_v11 = vpop.f32.mrb[254].mxu0 }
 0x2f5   : > { %v13179_v34 = vadd.f32 %v7581_v33, %v13083_v47  ;;  %v10280_v61 = vpop.f32.mrb[253].mxu1  ;;  %v13182_v10 = vadd.f32 %v7520_v11, %v13086_v46  ;;  %v10275_v45 = vpop.f32.mrb[255].mxu0 }
 0x2f6   : > { %v7584_v15 = vpop.f32.mrb[254].mxu1 }
 0x2f7   : > { %v13185_v3 = vadd.f32 %v7584_v15, %v13089_v54  ;;  %v10281_v60 = vpop.f32.mrb[255].mxu1 }
 0x2fa   : > { %v7684_v35 = vpop.f32.mrb[0].mxu0 }
 0x2fb   : > { %v8441_v47 = vadd.f32 %v7684_v35, %v13092_v57  ;;  %v10286_v0 = vpop.f32.mrb[1].mxu0 }
 0x2fc   : > { %v7734_v46 = vpop.f32.mrb[0].mxu1  ;;  %v7687_v13 = vpop.f32.mrb[2].mxu0 }
 0x2fd   : > { %v8480_v44 = vadd.f32 %v13191_v51, %v8441_v47  ;;  %v8443_v54 = vadd.f32 %v7734_v46, %v13095_v41  ;;  %v10292_v50 = vpop.f32.mrb[1].mxu1  ;;  %v8442_v23 = vadd.f32 %v7687_v13, %v13098_v6  ;;  %v10287_v2 = vpop.f32.mrb[3].mxu0 }
 0x2fe   : > { %v7737_v29 = vpop.f32.mrb[2].mxu1 }
 0x2ff   : > { %v8512_v36 = vmax.f32 %v8480_v44, 0.0  ;;  %v8482_v30 = vadd.f32 %v13191_v51, %v8443_v54  ;;  %v8481_v20 = vadd.f32 %v13191_v51, %v8442_v23  ;;  %v8444_v43 = vadd.f32 %v7737_v29, %v13101_v7  ;;  %v10293_v57 = vpop.f32.mrb[3].mxu1 }
 0x301   : > { %8544 = vst [vmem:[%s13202_s9] sm:$0xff] %v8512_v36  ;;  %v8514_v41 = vmax.f32 %v8482_v30, 0.0  ;;  %v8513_v9 = vmax.f32 %v8481_v20, 0.0  ;;  %v8483_v6 = vadd.f32 %v13191_v51, %v8444_v43 }
 0x302   : > { %v7784_v22 = vpop.f32.mrb[4].mxu0 }
 0x303   : > { %8546 = vst [vmem:[%s13202_s9 + $0x10] sm:$0xff] %v8514_v41  ;;  %8545 = vst [vmem:[%s13202_s9 + $0x8] sm:$0xff] %v8513_v9  ;;  %v8515_v19 = vmax.f32 %v8483_v6, 0.0  ;;  %v8445_v39 = vadd.f32 %v7784_v22, %v13104_v53  ;;  %v10298_v7 = vpop.f32.mrb[5].mxu0 }
 0x304   : > { %v7834_v5 = vpop.f32.mrb[4].mxu1  ;;  %v7787_v63 = vpop.f32.mrb[6].mxu0 }
 0x305   : > { %8547 = vst [vmem:[%s13202_s9 + $0x18] sm:$0xff] %v8515_v19  ;;  %v8484_v17 = vadd.f32 %v13191_v51, %v8445_v39  ;;  %v8447_v1 = vadd.f32 %v7834_v5, %v13107_v42  ;;  %v10304_v24 = vpop.f32.mrb[5].mxu1  ;;  %v8446_v4 = vadd.f32 %v7787_v63, %v13110_v55  ;;  %v10299_v33 = vpop.f32.mrb[7].mxu0 }
 0x306   : > { %v7837_v11 = vpop.f32.mrb[6].mxu1 }
 0x307   : > { %v8516_v61 = vmax.f32 %v8484_v17, 0.0  ;;  %v8486_v45 = vadd.f32 %v13191_v51, %v8447_v1  ;;  %v8485_v53 = vadd.f32 %v13191_v51, %v8446_v4  ;;  %v8448_v15 = vadd.f32 %v7837_v11, %v13113_v32  ;;  %v10305_v60 = vpop.f32.mrb[7].mxu1 }
 0x309   : > { %8548 = vst [vmem:[%s13202_s9 + $0x20] sm:$0xff] %v8516_v61  ;;  %v8518_v35 = vmax.f32 %v8486_v45, 0.0  ;;  %v8517_v47 = vmax.f32 %v8485_v53, 0.0  ;;  %v8487_v42 = vadd.f32 %v13191_v51, %v8448_v15 }
 0x30a   : > { %v7884_v0 = vpop.f32.mrb[8].mxu0 }
 0x30b   : > { %8550 = vst [vmem:[%s13202_s9 + $0x30] sm:$0xff] %v8518_v35  ;;  %8549 = vst [vmem:[%s13202_s9 + $0x28] sm:$0xff] %v8517_v47  ;;  %v8519_v55 = vmax.f32 %v8487_v42, 0.0  ;;  %v8449_v46 = vadd.f32 %v7884_v0, %v13116_v18  ;;  %v10310_v13 = vpop.f32.mrb[9].mxu0 }
 0x30c   : > { %v7934_v44 = vpop.f32.mrb[8].mxu1  ;;  %v7887_v54 = vpop.f32.mrb[10].mxu0 }
 0x30d   : > { %8551 = vst [vmem:[%s13202_s9 + $0x38] sm:$0xff] %v8519_v55  ;;  %v8488_v50 = vadd.f32 %v13191_v51, %v8449_v46  ;;  %v8451_v32 = vadd.f32 %v7934_v44, %v13119_v56  ;;  %v10316_v23 = vpop.f32.mrb[9].mxu1  ;;  %v8450_v2 = vadd.f32 %v7887_v54, %v13122_v38  ;;  %v10311_v29 = vpop.f32.mrb[11].mxu0 }
 0x30e   : > { %v7937_v36 = vpop.f32.mrb[10].mxu1 }
 0x30f   : > { %v8520_v30 = vmax.f32 %v8488_v50, 0.0  ;;  %v8490_v20 = vadd.f32 %v13191_v51, %v8451_v32  ;;  %v8489_v18 = vadd.f32 %v13191_v51, %v8450_v2  ;;  %v8452_v43 = vadd.f32 %v7937_v36, %v13125_v62  ;;  %v10317_v57 = vpop.f32.mrb[11].mxu1 }
 0x311   : > { %8552 = vst [vmem:[%s13202_s9 + $0x40] sm:$0xff] %v8520_v30  ;;  %v8522_v41 = vmax.f32 %v8490_v20, 0.0  ;;  %v8521_v9 = vmax.f32 %v8489_v18, 0.0  ;;  %v8491_v56 = vadd.f32 %v13191_v51, %v8452_v43 }
 0x312   : > { %v7984_v6 = vpop.f32.mrb[12].mxu0 }
 0x313   : > { %8554 = vst [vmem:[%s13202_s9 + $0x50] sm:$0xff] %v8522_v41  ;;  %8553 = vst [vmem:[%s13202_s9 + $0x48] sm:$0xff] %v8521_v9  ;;  %v8523_v38 = vmax.f32 %v8491_v56, 0.0  ;;  %v8453_v22 = vadd.f32 %v7984_v6, %v13128_v21  ;;  %v10322_v19 = vpop.f32.mrb[13].mxu0 }
 0x314   : > { %v8034_v39 = vpop.f32.mrb[12].mxu1  ;;  %v7987_v7 = vpop.f32.mrb[14].mxu0 }
 0x315   : > { %8555 = vst [vmem:[%s13202_s9 + $0x58] sm:$0xff] %v8523_v38  ;;  %v8492_v5 = vadd.f32 %v13191_v51, %v8453_v22  ;;  %v8455_v62 = vadd.f32 %v8034_v39, %v13131_v49  ;;  %v10328_v63 = vpop.f32.mrb[13].mxu1  ;;  %v8454_v17 = vadd.f32 %v7987_v7, %v13134_v37  ;;  %v10323_v1 = vpop.f32.mrb[15].mxu0 }
 0x316   : > { %v8037_v24 = vpop.f32.mrb[14].mxu1 }
 0x317   : > { %v8524_v4 = vmax.f32 %v8492_v5, 0.0  ;;  %v8494_v33 = vadd.f32 %v13191_v51, %v8455_v62  ;;  %v8493_v21 = vadd.f32 %v13191_v51, %v8454_v17  ;;  %v8456_v11 = vadd.f32 %v8037_v24, %v13137_v26  ;;  %v10329_v61 = vpop.f32.mrb[15].mxu1 }
 0x319   : > { %8556 = vst [vmem:[%s13202_s9 + $0x60] sm:$0xff] %v8524_v4  ;;  %v8526_v45 = vmax.f32 %v8494_v33, 0.0  ;;  %v8525_v53 = vmax.f32 %v8493_v21, 0.0  ;;  %v8495_v49 = vadd.f32 %v13191_v51, %v8456_v11 }
 0x31a   : > { %v8084_v15 = vpop.f32.mrb[16].mxu0 }
 0x31b   : > { %8558 = vst [vmem:[%s13202_s9 + $0x70] sm:$0xff] %v8526_v45  ;;  %8557 = vst [vmem:[%s13202_s9 + $0x68] sm:$0xff] %v8525_v53  ;;  %v8527_v37 = vmax.f32 %v8495_v49, 0.0  ;;  %v8457_v60 = vadd.f32 %v8084_v15, %v13140_v48  ;;  %v10334_v35 = vpop.f32.mrb[17].mxu0 }
 0x31c   : > { %v8134_v47 = vpop.f32.mrb[16].mxu1  ;;  %v8087_v42 = vpop.f32.mrb[18].mxu0 }
 0x31d   : > { %8559 = vst [vmem:[%s13202_s9 + $0x78] sm:$0xff] %v8527_v37  ;;  %v8496_v0 = vadd.f32 %v13191_v51, %v8457_v60  ;;  %v8459_v26 = vadd.f32 %v8134_v47, %v13143_v59  ;;  %v10340_v55 = vpop.f32.mrb[17].mxu1  ;;  %v8458_v46 = vadd.f32 %v8087_v42, %v13146_v28  ;;  %v10335_v13 = vpop.f32.mrb[19].mxu0 }
 0x31e   : > { %v8137_v44 = vpop.f32.mrb[18].mxu1 }
 0x31f   : > { %v8528_v54 = vmax.f32 %v8496_v0, 0.0  ;;  %v8498_v50 = vadd.f32 %v13191_v51, %v8459_v26  ;;  %v8497_v48 = vadd.f32 %v13191_v51, %v8458_v46  ;;  %v8460_v32 = vadd.f32 %v8137_v44, %v13149_v31  ;;  %v10341_v23 = vpop.f32.mrb[19].mxu1 }
 0x321   : > { %8560 = vst [vmem:[%s13202_s9 + $0x80] sm:$0xff] %v8528_v54  ;;  %v8530_v2 = vmax.f32 %v8498_v50, 0.0  ;;  %v8529_v29 = vmax.f32 %v8497_v48, 0.0  ;;  %v8499_v59 = vadd.f32 %v13191_v51, %v8460_v32 }
 0x322   : > { %v8184_v36 = vpop.f32.mrb[20].mxu0 }
 0x323   : > { %8562 = vst [vmem:[%s13202_s9 + $0x90] sm:$0xff] %v8530_v2  ;;  %8561 = vst [vmem:[%s13202_s9 + $0x88] sm:$0xff] %v8529_v29  ;;  %v8531_v28 = vmax.f32 %v8499_v59, 0.0  ;;  %v8461_v30 = vadd.f32 %v8184_v36, %v13152_v14  ;;  %v10346_v20 = vpop.f32.mrb[21].mxu0 }
 0x324   : > { %v8234_v18 = vpop.f32.mrb[20].mxu1  ;;  %v8187_v43 = vpop.f32.mrb[22].mxu0 }
 0x325   : > { %8563 = vst [vmem:[%s13202_s9 + $0x98] sm:$0xff] %v8531_v28  ;;  %v8500_v57 = vadd.f32 %v13191_v51, %v8461_v30  ;;  %v8463_v31 = vadd.f32 %v8234_v18, %v13155_v16  ;;  %v10352_v41 = vpop.f32.mrb[21].mxu1  ;;  %v8462_v9 = vadd.f32 %v8187_v43, %v13158_v12  ;;  %v10347_v56 = vpop.f32.mrb[23].mxu0 }
 0x326   : > { %v8237_v6 = vpop.f32.mrb[22].mxu1 }
 0x327   : > { %v8532_v38 = vmax.f32 %v8500_v57, 0.0  ;;  %v8502_v22 = vadd.f32 %v13191_v51, %v8463_v31  ;;  %v8501_v14 = vadd.f32 %v13191_v51, %v8462_v9  ;;  %v8464_v19 = vadd.f32 %v8237_v6, %v13161_v27  ;;  %v10353_v39 = vpop.f32.mrb[23].mxu1 }
 0x329   : > { %8564 = vst [vmem:[%s13202_s9 + $0xa0] sm:$0xff] %v8532_v38  ;;  %v8534_v7 = vmax.f32 %v8502_v22, 0.0  ;;  %v8533_v5 = vmax.f32 %v8501_v14, 0.0  ;;  %v8503_v16 = vadd.f32 %v13191_v51, %v8464_v19 }
 0x32a   : > { %v8284_v62 = vpop.f32.mrb[24].mxu0 }
 0x32b   : > { %8566 = vst [vmem:[%s13202_s9 + $0xb0] sm:$0xff] %v8534_v7  ;;  %8565 = vst [vmem:[%s13202_s9 + $0xa8] sm:$0xff] %v8533_v5  ;;  %v8535_v12 = vmax.f32 %v8503_v16, 0.0  ;;  %v8465_v63 = vadd.f32 %v8284_v62, %v13164_v8  ;;  %v10358_v17 = vpop.f32.mrb[25].mxu0 }
 0x32c   : > { %v8334_v1 = vpop.f32.mrb[24].mxu1  ;;  %v8287_v24 = vpop.f32.mrb[26].mxu0 }
 0x32d   : > { %8567 = vst [vmem:[%s13202_s9 + $0xb8] sm:$0xff] %v8535_v12  ;;  %v8504_v4 = vadd.f32 %v13191_v51, %v8465_v63  ;;  %v8467_v27 = vadd.f32 %v8334_v1, %v13167_v52  ;;  %v10364_v33 = vpop.f32.mrb[25].mxu1  ;;  %v8466_v21 = vadd.f32 %v8287_v24, %v13170_v40  ;;  %v10359_v11 = vpop.f32.mrb[27].mxu0 }
 0x32e   : > { %v8337_v61 = vpop.f32.mrb[26].mxu1 }
 0x32f   : > { %v8536_v45 = vmax.f32 %v8504_v4, 0.0  ;;  %v8506_v53 = vadd.f32 %v13191_v51, %v8467_v27  ;;  %v8505_v8 = vadd.f32 %v13191_v51, %v8466_v21  ;;  %v8468_v49 = vadd.f32 %v8337_v61, %v13173_v25  ;;  %v10365_v15 = vpop.f32.mrb[27].mxu1 }
 0x331   : > { %8568 = vst [vmem:[%s13202_s9 + $0xc0] sm:$0xff] %v8536_v45  ;;  %v8538_v37 = vmax.f32 %v8506_v53, 0.0  ;;  %v8537_v60 = vmax.f32 %v8505_v8, 0.0  ;;  %v8507_v52 = vadd.f32 %v13191_v51, %v8468_v49 }
 0x332   : > { %v8384_v35 = vpop.f32.mrb[28].mxu0 }
 0x333   : > { %8570 = vst [vmem:[%s13202_s9 + $0xd0] sm:$0xff] %v8538_v37  ;;  %8569 = vst [vmem:[%s13202_s9 + $0xc8] sm:$0xff] %v8537_v60  ;;  %v8539_v40 = vmax.f32 %v8507_v52, 0.0  ;;  %v8469_v47 = vadd.f32 %v8384_v35, %v13176_v58  ;;  %v10370_v42 = vpop.f32.mrb[29].mxu0 }
 0x334   : > { %v8434_v0 = vpop.f32.mrb[28].mxu1  ;;  %v8387_v26 = vpop.f32.mrb[30].mxu0 }
 0x335   : > { %8571 = vst [vmem:[%s13202_s9 + $0xd8] sm:$0xff] %v8539_v40  ;;  %v8508_v25 = vadd.f32 %v13191_v51, %v8469_v47  ;;  %v8471_v55 = vadd.f32 %v8434_v0, %v13179_v34  ;;  %v10376_v46 = vpop.f32.mrb[29].mxu1  ;;  %v8470_v13 = vadd.f32 %v8387_v26, %v13182_v10  ;;  %v10371_v44 = vpop.f32.mrb[31].mxu0 }
 0x336   : > { %v8437_v54 = vpop.f32.mrb[30].mxu1 }
 0x337   : > { %v8540_v50 = vmax.f32 %v8508_v25, 0.0  ;;  %v8510_v58 = vadd.f32 %v13191_v51, %v8471_v55  ;;  %v8509_v48 = vadd.f32 %v13191_v51, %v8470_v13  ;;  %v8472_v32 = vadd.f32 %v8437_v54, %v13185_v3  ;;  %v10377_v23 = vpop.f32.mrb[31].mxu1 }
 0x339   : > { %8572 = vst [vmem:[%s13202_s9 + $0xe0] sm:$0xff] %v8540_v50  ;;  %v8542_v34 = vmax.f32 %v8510_v58, 0.0  ;;  %v8541_v10 = vmax.f32 %v8509_v48, 0.0  ;;  %v8511_v2 = vadd.f32 %v13191_v51, %v8472_v32 }
 0x33b   : > { %8574 = vst [vmem:[%s13202_s9 + $0xf0] sm:$0xff] %v8542_v34  ;;  %8573 = vst [vmem:[%s13202_s9 + $0xe8] sm:$0xff] %v8541_v10  ;;  %v8543_v3 = vmax.f32 %v8511_v2, 0.0 }
 0x33d   : > { %8575 = vst [vmem:[%s13202_s9 + $0xf8] sm:$0xff] %v8543_v3 }
 0x33e   : > { %10627 = shalt.err (!%p10624_p5)
}
 0x33f   : > { %s10628_s29 = scalar_lea.hbm %s13295_s21, 4096  ;;  %s10632_s5 = scalar_lea.hbm %s13353_s3, 8192 }
 0x340   : > { %p10629_p6 = scmp.ne.s32.totalorder %s13295_s21, %s10628_s29  ;;  %p10633_p10 = scmp.lt.u32.totalorder %s13295_s21, %s13353_s3 }
 0x341   : > { %p10634_p11 = scmp.lt.u32.totalorder %s10632_s5, %s10628_s29  ;;  %p10636_p13 = scmp.lt.u32.totalorder %s10628_s29, %s13295_s21 }
 0x342   : > { %p10630_p7 = pnand %p10629_p6, %p10759_p4 }
 0x343   : > { %p10635_p12 = por %p10634_p11, %p10633_p10 }
 0x344   : > { %p10631_p9 = pneg %p10630_p7 }
 0x345   : > { %p10637_p0 = por %p10636_p13, %p10635_p12 }
 0x347   : > { %p10638_p1 = pnand %p10637_p0, %p10631_p9 }
 0x349   : > { %10641 = shalt.err (!%p10638_p1)
}
 0x34a   : > { %s10697_s8 = smov 128   ;;  %s10698_s9 = smov 8  }
 0x34b   : > { %10379 = dma.vmem_to_hbm [thread:$0]  (%p10759_p4), %s13297_s11, 4096, %s13295_s21, %s13304_s15, %s10697_s8, %s10697_s8, %s10698_s9  }
 0x34c PF: > { %p10385_p2 = scmp.ge.s32.totalorder %s10692_s17, 2  ;;  %s8606_s10 = sand.u32 1, %s10672_s12  }
 0x34d   : > { %s8607_s18 = scalar_lea.sflag [#allocation3], %s8606_s10 }
 0x34e   : > { %p10382_p3 = pnand %p10385_p2, %p10766_p8 }
 0x350   : > { %10667 = dma.done.wait (!%p10382_p3), %s8607_s18, 4096  }
 0x351   : > { %10669 = vsyncadd (!%p10382_p3), %s8607_s18, 4294963200  ;;  %s16_s17 = sadd.s32 1, %s10692_s17   ;;  %s13565_s12 = smov %s10676_s13 }
 0x352   : > { %p13_p5 = scmp.ge.s32.totalorder %s16_s17, 4   ;;  %s13566_s13 = smov %s10680_s14 }
 0x353   : > { %s13567_s14 = smov %s10772_s25  ;;  %s13568_s15 = smov %s10688_s16 }
 0x354   : > { %s13569_s16 = smov %s13571_s20  ;;  %15 = sbr.rel (!%p13_p5) target bundleno = 4 (0x4), region = 83 }
 0x35b   :  { %8612 = vsyncpa [#allocation3], 1 }
 0x35c   :  { %8614 = vsyncpa [#allocation3 + $0x1], 1 }

</bundles_post_ra>
